<compile_context>
chip_gen: v6e
topology: v6e:2x2x1
jax: 0.10.0
libtpu: 0.0.40
codegen_flags: <defaults>
</compile_context>

<pallas_src>
import functools

import numpy as np
import jax
import jax.numpy as jnp
from jax import lax
from jax.experimental import pallas as pl
from jax.experimental.pallas import tpu as pltpu


def stn_conv_max_kernel(x_ref, w1_ref, b1_ref, w2_ref, b2_ref, w3_ref, b3_ref,
                        g_ref, *, nc, n_valid, n_total):
    """conv1/2/3 (+folded BN, ReLU) fused with the per-batch global max pool."""
    n_idx = pl.program_id(1)
    tb, tn, _ = x_ref.shape
    spb = tn // nc                      # conv3 slabs per batch element per step
    needs_mask = n_total != n_valid     # static: point axis was zero-padded

    @pl.when(n_idx == 0)
    def _init():
        # Post-ReLU activations are >= 0, so 0 is the max identity (and makes
        # masked/padded rows trivially safe).
        g_ref[...] = jnp.zeros_like(g_ref)

    def slab_max(bi, c):
        # One (nc, .) slab: conv1 -> conv2 -> conv3 -> row max.  nc is 128/256
        # so the dominant (nc,128)@(128,1024) matmul keeps the MXU well fed and
        # the (nc,1024) activation lives only inside this loop body.
        r0 = pl.multiple_of(c * nc, nc)
        xs = x_ref[bi, pl.ds(r0, nc), :]                               # (nc, K)
        h = jnp.maximum(
            jnp.dot(xs, w1_ref[...], preferred_element_type=jnp.float32)
            + b1_ref[...], 0.0)                                        # (nc, 64)
        h = jnp.maximum(
            jnp.dot(h, w2_ref[...], preferred_element_type=jnp.float32)
            + b2_ref[...], 0.0)                                        # (nc, 128)
        h3 = jnp.maximum(
            jnp.dot(h.astype(w3_ref.dtype), w3_ref[...],
                    preferred_element_type=jnp.float32)
            + b3_ref[...], 0.0)                                        # (nc, 1024)
        if needs_mask:
            pt = (n_idx * tn + r0
                  + lax.broadcasted_iota(jnp.int32, h3.shape, 0))
            h3 = jnp.where(pt < n_valid, h3, 0.0)   # padded points can't win
        return jnp.max(h3, axis=0, keepdims=True)                      # (1, 1024)

    unroll = 2 if (spb > 2 and spb % 2 == 0) else 1
    for bi in range(tb):                # small static batch tile (tb <= 8 typ.)
        def body(c, m):
            return jnp.maximum(m, slab_max(bi, c))
        m = lax.fori_loop(0, spb, body, jnp.zeros((1, 1024), jnp.float32),
                          unroll=unroll)
        # Write the per-batch running max directly into its output row.
        g_ref[bi:bi + 1, :] = jnp.maximum(g_ref[bi:bi + 1, :], m)


def stn_fc_kernel(g_ref, wf1_ref, bf1_ref, wf2_ref, bf2_ref, wf3_ref, bf3_ref,
                  out_ref):
    """fc1/fc2 (+folded BN, ReLU) + fc3 (bias folded with flattened identity)."""
    g = g_ref[...].astype(wf1_ref.dtype)
    f = jnp.maximum(
        jnp.dot(g, wf1_ref[...], preferred_element_type=jnp.float32)
        + bf1_ref[...], 0.0)
    f = jnp.maximum(
        jnp.dot(f, wf2_ref[...], preferred_element_type=jnp.float32)
        + bf2_ref[...], 0.0)
    out_ref[...] = (jnp.dot(f, wf3_ref[...], preferred_element_type=jnp.float32)
                    + bf3_ref[...])


def _const_spec(arr, n_axes):
    """Full-array block whose index_map never changes (constant weights/biases)."""
    nd = arr.ndim
    if n_axes == 1:
        return pl.BlockSpec(arr.shape, lambda b, _nd=nd: (0,) * _nd)
    return pl.BlockSpec(arr.shape, lambda b, n, _nd=nd: (0,) * _nd)


def init_params(key, k):
    """Deterministic synthetic parameters; eval-mode BN folded into weights."""
    eps = 1e-5
    keys = jax.random.split(key, 12)

    def lin(kk, out_dim, in_dim):
        kw, kb = jax.random.split(kk)
        bound = 1.0 / np.sqrt(in_dim)
        W = jax.random.uniform(kw, (out_dim, in_dim), jnp.float32, -bound, bound)
        b = jax.random.uniform(kb, (out_dim,), jnp.float32, -bound, bound)
        return W, b

    def bn(kk, dim):
        kg, kb, km, kv = jax.random.split(kk, 4)
        gamma = 1.0 + 0.1 * jax.random.normal(kg, (dim,), jnp.float32)
        beta = 0.1 * jax.random.normal(kb, (dim,), jnp.float32)
        mean = 0.1 * jax.random.normal(km, (dim,), jnp.float32)
        var = jnp.abs(jax.random.normal(kv, (dim,), jnp.float32)) + 0.5
        return gamma, beta, mean, var

    def fold(W, b, bn_params):
        gamma, beta, mean, var = bn_params
        s = gamma / jnp.sqrt(var + eps)
        Wf = (W * s[:, None]).T               # (in, out) so kernel does x @ W
        bf = (b * s + beta - mean * s)[None, :]
        return Wf, bf

    w1, b1 = fold(*lin(keys[0], 64, k), bn(keys[1], 64))
    w2, b2 = fold(*lin(keys[2], 128, 64), bn(keys[3], 128))
    w3, b3 = fold(*lin(keys[4], 1024, 128), bn(keys[5], 1024))
    wf1, bf1 = fold(*lin(keys[6], 512, 1024), bn(keys[7], 512))
    wf2, bf2 = fold(*lin(keys[8], 256, 512), bn(keys[9], 256))
    W3, B3 = lin(keys[10], k * k, 256)
    wf3 = W3.T
    bf3 = B3[None, :] + jnp.asarray(np.eye(k, dtype=np.float32).reshape(1, k * k))
    return [w1, b1, w2, b2, w3, b3, wf1, bf1, wf2, bf2, wf3, bf3]


def stnkd_forward(x, params, k, *, tb=None, tn=None, mxu_dtype=jnp.float32):
    """x: (B, N, k) -- the transpose of PyTorch's (B, k, N) Conv1d layout."""
    w1, b1, w2, b2, w3, b3, wf1, bf1, wf2, bf2, wf3, bf3 = params
    B, N, K = x.shape
    assert K == k
    kk = k * k

    # Pad the point axis to a multiple of 128 so conv3 slabs stay MXU-sized and
    # sublane-aligned for any N (padded rows are masked to 0 in-kernel).
    n_pad = -(-N // 128) * 128
    if n_pad != N:
        x = jnp.pad(x, ((0, 0), (0, n_pad - N), (0, 0)))

    # Batch tile: multiple of 8 (sublane alignment of the (tb,1024) output
    # block) or the full batch.
    if tb is None:
        tb = 8 if B % 8 == 0 else B
    assert B % tb == 0 and (tb % 8 == 0 or tb == B), (B, tb)

    # Point tile: capped at 512 so the working set stays well under v7x's
    # 64 MiB VMEM and v5e's 16 MiB scoped default.
    if tn is None:
        tn = next(t for t in (512, 256, 128) if n_pad % t == 0)
    assert n_pad % tn == 0 and tn % 128 == 0, (n_pad, tn)
    nc = 256 if tn % 256 == 0 else 128        # conv3 slab rows (MXU M dim)

    # Optional bf16 MXU inputs for the two dominant matmuls (v6e/v7x lever);
    # f32 by default to hold this script's 1e-4 tolerance.
    w3c = w3.astype(mxu_dtype)
    wf1c = wf1.astype(mxu_dtype)

    conv_params = (w1, b1, w2, b2, w3c, b3)
    kernel1 = functools.partial(stn_conv_max_kernel,
                                nc=nc, n_valid=N, n_total=n_pad)
    g = pl.pallas_call(
        kernel1,
        out_shape=jax.ShapeDtypeStruct((B, 1024), jnp.float32),
        grid=(B // tb, n_pad // tn),
        in_specs=[pl.BlockSpec((tb, tn, K), lambda b, n: (b, n, 0))]
                 + [_const_spec(p, 2) for p in conv_params],
        out_specs=pl.BlockSpec((tb, 1024), lambda b, n: (b, 0)),
        compiler_params=pltpu.CompilerParams(
            dimension_semantics=("parallel", "arbitrary"),
            vmem_limit_bytes=32 * 1024 * 1024),
    )(x, *conv_params)

    # FC head as its own tiny pallas_call: keeps the fc weights out of the conv
    # kernel's resident VMEM; the extra HBM round-trip of g is only B*4 KiB.
    tbf = 8 if B % 8 == 0 else B
    fc_params = (wf1c, bf1, wf2, bf2, wf3, bf3)
    out = pl.pallas_call(
        stn_fc_kernel,
        out_shape=jax.ShapeDtypeStruct((B, kk), jnp.float32),
        grid=(B // tbf,),
        in_specs=[pl.BlockSpec((tbf, 1024), lambda b: (b, 0))]
                 + [_const_spec(p, 1) for p in fc_params],
        out_specs=pl.BlockSpec((tbf, kk), lambda b: (b, 0)),
        compiler_params=pltpu.CompilerParams(
            dimension_semantics=("parallel",),
            vmem_limit_bytes=32 * 1024 * 1024),
    )(g, *fc_params)
    return out.reshape(B, k, k)


def stnkd_reference(x, params, k):
    w1, b1, w2, b2, w3, b3, wf1, bf1, wf2, bf2, wf3, bf3 = params
    h = jnp.maximum(x @ w1 + b1, 0.0)
    h = jnp.maximum(h @ w2 + b2, 0.0)
    h = jnp.maximum(h @ w3 + b3, 0.0)
    g = jnp.max(h, axis=1)                      # (B, 1024)
    f = jnp.maximum(g @ wf1 + bf1, 0.0)
    f = jnp.maximum(f @ wf2 + bf2, 0.0)
    f = f @ wf3 + bf3                           # bf3 already includes identity
    return f.reshape(-1, k, k)


if __name__ == "__main__":
    k = 16          # STNkd(k=16) -- small deterministic config
    B, N = 2, 250   # N not a multiple of 128 -> exercises padding + masking

    key = jax.random.PRNGKey(0)
    kx, kp = jax.random.split(key)
    # PyTorch input would be (B, k, N); our kernel layout is (B, N, k).
    x = jax.random.normal(kx, (B, N, k), dtype=jnp.float32)
    params = init_params(kp, k)

    # tn=128 -> two point-axis grid steps, exercising the revisited accumulator.
    out = stnkd_forward(x, params, k, tn=128)
    out = jax.block_until_ready(out)

    ref = stnkd_reference(x, params, k)
    assert out.shape == (B, k, k)
    np.testing.assert_allclose(np.asarray(out), np.asarray(ref), rtol=1e-4, atol=1e-4)
    print("KERNEL_OK")
</pallas_src>

<mosaic_0001>
module attributes {stable_mosaic.version = 11 : i64} {
  func.func @stn_conv_max_kernel(%arg0: i32, %arg1: i32, %arg2: memref<2x128x16xf32, #tpu.memory_space<vmem>>, %arg3: memref<16x64xf32, #tpu.memory_space<vmem>>, %arg4: memref<1x64xf32, #tpu.memory_space<vmem>>, %arg5: memref<64x128xf32, #tpu.memory_space<vmem>>, %arg6: memref<1x128xf32, #tpu.memory_space<vmem>>, %arg7: memref<128x1024xf32, #tpu.memory_space<vmem>>, %arg8: memref<1x1024xf32, #tpu.memory_space<vmem>>, %arg9: memref<2x1024xf32, #tpu.memory_space<vmem>>) attributes {dimension_semantics = [#tpu.dimension_semantics<parallel>, #tpu.dimension_semantics<arbitrary>], iteration_bounds = array<i64: 1, 2>, scalar_prefetch = 0 : i64, scratch_operands = 0 : i64, tpu.core_type = #tpu.core_type<tc>, window_params = [{transform_indices = @transform_0, window_bounds = array<i64: 2, 128, 16>}, {pipeline_mode = #tpu.pipeline_mode<synchronous>, transform_indices = @transform_1, window_bounds = array<i64: 16, 64>}, {pipeline_mode = #tpu.pipeline_mode<synchronous>, transform_indices = @transform_2, window_bounds = array<i64: 1, 64>}, {pipeline_mode = #tpu.pipeline_mode<synchronous>, transform_indices = @transform_3, window_bounds = array<i64: 64, 128>}, {pipeline_mode = #tpu.pipeline_mode<synchronous>, transform_indices = @transform_4, window_bounds = array<i64: 1, 128>}, {pipeline_mode = #tpu.pipeline_mode<synchronous>, transform_indices = @transform_5, window_bounds = array<i64: 128, 1024>}, {pipeline_mode = #tpu.pipeline_mode<synchronous>, transform_indices = @transform_6, window_bounds = array<i64: 1, 1024>}, {transform_indices = @transform_7, window_bounds = array<i64: 2, 1024>}]} {
    %c0_i32 = arith.constant 0 : i32
    %0 = arith.cmpi eq, %arg1, %c0_i32 : i32
    %1 = arith.extui %0 : i1 to i32
    %c0_i32_0 = arith.constant 0 : i32
    %2 = arith.cmpi ne, %1, %c0_i32_0 : i32
    scf.if %2 {
      %cst_59 = arith.constant 0.000000e+00 : f32
      %87 = vector.broadcast %cst_59 : f32 to vector<2x1024xf32>
      %c0_60 = arith.constant 0 : index
      %c0_61 = arith.constant 0 : index
      %88 = vector.load %arg9[%c0_60, %c0_61] : memref<2x1024xf32, #tpu.memory_space<vmem>>, vector<2x1024xf32>
      tpu.vector_store %arg9[%c0_60, %c0_61], %87 {strides = array<i32>} : memref<2x1024xf32, #tpu.memory_space<vmem>>, vector<2x1024xf32>,
    } else {
    }
    %cst = arith.constant 0.000000e+00 : f32
    %3 = vector.broadcast %cst : f32 to vector<1x1024xf32>
    %c0_i32_1 = arith.constant 0 : i32
    %c128_i32 = arith.constant 128 : i32
    %4 = arith.muli %c0_i32_1, %c128_i32 : i32
    %5 = tpu.assume_multiple %4, 128 : i32
    %c0 = arith.constant 0 : index
    %6 = arith.index_cast %5 : i32 to index
    %c0_2 = arith.constant 0 : index
    %7 = vector.load %arg2[%c0, %6, %c0_2] : memref<2x128x16xf32, #tpu.memory_space<vmem>>, vector<1x128x16xf32>
    %8 = vector.shape_cast %7 : vector<1x128x16xf32> to vector<128x16xf32>
    %c0_3 = arith.constant 0 : index
    %c0_4 = arith.constant 0 : index
    %9 = vector.load %arg3[%c0_3, %c0_4] : memref<16x64xf32, #tpu.memory_space<vmem>>, vector<16x64xf32>
    %cst_5 = arith.constant dense<0.000000e+00> : vector<128x64xf32>
    %10 = tpu.matmul %8, %9, %cst_5 {dimension_numbers = #tpu.dot_dimension_numbers<[1], [0], [0], [1], [0, 0, 1, 1], [], []>} : vector<128x16xf32>, vector<16x64xf32>, vector<128x64xf32> -> vector<128x64xf32>
    %c0_6 = arith.constant 0 : index
    %c0_7 = arith.constant 0 : index
    %11 = vector.load %arg4[%c0_6, %c0_7] : memref<1x64xf32, #tpu.memory_space<vmem>>, vector<1x64xf32>
    %12 = vector.broadcast %11 : vector<1x64xf32> to vector<128x64xf32>
    %13 = arith.addf %10, %12 : vector<128x64xf32>
    %cst_8 = arith.constant 0.000000e+00 : f32
    %14 = vector.broadcast %cst_8 : f32 to vector<128x64xf32>
    %15 = arith.maximumf %13, %14 : vector<128x64xf32>
    %c0_9 = arith.constant 0 : index
    %c0_10 = arith.constant 0 : index
    %16 = vector.load %arg5[%c0_9, %c0_10] : memref<64x128xf32, #tpu.memory_space<vmem>>, vector<64x128xf32>
    %cst_11 = arith.constant dense<0.000000e+00> : vector<128x128xf32>
    %17 = tpu.matmul %15, %16, %cst_11 {dimension_numbers = #tpu.dot_dimension_numbers<[1], [0], [0], [1], [0, 0, 1, 1], [], []>} : vector<128x64xf32>, vector<64x128xf32>, vector<128x128xf32> -> vector<128x128xf32>
    %c0_12 = arith.constant 0 : index
    %c0_13 = arith.constant 0 : index
    %18 = vector.load %arg6[%c0_12, %c0_13] : memref<1x128xf32, #tpu.memory_space<vmem>>, vector<1x128xf32>
    %19 = vector.broadcast %18 : vector<1x128xf32> to vector<128x128xf32>
    %20 = arith.addf %17, %19 : vector<128x128xf32>
    %cst_14 = arith.constant 0.000000e+00 : f32
    %21 = vector.broadcast %cst_14 : f32 to vector<128x128xf32>
    %22 = arith.maximumf %20, %21 : vector<128x128xf32>
    %c0_15 = arith.constant 0 : index
    %c0_16 = arith.constant 0 : index
    %23 = vector.load %arg7[%c0_15, %c0_16] : memref<128x1024xf32, #tpu.memory_space<vmem>>, vector<128x1024xf32>
    %cst_17 = arith.constant dense<0.000000e+00> : vector<128x1024xf32>
    %24 = tpu.matmul %22, %23, %cst_17 {dimension_numbers = #tpu.dot_dimension_numbers<[1], [0], [0], [1], [0, 0, 1, 1], [], []>} : vector<128x128xf32>, vector<128x1024xf32>, vector<128x1024xf32> -> vector<128x1024xf32>
    %c0_18 = arith.constant 0 : index
    %c0_19 = arith.constant 0 : index
    %25 = vector.load %arg8[%c0_18, %c0_19] : memref<1x1024xf32, #tpu.memory_space<vmem>>, vector<1x1024xf32>
    %26 = vector.broadcast %25 : vector<1x1024xf32> to vector<128x1024xf32>
    %27 = arith.addf %24, %26 : vector<128x1024xf32>
    %cst_20 = arith.constant 0.000000e+00 : f32
    %28 = vector.broadcast %cst_20 : f32 to vector<128x1024xf32>
    %29 = arith.maximumf %27, %28 : vector<128x1024xf32>
    %c128_i32_21 = arith.constant 128 : i32
    %30 = arith.muli %arg1, %c128_i32_21 : i32
    %31 = arith.addi %30, %5 : i32
    %32 = tpu.iota {dimensions = array<i32: 0>} : vector<128x1024xi32>
    %33 = vector.broadcast %31 : i32 to vector<128x1024xi32>
    %34 = arith.addi %33, %32 : vector<128x1024xi32>
    %c250_i32 = arith.constant 250 : i32
    %35 = vector.broadcast %c250_i32 : i32 to vector<128x1024xi32>
    %36 = arith.cmpi slt, %34, %35 : vector<128x1024xi32>
    %cst_22 = arith.constant 0.000000e+00 : f32
    %37 = vector.broadcast %cst_22 : f32 to vector<128x1024xf32>
    %38 = arith.select %36, %29, %37 : vector<128x1024xi1>, vector<128x1024xf32>
    %cst_23 = arith.constant dense<0xFF800000> : vector<1024xf32>
    %39 = vector.multi_reduction <maximumf>, %38, %cst_23 [0] : vector<128x1024xf32> to vector<1024xf32>
    %40 = vector.shape_cast %39 : vector<1024xf32> to vector<1x1024xf32>
    %41 = arith.maximumf %3, %40 : vector<1x1024xf32>
    %c1_i32 = arith.constant 1 : i32
    %c0_24 = arith.constant 0 : index
    %c0_25 = arith.constant 0 : index
    %42 = vector.load %arg9[%c0_24, %c0_25] : memref<2x1024xf32, #tpu.memory_space<vmem>>, vector<1x1024xf32>
    %43 = arith.maximumf %42, %41 : vector<1x1024xf32>
    %c0_26 = arith.constant 0 : index
    %c0_27 = arith.constant 0 : index
    %44 = vector.load %arg9[%c0_26, %c0_27] : memref<2x1024xf32, #tpu.memory_space<vmem>>, vector<1x1024xf32>
    tpu.vector_store %arg9[%c0_26, %c0_27], %43 {strides = array<i32>} : memref<2x1024xf32, #tpu.memory_space<vmem>>, vector<1x1024xf32>,
    %cst_28 = arith.constant 0.000000e+00 : f32
    %45 = vector.broadcast %cst_28 : f32 to vector<1x1024xf32>
    %c0_i32_29 = arith.constant 0 : i32
    %c128_i32_30 = arith.constant 128 : i32
    %46 = arith.muli %c0_i32_29, %c128_i32_30 : i32
    %47 = tpu.assume_multiple %46, 128 : i32
    %c1 = arith.constant 1 : index
    %48 = arith.index_cast %47 : i32 to index
    %c0_31 = arith.constant 0 : index
    %49 = vector.load %arg2[%c1, %48, %c0_31] : memref<2x128x16xf32, #tpu.memory_space<vmem>>, vector<1x128x16xf32>
    %50 = vector.shape_cast %49 : vector<1x128x16xf32> to vector<128x16xf32>
    %c0_32 = arith.constant 0 : index
    %c0_33 = arith.constant 0 : index
    %51 = vector.load %arg3[%c0_32, %c0_33] : memref<16x64xf32, #tpu.memory_space<vmem>>, vector<16x64xf32>
    %cst_34 = arith.constant dense<0.000000e+00> : vector<128x64xf32>
    %52 = tpu.matmul %50, %51, %cst_34 {dimension_numbers = #tpu.dot_dimension_numbers<[1], [0], [0], [1], [0, 0, 1, 1], [], []>} : vector<128x16xf32>, vector<16x64xf32>, vector<128x64xf32> -> vector<128x64xf32>
    %c0_35 = arith.constant 0 : index
    %c0_36 = arith.constant 0 : index
    %53 = vector.load %arg4[%c0_35, %c0_36] : memref<1x64xf32, #tpu.memory_space<vmem>>, vector<1x64xf32>
    %54 = vector.broadcast %53 : vector<1x64xf32> to vector<128x64xf32>
    %55 = arith.addf %52, %54 : vector<128x64xf32>
    %cst_37 = arith.constant 0.000000e+00 : f32
    %56 = vector.broadcast %cst_37 : f32 to vector<128x64xf32>
    %57 = arith.maximumf %55, %56 : vector<128x64xf32>
    %c0_38 = arith.constant 0 : index
    %c0_39 = arith.constant 0 : index
    %58 = vector.load %arg5[%c0_38, %c0_39] : memref<64x128xf32, #tpu.memory_space<vmem>>, vector<64x128xf32>
    %cst_40 = arith.constant dense<0.000000e+00> : vector<128x128xf32>
    %59 = tpu.matmul %57, %58, %cst_40 {dimension_numbers = #tpu.dot_dimension_numbers<[1], [0], [0], [1], [0, 0, 1, 1], [], []>} : vector<128x64xf32>, vector<64x128xf32>, vector<128x128xf32> -> vector<128x128xf32>
    %c0_41 = arith.constant 0 : index
    %c0_42 = arith.constant 0 : index
    %60 = vector.load %arg6[%c0_41, %c0_42] : memref<1x128xf32, #tpu.memory_space<vmem>>, vector<1x128xf32>
    %61 = vector.broadcast %60 : vector<1x128xf32> to vector<128x128xf32>
    %62 = arith.addf %59, %61 : vector<128x128xf32>
    %cst_43 = arith.constant 0.000000e+00 : f32
    %63 = vector.broadcast %cst_43 : f32 to vector<128x128xf32>
    %64 = arith.maximumf %62, %63 : vector<128x128xf32>
    %c0_44 = arith.constant 0 : index
    %c0_45 = arith.constant 0 : index
    %65 = vector.load %arg7[%c0_44, %c0_45] : memref<128x1024xf32, #tpu.memory_space<vmem>>, vector<128x1024xf32>
    %cst_46 = arith.constant dense<0.000000e+00> : vector<128x1024xf32>
    %66 = tpu.matmul %64, %65, %cst_46 {dimension_numbers = #tpu.dot_dimension_numbers<[1], [0], [0], [1], [0, 0, 1, 1], [], []>} : vector<128x128xf32>, vector<128x1024xf32>, vector<128x1024xf32> -> vector<128x1024xf32>
    %c0_47 = arith.constant 0 : index
    %c0_48 = arith.constant 0 : index
    %67 = vector.load %arg8[%c0_47, %c0_48] : memref<1x1024xf32, #tpu.memory_space<vmem>>, vector<1x1024xf32>
    %68 = vector.broadcast %67 : vector<1x1024xf32> to vector<128x1024xf32>
    %69 = arith.addf %66, %68 : vector<128x1024xf32>
    %cst_49 = arith.constant 0.000000e+00 : f32
    %70 = vector.broadcast %cst_49 : f32 to vector<128x1024xf32>
    %71 = arith.maximumf %69, %70 : vector<128x1024xf32>
    %c128_i32_50 = arith.constant 128 : i32
    %72 = arith.muli %arg1, %c128_i32_50 : i32
    %73 = arith.addi %72, %47 : i32
    %74 = tpu.iota {dimensions = array<i32: 0>} : vector<128x1024xi32>
    %75 = vector.broadcast %73 : i32 to vector<128x1024xi32>
    %76 = arith.addi %75, %74 : vector<128x1024xi32>
    %c250_i32_51 = arith.constant 250 : i32
    %77 = vector.broadcast %c250_i32_51 : i32 to vector<128x1024xi32>
    %78 = arith.cmpi slt, %76, %77 : vector<128x1024xi32>
    %cst_52 = arith.constant 0.000000e+00 : f32
    %79 = vector.broadcast %cst_52 : f32 to vector<128x1024xf32>
    %80 = arith.select %78, %71, %79 : vector<128x1024xi1>, vector<128x1024xf32>
    %cst_53 = arith.constant dense<0xFF800000> : vector<1024xf32>
    %81 = vector.multi_reduction <maximumf>, %80, %cst_53 [0] : vector<128x1024xf32> to vector<1024xf32>
    %82 = vector.shape_cast %81 : vector<1024xf32> to vector<1x1024xf32>
    %83 = arith.maximumf %45, %82 : vector<1x1024xf32>
    %c1_i32_54 = arith.constant 1 : i32
    %c1_55 = arith.constant 1 : index
    %c0_56 = arith.constant 0 : index
    %84 = vector.load %arg9[%c1_55, %c0_56] : memref<2x1024xf32, #tpu.memory_space<vmem>>, vector<1x1024xf32>
    %85 = arith.maximumf %84, %83 : vector<1x1024xf32>
    %c1_57 = arith.constant 1 : index
    %c0_58 = arith.constant 0 : index
    %86 = vector.load %arg9[%c1_57, %c0_58] : memref<2x1024xf32, #tpu.memory_space<vmem>>, vector<1x1024xf32>
    tpu.vector_store %arg9[%c1_57, %c0_58], %85 {strides = array<i32>} : memref<2x1024xf32, #tpu.memory_space<vmem>>, vector<1x1024xf32>,
    return
  }
  func.func @transform_0(%arg0: i32, %arg1: i32) -> (i32, i32, i32) {
    %c0_i32 = arith.constant 0 : i32
    %c0_i32_0 = arith.constant 0 : i32
    return %arg0, %arg1, %c0_i32 : i32, i32, i32
  }
  func.func @transform_1(%arg0: i32, %arg1: i32) -> (i32, i32) {
    %c0_i32 = arith.constant 0 : i32
    %c0_i32_0 = arith.constant 0 : i32
    %c0_i32_1 = arith.constant 0 : i32
    return %c0_i32, %c0_i32_0 : i32, i32
  }
  func.func @transform_2(%arg0: i32, %arg1: i32) -> (i32, i32) {
    %c0_i32 = arith.constant 0 : i32
    %c0_i32_0 = arith.constant 0 : i32
    %c0_i32_1 = arith.constant 0 : i32
    return %c0_i32, %c0_i32_0 : i32, i32
  }
  func.func @transform_3(%arg0: i32, %arg1: i32) -> (i32, i32) {
    %c0_i32 = arith.constant 0 : i32
    %c0_i32_0 = arith.constant 0 : i32
    %c0_i32_1 = arith.constant 0 : i32
    return %c0_i32, %c0_i32_0 : i32, i32
  }
  func.func @transform_4(%arg0: i32, %arg1: i32) -> (i32, i32) {
    %c0_i32 = arith.constant 0 : i32
    %c0_i32_0 = arith.constant 0 : i32
    %c0_i32_1 = arith.constant 0 : i32
    return %c0_i32, %c0_i32_0 : i32, i32
  }
  func.func @transform_5(%arg0: i32, %arg1: i32) -> (i32, i32) {
    %c0_i32 = arith.constant 0 : i32
    %c0_i32_0 = arith.constant 0 : i32
    %c0_i32_1 = arith.constant 0 : i32
    return %c0_i32, %c0_i32_0 : i32, i32
  }
  func.func @transform_6(%arg0: i32, %arg1: i32) -> (i32, i32) {
    %c0_i32 = arith.constant 0 : i32
    %c0_i32_0 = arith.constant 0 : i32
    %c0_i32_1 = arith.constant 0 : i32
    return %c0_i32, %c0_i32_0 : i32, i32
  }
  func.func @transform_7(%arg0: i32, %arg1: i32) -> (i32, i32) {
    %c0_i32 = arith.constant 0 : i32
    %c0_i32_0 = arith.constant 0 : i32
    return %arg0, %c0_i32 : i32, i32
  }
}

</mosaic_0001>

<bundles_post_ra>
// kernel: tpu_custom_call.1
= control target key start
LH: loop header
LB: loop body
LE: loop exit
PB: predicated region body
PF: predicated region fallthrough
CT: control target
= control target key end

     0   :  { %12 = vsyncpa [#allocation4], 0  ;;  %s6567_s0 = inlined_call_operand.vmem [shape: f32[2,256,16], index: 0, kind: input, shape index: {}]   ;;  %s6568_s1 = inlined_call_operand.vmem [shape: f32[16,64], index: 1, kind: input, shape index: {}]   ;;  %s6569_s2 = inlined_call_operand.vmem [shape: f32[1,64], index: 2, kind: input, shape index: {}]   ;;  %s6570_s3 = inlined_call_operand.vmem [shape: f32[64,128], index: 3, kind: input, shape index: {}]   ;;  %s6571_s4 = inlined_call_operand.vmem [shape: f32[1,128], index: 4, kind: input, shape index: {}]   ;;  %s6572_s5 = inlined_call_operand.hbm [shape: f32[128,1024], index: 5, kind: input, shape index: {}]   ;;  %s6573_s6 = inlined_call_operand.vmem [shape: f32[1,1024], index: 6, kind: input, shape index: {}]   ;;  %s6574_s7 = inlined_call_operand.hbm [shape: f32[2,1024], index: 7, kind: output, shape index: {}]  }
   0x1   :  { %13 = vsyncpa [#allocation5], 0  ;;  %s4700_s24 = smov 0   ;;  %s4702_s25 = smov 0  }
   0x2   :  { %s4704_s26 = smov 0   ;;  %s4706_s27 = smov 0  }
   0x3   :  { %s4708_s28 = smov 0  }
   0x4 LB: > { %s4139_s29 = sadd.s32 4294967295, %s4651_s28   ;;  %s28_s30 = sadd.s32 1, %s4647_s27  ;;  %s4651_s28 = sphi %s4708_s28, %s19_s28   ;;  %s4647_s27 = sphi %s4706_s27, %s6636_s27   ;;  %s4643_s26 = sphi %s4704_s26, %s6635_s26   ;;  %s4639_s25 = sphi %s4702_s25, %s6634_s25   ;;  %s4635_s24 = sphi %s4700_s24, %s6633_s24  }
   0x5   : > { %p29_p0 = scmp.ge.s32.totalorder %s28_s30, 2  ;;  %s40_s8 = sadd.s32 1, %s4639_s25 }
   0x6   : > { %p47_p1 = scmp.ne.s32.totalorder %s4639_s25, %s4635_s24  ;;  %p48_p2 = scmp.eq.s32.totalorder %s4651_s28, 0 }
   0x7   : > { %s6638_s30 = smov (%p29_p0, %s28_s30), 0  ;;  %p4140_p4 = scmp.ge.s32.totalorder %s4651_s28, 1 }
   0x8   : > { %p4733_p3 = por %p48_p2, %p47_p1  ;;  %s36_s10 = ssub.s32 %s4647_s27, %s6638_s30 }
   0x9   : > { %p216_p5 = scmp.lt.s32.totalorder %s4651_s28, 3  ;;  %p38_p6 = scmp.eq.s32.totalorder %s36_s10, 0 }
   0xa   : > { %p4747_p8 = scmp.eq.s32.totalorder %s4139_s29, 0  ;;  %s4653_s14 = smov [#allocation3]  }
   0xb   : > { %p4741_p7 = pnand %p4140_p4, %p216_p5  ;;  %s240_s15 = sshll.u32 %s4653_s14, 4  ;;  %s241_s15 = int_to_ptr.vmem [resolvable:$true] %s240_s15 }
   0xc   : > { %s4752_s13 = scalar_select %p38_p6, %s4639_s25, %s40_s8  }
   0xd   : > { %p4500_p9 = pneg %p4741_p7  ;;  %s4566_s16 = scalar_lea.vmem %s241_s15, 16384 }
   0xe   : > { %p4567_p12 = scmp.ne.s32.totalorder %s241_s15, %s4566_s16  ;;  %p4574_p1 = scmp.lt.s32.totalorder %s241_s15, %s241_s15 }
   0xf   : > { %p4501_p10 = pnand %p4747_p8, %p4500_p9  ;;  %p4575_p2 = scmp.lt.s32.totalorder %s4566_s16, %s4566_s16 }
  0x11   : > { %p4557_p11 = pneg %p4501_p10  ;;  %p4576_p4 = por %p4575_p2, %p4574_p1 }
  0x13   : > { %p4569_p13 = pnand %p4567_p12, %p4557_p11 }
  0x15   : > { %p4570_p0 = pneg %p4569_p13 }
  0x17   : > { %p4577_p5 = pnand %p4576_p4, %p4570_p0 }
  0x19   : > { %4580 = shalt.err (!%p4577_p5)
}
  0x1a   : > { %s4654_s17 = smov 1024   ;;  %s4655_s18 = smov 64  }
  0x1b   : > { %4503 = dma.hbm_to_vmem [thread:$0]  (!%p4501_p10), %s6572_s5, 16384, %s241_s15, [#allocation4], %s4654_s17, %s4654_s17, %s4655_s18  }
  0x1c   : > { %p4142_p6 = scmp.ge.s32.totalorder %s4651_s28, 2 }
  0x1e   : > { %253 = sbr.rel (%p4142_p6) target bundleno = 55 (0x37), region = 40 }
  0x23   : > { %256 = sbr.rel (!%p4733_p3) target bundleno = 55 (0x37), region = 44  ;;  %s258_s21 = sand.u32 (%p4733_p3), 1, %s4639_s25  }
  0x24   : > { %s4239_s22 = sshll.u32 (%p4733_p3), %s4647_s27, 7  ;;  %s4143_s23 = sshll.u32 (%p4733_p3), %s258_s21, 8 }
  0x25   : > { %s4769_s14 = scalar_lea.vmem (%p4733_p3), %s6567_s0, %s4239_s22  ;;  %s4774_s9 = scalar_lea.vmem (%p4733_p3), [#allocation2], %s4143_s23 }
  0x26   : > { %v357_v0 = vld [vmem:[%s4769_s14] sm:$0xff] (%p4733_p3)  ;;  %v359_v1 = vld [vmem:[%s4769_s14 + $0x8] sm:$0xff] (%p4733_p3)  ;;  %v361_v2 = vld [vmem:[%s4769_s14 + $0x10] sm:$0xff] (%p4733_p3) }
  0x27   : > { %358 = vst [vmem:[%s4774_s9] sm:$0xff] (%p4733_p3), %v357_v0  ;;  %360 = vst [vmem:[%s4774_s9 + $0x8] sm:$0xff] (%p4733_p3), %v359_v1  ;;  %v363_v3 = vld [vmem:[%s4769_s14 + $0x18] sm:$0xff] (%p4733_p3)  ;;  %v365_v4 = vld [vmem:[%s4769_s14 + $0x20] sm:$0xff] (%p4733_p3) }
  0x28   : > { %362 = vst [vmem:[%s4774_s9 + $0x10] sm:$0xff] %v361_v2  ;;  %v367_v5 = vld [vmem:[%s4769_s14 + $0x28] sm:$0xff]  ;;  %364 = vst [vmem:[%s4774_s9 + $0x18] sm:$0xff] %v363_v3  ;;  %v369_v6 = vld [vmem:[%s4769_s14 + $0x30] sm:$0xff] }
  0x29   : > { %366 = vst [vmem:[%s4774_s9 + $0x20] sm:$0xff] %v365_v4  ;;  %368 = vst [vmem:[%s4774_s9 + $0x28] sm:$0xff] %v367_v5  ;;  %v371_v7 = vld [vmem:[%s4769_s14 + $0x38] sm:$0xff]  ;;  %v373_v8 = vld [vmem:[%s4769_s14 + $0x40] sm:$0xff] }
  0x2a   : > { %370 = vst [vmem:[%s4774_s9 + $0x30] sm:$0xff] %v369_v6  ;;  %372 = vst [vmem:[%s4774_s9 + $0x38] sm:$0xff] %v371_v7  ;;  %v375_v9 = vld [vmem:[%s4769_s14 + $0x48] sm:$0xff]  ;;  %v377_v10 = vld [vmem:[%s4769_s14 + $0x50] sm:$0xff] }
  0x2b   : > { %374 = vst [vmem:[%s4774_s9 + $0x40] sm:$0xff] %v373_v8  ;;  %v379_v11 = vld [vmem:[%s4769_s14 + $0x58] sm:$0xff]  ;;  %376 = vst [vmem:[%s4774_s9 + $0x48] sm:$0xff] %v375_v9  ;;  %v381_v12 = vld [vmem:[%s4769_s14 + $0x60] sm:$0xff] }
  0x2c   : > { %378 = vst [vmem:[%s4774_s9 + $0x50] sm:$0xff] %v377_v10  ;;  %380 = vst [vmem:[%s4774_s9 + $0x58] sm:$0xff] %v379_v11  ;;  %v383_v13 = vld [vmem:[%s4769_s14 + $0x68] sm:$0xff]  ;;  %v385_v14 = vld [vmem:[%s4769_s14 + $0x70] sm:$0xff] }
  0x2d   : > { %382 = vst [vmem:[%s4774_s9 + $0x60] sm:$0xff] %v381_v12  ;;  %384 = vst [vmem:[%s4774_s9 + $0x68] sm:$0xff] %v383_v13  ;;  %v387_v15 = vld [vmem:[%s4769_s14 + $0x78] sm:$0xff]  ;;  %v389_v16 = vld [vmem:[%s4769_s14 + $0x100] sm:$0xff] }
  0x2e   : > { %386 = vst [vmem:[%s4774_s9 + $0x70] sm:$0xff] %v385_v14  ;;  %v391_v17 = vld [vmem:[%s4769_s14 + $0x108] sm:$0xff]  ;;  %388 = vst [vmem:[%s4774_s9 + $0x78] sm:$0xff] %v387_v15  ;;  %v393_v18 = vld [vmem:[%s4769_s14 + $0x110] sm:$0xff] }
  0x2f   : > { %390 = vst [vmem:[%s4774_s9 + $0x80] sm:$0xff] %v389_v16  ;;  %392 = vst [vmem:[%s4774_s9 + $0x88] sm:$0xff] %v391_v17  ;;  %v395_v19 = vld [vmem:[%s4769_s14 + $0x118] sm:$0xff]  ;;  %v397_v20 = vld [vmem:[%s4769_s14 + $0x120] sm:$0xff] }
  0x30   : > { %394 = vst [vmem:[%s4774_s9 + $0x90] sm:$0xff] %v393_v18  ;;  %396 = vst [vmem:[%s4774_s9 + $0x98] sm:$0xff] %v395_v19  ;;  %v399_v21 = vld [vmem:[%s4769_s14 + $0x128] sm:$0xff]  ;;  %v401_v22 = vld [vmem:[%s4769_s14 + $0x130] sm:$0xff] }
  0x31   : > { %398 = vst [vmem:[%s4774_s9 + $0xa0] sm:$0xff] %v397_v20  ;;  %v403_v23 = vld [vmem:[%s4769_s14 + $0x138] sm:$0xff]  ;;  %400 = vst [vmem:[%s4774_s9 + $0xa8] sm:$0xff] %v399_v21  ;;  %v405_v24 = vld [vmem:[%s4769_s14 + $0x140] sm:$0xff] }
  0x32   : > { %402 = vst [vmem:[%s4774_s9 + $0xb0] sm:$0xff] %v401_v22  ;;  %404 = vst [vmem:[%s4774_s9 + $0xb8] sm:$0xff] %v403_v23  ;;  %v407_v25 = vld [vmem:[%s4769_s14 + $0x148] sm:$0xff]  ;;  %v409_v26 = vld [vmem:[%s4769_s14 + $0x150] sm:$0xff] }
  0x33   : > { %406 = vst [vmem:[%s4774_s9 + $0xc0] sm:$0xff] %v405_v24  ;;  %408 = vst [vmem:[%s4774_s9 + $0xc8] sm:$0xff] %v407_v25  ;;  %v411_v27 = vld [vmem:[%s4769_s14 + $0x158] sm:$0xff]  ;;  %v413_v28 = vld [vmem:[%s4769_s14 + $0x160] sm:$0xff] }
  0x34   : > { %410 = vst [vmem:[%s4774_s9 + $0xd0] sm:$0xff] %v409_v26  ;;  %v415_v29 = vld [vmem:[%s4769_s14 + $0x168] sm:$0xff]  ;;  %412 = vst [vmem:[%s4774_s9 + $0xd8] sm:$0xff] %v411_v27  ;;  %v417_v30 = vld [vmem:[%s4769_s14 + $0x170] sm:$0xff] }
  0x35   : > { %414 = vst [vmem:[%s4774_s9 + $0xe0] sm:$0xff] %v413_v28  ;;  %416 = vst [vmem:[%s4774_s9 + $0xe8] sm:$0xff] %v415_v29  ;;  %v419_v31 = vld [vmem:[%s4769_s14 + $0x178] sm:$0xff] }
  0x36   : > { %418 = vst [vmem:[%s4774_s9 + $0xf0] sm:$0xff] %v417_v30  ;;  %420 = vst [vmem:[%s4774_s9 + $0xf8] sm:$0xff] %v419_v31 }
  0x37 PF: > { %429 = sbr.rel (%p4741_p7) target bundleno = 1374 (0x55e), region = 82  ;;  %s432_s15 = sand.u32 (!%p4741_p7), 1, %s4635_s24  }
  0x38   : > { %s4147_s16 = sshll.u32 (!%p4741_p7), %s432_s15, 8 }
  0x39   : > { %s4840_s17 = scalar_lea.vmem (!%p4741_p7), [#allocation2], %s4147_s16 }
  0x3c   : > { %4626 = dma.done.wait (%p4747_p8), [#allocation4], 16384  }
  0x3d   : > { %4628 = vsyncadd (%p4747_p8), [#allocation4], 4294950912  ;;  %p4149_p3 = scmp.ne.s32.totalorder %s4643_s26, 0 }
  0x3f   : > { %467 = sbr.rel (%p4149_p3) target bundleno = 70 (0x46), region = 94 }
  0x44   : > { %v4656_v32 = vmov 0.0  }
  0x45   : > { %468 = vst [vmem:[#allocation6] sm:$0xff] %v4656_v32  ;;  %469 = vst [vmem:[#allocation6 + $0x8] sm:$0xff] %v4656_v32 }
  0x46 PF: > { %v487_v33 = vld [vmem:[%s6568_s1 + $0x8] sm:$0xff]  ;;  %v486_v34 = vld [vmem:[%s6568_s1] sm:$0xff]  ;;  %vm495_vm0 = vcmask 130048   ;;  %v472_v37 = vld [vmem:[%s4840_s17 + $0x10] sm:$0xff]  ;;  %vm6575_vm1 = vcmask 523264   ;;  %s4184_s20 = sshll.u32 %s4643_s26, 7 }
  0x47   : > { %v470_v35 = vld [vmem:[%s4840_s17] sm:$0xff]  ;;  %4324 = vmatprep.subr.mxu0 %v487_v33  ;;  %v471_v36 = vld [vmem:[%s4840_s17 + $0x8] sm:$0xff]  ;;  %v473_v38 = vld [vmem:[%s4840_s17 + $0x18] sm:$0xff]  ;;  %p6537_p7 = scmp.eq.s32.totalorder %s4139_s29, 1 }
  0x48   : > { %4328 = vmatprep.mubr.msk.f32.mxu0 %vm495_vm0, %v470_v35  ;;  %4325 = vmatpush3.msra.mxu0 %v487_v33  ;;  %v712_v39 = vld [vmem:[%s6570_s3 + $0x38] sm:$0xff]  ;;  %v711_v40 = vld [vmem:[%s6570_s3 + $0x30] sm:$0xff]  ;;  %v474_v41 = vld [vmem:[%s4840_s17 + $0x20] sm:$0xff] }
  0x49   : > { %4326 = vmatprep.subr.mxu0 %v486_v34  ;;  %4352 = vmatprep.subr.mxu1 %v712_v39  ;;  %v710_v42 = vld [vmem:[%s6570_s3 + $0x28] sm:$0xff]  ;;  %v709_v44 = vld [vmem:[%s6570_s3 + $0x20] sm:$0xff]  ;;  %v476_v45 = vld [vmem:[%s4840_s17 + $0x30] sm:$0xff] }
  0x4a   : > { %4327 = vmatpush3.msra.mxu0 %v486_v34  ;;  %4353 = vmatpush3.msra.mxu1 %v712_v39  ;;  %v475_v43 = vld [vmem:[%s4840_s17 + $0x28] sm:$0xff]  ;;  %v477_v46 = vld [vmem:[%s4840_s17 + $0x38] sm:$0xff]  ;;  %v478_v47 = vld [vmem:[%s4840_s17 + $0x40] sm:$0xff] }
  0x4b   : > { %4329 = vmatmul.mubr.msk.f32.vlgmr.msra.gmra.mxu0 %vm495_vm0, %v471_v36  ;;  %4354 = vmatprep.subr.mxu1 %v711_v40  ;;  %v479_v48 = vld [vmem:[%s4840_s17 + $0x48] sm:$0xff]  ;;  %v480_v49 = vld [vmem:[%s4840_s17 + $0x50] sm:$0xff]  ;;  %v481_v50 = vld [vmem:[%s4840_s17 + $0x58] sm:$0xff] }
  0x4c   : > { %4331 = vmatprep.mubr.msk.f32.mxu0 %vm495_vm0, %v472_v37  ;;  %4355 = vmatpush3.msra.mxu1 %v711_v40  ;;  %v482_v51 = vld [vmem:[%s4840_s17 + $0x60] sm:$0xff]  ;;  %v483_v52 = vld [vmem:[%s4840_s17 + $0x68] sm:$0xff]  ;;  %v484_v53 = vld [vmem:[%s4840_s17 + $0x70] sm:$0xff] }
  0x4d   : > { %4356 = vmatprep.subr.mxu1 %v710_v42  ;;  %v485_v54 = vld [vmem:[%s4840_s17 + $0x78] sm:$0xff]  ;;  %v707_v56 = vld [vmem:[%s6570_s3 + $0x10] sm:$0xff]  ;;  %v706_v57 = vld [vmem:[%s6570_s3 + $0x8] sm:$0xff] }
  0x4e   : > { %4357 = vmatpush3.msra.mxu1 %v710_v42  ;;  %v708_v55 = vld [vmem:[%s6570_s3 + $0x18] sm:$0xff]  ;;  %v705_v58 = vld [vmem:[%s6570_s3] sm:$0xff]  ;;  %v1051_v59 = vld [vmem:[#allocation3 + $0x3c8] sm:$0xff] }
  0x4f   : > { %4332 = vmatmul.mubr.msk.f32.gmra.mxu0 %vm495_vm0, %v473_v38  ;;  %4358 = vmatprep.subr.mxu1 %v709_v44  ;;  %v1050_v60 = vld [vmem:[#allocation3 + $0x3c0] sm:$0xff]  ;;  %v1053_v61 = vld [vmem:[#allocation3 + $0x3d8] sm:$0xff]  ;;  %v1043_v62 = vld [vmem:[#allocation3 + $0x388] sm:$0xff] }
  0x50   : > { %4334 = vmatprep.mubr.msk.f32.mxu0 %vm495_vm0, %v474_v41  ;;  %4359 = vmatpush3.msra.mxu1 %v709_v44  ;;  %v1042_v63 = vld [vmem:[#allocation3 + $0x380] sm:$0xff]  ;;  %v1035_v0 = vld [vmem:[#allocation3 + $0x348] sm:$0xff]  ;;  %v1052_v32 = vld [vmem:[#allocation3 + $0x3d0] sm:$0xff] }
  0x51   : > { %4360 = vmatprep.subr.mxu1 %v708_v55  ;;  %1100 = vmatprep.subr.mxu0 %v1051_v59  ;;  %v1034_v1 = vld [vmem:[#allocation3 + $0x340] sm:$0xff]  ;;  %v1027_v2 = vld [vmem:[#allocation3 + $0x308] sm:$0xff]  ;;  %v1045_v34 = vld [vmem:[#allocation3 + $0x398] sm:$0xff] }
  0x52   : > { %4361 = vmatpush3.msra.mxu1 %v708_v55  ;;  %1101 = vmatpush1.msra.mxu0 %v1050_v60  ;;  %v1026_v3 = vld [vmem:[#allocation3 + $0x300] sm:$0xff]  ;;  %v1019_v4 = vld [vmem:[#allocation3 + $0x2c8] sm:$0xff]  ;;  %v1044_v37 = vld [vmem:[#allocation3 + $0x390] sm:$0xff] }
  0x53   : > { %4335 = vmatmul.mubr.msk.f32.gmra.mxu0 %vm495_vm0, %v475_v43  ;;  %4362 = vmatprep.subr.mxu1 %v707_v56  ;;  %v1018_v5 = vld [vmem:[#allocation3 + $0x2c0] sm:$0xff]  ;;  %v1011_v6 = vld [vmem:[#allocation3 + $0x288] sm:$0xff]  ;;  %v1037_v40 = vld [vmem:[#allocation3 + $0x358] sm:$0xff] }
  0x54   : > { %4337 = vmatprep.mubr.msk.f32.mxu0 %vm495_vm0, %v476_v45  ;;  %4363 = vmatpush3.msra.mxu1 %v707_v56  ;;  %v1010_v7 = vld [vmem:[#allocation3 + $0x280] sm:$0xff]  ;;  %v1003_v8 = vld [vmem:[#allocation3 + $0x248] sm:$0xff]  ;;  %v1036_v42 = vld [vmem:[#allocation3 + $0x350] sm:$0xff] }
  0x55   : > { %4364 = vmatprep.subr.mxu1 %v706_v57  ;;  %1102 = vmatprep.subr.mxu0 %v1043_v62  ;;  %v1002_v9 = vld [vmem:[#allocation3 + $0x240] sm:$0xff]  ;;  %v995_v10 = vld [vmem:[#allocation3 + $0x208] sm:$0xff]  ;;  %v1029_v44 = vld [vmem:[#allocation3 + $0x318] sm:$0xff] }
  0x56   : > { %4365 = vmatpush3.msra.mxu1 %v706_v57  ;;  %1103 = vmatpush1.msra.mxu0 %v1042_v63  ;;  %v994_v11 = vld [vmem:[#allocation3 + $0x200] sm:$0xff]  ;;  %v987_v12 = vld [vmem:[#allocation3 + $0x1c8] sm:$0xff]  ;;  %v1012_v57 = vld [vmem:[#allocation3 + $0x290] sm:$0xff] }
  0x57   : > { %4338 = vmatmul.mubr.msk.f32.gmra.mxu0 %vm495_vm0, %v477_v46  ;;  %4366 = vmatprep.subr.mxu1 %v705_v58  ;;  %v986_v13 = vld [vmem:[#allocation3 + $0x1c0] sm:$0xff]  ;;  %v979_v14 = vld [vmem:[#allocation3 + $0x188] sm:$0xff]  ;;  %v1005_v60 = vld [vmem:[#allocation3 + $0x258] sm:$0xff] }
  0x58   : > { %4340 = vmatprep.mubr.msk.f32.mxu0 %vm495_vm0, %v478_v47  ;;  %4367 = vmatpush3.msra.mxu1 %v705_v58  ;;  %v978_v15 = vld [vmem:[#allocation3 + $0x180] sm:$0xff]  ;;  %v971_v16 = vld [vmem:[#allocation3 + $0x148] sm:$0xff]  ;;  %v1028_v47 = vld [vmem:[#allocation3 + $0x310] sm:$0xff] }
  0x59   : > { %1261 = vmatprep.subr.mxu1 %v1053_v61  ;;  %1104 = vmatprep.subr.mxu0 %v1035_v0  ;;  %v970_v17 = vld [vmem:[#allocation3 + $0x140] sm:$0xff]  ;;  %v963_v18 = vld [vmem:[#allocation3 + $0x108] sm:$0xff]  ;;  %v1004_v62 = vld [vmem:[#allocation3 + $0x250] sm:$0xff] }
  0x5a   : > { %1105 = vmatpush1.msra.mxu0 %v1034_v1  ;;  %v962_v19 = vld [vmem:[#allocation3 + $0x100] sm:$0xff]  ;;  %v955_v20 = vld [vmem:[#allocation3 + $0xc8] sm:$0xff]  ;;  %v997_v0 = vld [vmem:[#allocation3 + $0x218] sm:$0xff] }
  0x5b   : > { %4341 = vmatmul.mubr.msk.f32.gmra.mxu0 %vm495_vm0, %v479_v48  ;;  %1106 = vmatprep.subr.mxu0 %v1027_v2  ;;  %v954_v21 = vld [vmem:[#allocation3 + $0xc0] sm:$0xff] }
  0x5c   : > { %4343 = vmatprep.mubr.msk.f32.mxu0 %vm495_vm0, %v480_v49  ;;  %1107 = vmatpush1.msra.mxu0 %v1026_v3  ;;  %v4912_v22 = vld [vmem:[%s6569_s2] ss:$0 sm:$0xff]  ;;  %v996_v3 = vld [vmem:[#allocation3 + $0x210] sm:$0xff] }
  0x5d   : > { %1108 = vmatprep.subr.mxu0 %v1019_v4 }
  0x5e   : > { %1109 = vmatpush1.msra.mxu0 %v1018_v5 }
  0x5f   : > { %4344 = vmatmul.mubr.msk.f32.gmra.mxu0 %vm495_vm0, %v481_v50  ;;  %1110 = vmatprep.subr.mxu0 %v1011_v6  ;;  %v1021_v50 = vld [vmem:[#allocation3 + $0x2d8] sm:$0xff] }
  0x60   : > { %4346 = vmatprep.mubr.msk.f32.mxu0 %vm495_vm0, %v482_v51  ;;  %1111 = vmatpush1.msra.mxu0 %v1010_v7  ;;  %v989_v6 = vld [vmem:[#allocation3 + $0x1d8] sm:$0xff] }
  0x61   : > { %1112 = vmatprep.subr.mxu0 %v1003_v8  ;;  %v988_v8 = vld [vmem:[#allocation3 + $0x1d0] sm:$0xff] }
  0x62   : > { %1113 = vmatpush1.msra.mxu0 %v1002_v9 }
  0x63   : > { %4347 = vmatmul.mubr.msk.f32.gmra.mxu0 %vm495_vm0, %v483_v52  ;;  %1114 = vmatprep.subr.mxu0 %v995_v10  ;;  %v1020_v52 = vld [vmem:[#allocation3 + $0x2d0] sm:$0xff]  ;;  %v981_v10 = vld [vmem:[#allocation3 + $0x198] sm:$0xff] }
  0x64   : > { %4349 = vmatprep.mubr.msk.f32.mxu0 %vm495_vm0, %v484_v53  ;;  %1115 = vmatpush1.msra.mxu0 %v994_v11 }
  0x65   : > { %1116 = vmatprep.subr.mxu0 %v987_v12 }
  0x66   : > { %1117 = vmatpush1.msra.mxu0 %v986_v13  ;;  %v980_v13 = vld [vmem:[#allocation3 + $0x190] sm:$0xff] }
  0x67   : > { %4350 = vmatmul.mubr.msk.f32.gmra.mxu0 %vm495_vm0, %v485_v54  ;;  %1118 = vmatprep.subr.mxu0 %v979_v14  ;;  %v1013_v54 = vld [vmem:[#allocation3 + $0x298] sm:$0xff] }
  0x68   : > { %1119 = vmatpush1.msra.mxu0 %v978_v15 }
  0x69   : > { %1120 = vmatprep.subr.mxu0 %v971_v16  ;;  %v973_v16 = vld [vmem:[#allocation3 + $0x158] sm:$0xff] }
  0x6a   : > { %1121 = vmatpush1.msra.mxu0 %v970_v17 }
  0x6b   : > { %1122 = vmatprep.subr.mxu0 %v963_v18  ;;  %v972_v18 = vld [vmem:[#allocation3 + $0x150] sm:$0xff] }
  0x6c   : > { %1123 = vmatpush1.msra.mxu0 %v962_v19 }
  0x6d   : > { %1124 = vmatprep.subr.mxu0 %v955_v20  ;;  %v965_v20 = vld [vmem:[#allocation3 + $0x118] sm:$0xff] }
  0x6e   : > { %1125 = vmatpush1.msra.mxu0 %v954_v21 }
 0x10b   : > { %v4330_v23 = vpop.f32.mrf.mxu0 }
 0x10c   : > { %v616_v24 = vadd.f32 %v4330_v23, %v4912_v22 }
 0x10d   : > { %v610_v25 = vpop.f32.mrf.mxu0 }
 0x10e   : > { %v611_v26 = vadd.f32 %v4912_v22, %v610_v25  ;;  %v690_v30 = vmax.f32 %v616_v24, 0.0  ;;  %v964_v24 = vld [vmem:[#allocation3 + $0x110] sm:$0xff] }
 0x10f   : > { %v4333_v27 = vpop.f32.mrf.mxu0 }
 0x110   : > { %v626_v28 = vadd.f32 %v4333_v27, %v4912_v22  ;;  %v689_v29 = vmax.f32 %v611_v26, 0.0  ;;  %v957_v27 = vld [vmem:[#allocation3 + $0xd8] sm:$0xff] }
 0x111   : > { %v620_v31 = vpop.f32.mrf.mxu0 }
 0x112   : > { %v621_v33 = vadd.f32 %v4912_v22, %v620_v31  ;;  %4368 = vmatprep.mubr.msk.f32.mxu1 %vm6575_vm1, %v689_v29  ;;  %v692_v35 = vmax.f32 %v626_v28, 0.0 }
 0x113   : > { %4369 = vmatmul.mubr.msk.f32.vlgmr.msra.gmra.mxu1 %vm6575_vm1, %v690_v30  ;;  %v4336_v36 = vpop.f32.mrf.mxu0 }
 0x114   : > { %v691_v38 = vmax.f32 %v621_v33, 0.0  ;;  %v636_v39 = vadd.f32 %v4336_v36, %v4912_v22  ;;  %1262 = vmatpush1.msra.mxu1 %v1052_v32  ;;  %v956_v32 = vld [vmem:[#allocation3 + $0xd0] sm:$0xff]  ;;  %v947_v33 = vld [vmem:[#allocation3 + $0x88] sm:$0xff] }
 0x115   : > { %v630_v41 = vpop.f32.mrf.mxu0  ;;  %1263 = vmatprep.subr.mxu1 %v1045_v34  ;;  %v949_v34 = vld [vmem:[#allocation3 + $0x98] sm:$0xff]  ;;  %1126 = vmatprep.subr.mxu0 %v947_v33  ;;  %v948_v36 = vld [vmem:[#allocation3 + $0x90] sm:$0xff] }
 0x116   : > { %4371 = vmatprep.mubr.msk.f32.mxu1 %vm6575_vm1, %v691_v38  ;;  %v631_v43 = vadd.f32 %v4912_v22, %v630_v41  ;;  %1264 = vmatpush1.msra.mxu1 %v1044_v37  ;;  %v694_v45 = vmax.f32 %v636_v39, 0.0  ;;  %v941_v37 = vld [vmem:[#allocation3 + $0x58] sm:$0xff]  ;;  %v938_v38 = vld [vmem:[#allocation3 + $0x40] sm:$0xff]  ;;  %v940_v39 = vld [vmem:[#allocation3 + $0x50] sm:$0xff] }
 0x117   : > { %4372 = vmatmul.mubr.msk.f32.gmra.mxu1 %vm6575_vm1, %v692_v35  ;;  %v4339_v46 = vpop.f32.mrf.mxu0  ;;  %1265 = vmatprep.subr.mxu1 %v1037_v40  ;;  %v946_v35 = vld [vmem:[#allocation3 + $0x80] sm:$0xff]  ;;  %v931_v40 = vld [vmem:[#allocation3 + $0x8] sm:$0xff]  ;;  %v933_v41 = vld [vmem:[#allocation3 + $0x18] sm:$0xff] }
 0x118   : > { %v693_v48 = vmax.f32 %v631_v43, 0.0  ;;  %v646_v49 = vadd.f32 %v4339_v46, %v4912_v22  ;;  %1266 = vmatpush1.msra.mxu1 %v1036_v42  ;;  %1127 = vmatpush1.msra.mxu0 %v946_v35  ;;  %v930_v42 = vld [vmem:[#allocation3] sm:$0xff]  ;;  %v932_v43 = vld [vmem:[#allocation3 + $0x10] sm:$0xff]  ;;  %v4948_v46 = vld [vmem:[#allocation3 + $0x3f8] sm:$0xff] }
 0x119   : > { %v640_v51 = vpop.f32.mrf.mxu0  ;;  %1267 = vmatprep.subr.mxu1 %v1029_v44  ;;  %v4657_v44 = vmov 0.0   ;;  %v5035_v35 = vld [vmem:[#allocation3 + $0x278] sm:$0xff] }
 0x11a   : > { %4374 = vmatprep.mubr.msk.f32.mxu1 %vm6575_vm1, %v693_v48  ;;  %v641_v53 = vadd.f32 %v4912_v22, %v640_v51  ;;  %1268 = vmatpush1.msra.mxu1 %v1028_v47  ;;  %v696_v55 = vmax.f32 %v646_v49, 0.0  ;;  %v4954_v48 = vld [vmem:[%s6571_s4] ss:$0 sm:$0xff] }
 0x11b   : > { %4375 = vmatmul.mubr.msk.f32.gmra.mxu1 %vm6575_vm1, %v694_v45  ;;  %v4342_v56 = vpop.f32.mrf.mxu0  ;;  %1269 = vmatprep.subr.mxu1 %v1021_v50  ;;  %v1055_v45 = vld [vmem:[#allocation3 + $0x3e8] sm:$0xff] }
 0x11c   : > { %v695_v58 = vmax.f32 %v641_v53, 0.0  ;;  %v656_v59 = vadd.f32 %v4342_v56, %v4912_v22  ;;  %1270 = vmatpush1.msra.mxu1 %v1020_v52  ;;  %1164 = vmatprep.mubr.f32.mxu0 %v4657_v44  ;;  %v1047_v56 = vld [vmem:[#allocation3 + $0x3a8] sm:$0xff] }
 0x11d   : > { %v650_v61 = vpop.f32.mrf.mxu0  ;;  %1271 = vmatprep.subr.mxu1 %v1013_v54  ;;  %v1054_v54 = vld [vmem:[#allocation3 + $0x3e0] sm:$0xff] }
 0x11e   : > { %4377 = vmatprep.mubr.msk.f32.mxu1 %vm6575_vm1, %v695_v58  ;;  %v651_v63 = vadd.f32 %v4912_v22, %v650_v61  ;;  %1272 = vmatpush1.msra.mxu1 %v1012_v57  ;;  %v698_v1 = vmax.f32 %v656_v59, 0.0  ;;  %v1046_v57 = vld [vmem:[#allocation3 + $0x3a0] sm:$0xff]  ;;  %v4962_v58 = vld [vmem:[#allocation3 + $0x3f0] sm:$0xff] }
 0x11f   : > { %4378 = vmatmul.mubr.msk.f32.gmra.mxu1 %vm6575_vm1, %v696_v55  ;;  %v4345_v2 = vpop.f32.mrf.mxu0  ;;  %1273 = vmatprep.subr.mxu1 %v1005_v60 }
 0x120   : > { %v697_v4 = vmax.f32 %v651_v63, 0.0  ;;  %v666_v5 = vadd.f32 %v4345_v2, %v4912_v22  ;;  %1274 = vmatpush1.msra.mxu1 %v1004_v62  ;;  %v1039_v62 = vld [vmem:[#allocation3 + $0x368] sm:$0xff]  ;;  %v4970_v63 = vld [vmem:[#allocation3 + $0x3b8] sm:$0xff] }
 0x121   : > { %v660_v7 = vpop.f32.mrf.mxu0  ;;  %1275 = vmatprep.subr.mxu1 %v997_v0  ;;  %v1038_v0 = vld [vmem:[#allocation3 + $0x360] sm:$0xff] }
 0x122   : > { %4380 = vmatprep.mubr.msk.f32.mxu1 %vm6575_vm1, %v697_v4  ;;  %v661_v9 = vadd.f32 %v4912_v22, %v660_v7  ;;  %1276 = vmatpush1.msra.mxu1 %v996_v3  ;;  %v700_v11 = vmax.f32 %v666_v5, 0.0  ;;  %v1031_v5 = vld [vmem:[#allocation3 + $0x328] sm:$0xff]  ;;  %v1030_v7 = vld [vmem:[#allocation3 + $0x320] sm:$0xff] }
 0x123   : > { %4381 = vmatmul.mubr.msk.f32.gmra.mxu1 %vm6575_vm1, %v698_v1  ;;  %v4348_v12 = vpop.f32.mrf.mxu0  ;;  %1277 = vmatprep.subr.mxu1 %v989_v6  ;;  %v4974_v1 = vld [vmem:[#allocation3 + $0x3b0] sm:$0xff]  ;;  %v4983_v6 = vld [vmem:[#allocation3 + $0x378] sm:$0xff] }
 0x124   : > { %v699_v14 = vmax.f32 %v661_v9, 0.0  ;;  %v676_v15 = vadd.f32 %v4348_v12, %v4912_v22  ;;  %1278 = vmatpush1.msra.mxu1 %v988_v8  ;;  %v4987_v8 = vld [vmem:[#allocation3 + $0x370] sm:$0xff]  ;;  %v1023_v12 = vld [vmem:[#allocation3 + $0x2e8] sm:$0xff] }
 0x125   : > { %v670_v17 = vpop.f32.mrf.mxu0  ;;  %1279 = vmatprep.subr.mxu1 %v981_v10 }
 0x126   : > { %4383 = vmatprep.mubr.msk.f32.mxu1 %vm6575_vm1, %v699_v14  ;;  %v671_v19 = vadd.f32 %v4912_v22, %v670_v17  ;;  %1280 = vmatpush1.msra.mxu1 %v980_v13  ;;  %v702_v21 = vmax.f32 %v676_v15, 0.0  ;;  %v4996_v13 = vld [vmem:[#allocation3 + $0x338] sm:$0xff]  ;;  %v1022_v14 = vld [vmem:[#allocation3 + $0x2e0] sm:$0xff]  ;;  %v5000_v15 = vld [vmem:[#allocation3 + $0x330] sm:$0xff] }
 0x127   : > { %4384 = vmatmul.mubr.msk.f32.gmra.mxu1 %vm6575_vm1, %v700_v11  ;;  %v4351_v23 = vpop.f32.mrf.mxu0  ;;  %1281 = vmatprep.subr.mxu1 %v973_v16 }
 0x128   : > { %v701_v25 = vmax.f32 %v671_v19, 0.0  ;;  %v686_v26 = vadd.f32 %v4351_v23, %v4912_v22  ;;  %1282 = vmatpush1.msra.mxu1 %v972_v18  ;;  %v1015_v19 = vld [vmem:[#allocation3 + $0x2a8] sm:$0xff]  ;;  %v5013_v23 = vld [vmem:[#allocation3 + $0x2f0] sm:$0xff] }
 0x129   : > { %v680_v28 = vpop.f32.mrf.mxu0  ;;  %1283 = vmatprep.subr.mxu1 %v965_v20  ;;  %v5009_v20 = vld [vmem:[#allocation3 + $0x2f8] sm:$0xff] }
 0x12a   : > { %4386 = vmatprep.mubr.msk.f32.mxu1 %vm6575_vm1, %v701_v25  ;;  %v681_v29 = vadd.f32 %v4912_v22, %v680_v28  ;;  %1284 = vmatpush1.msra.mxu1 %v964_v24  ;;  %v704_v30 = vmax.f32 %v686_v26, 0.0  ;;  %v939_v22 = vld [vmem:[#allocation3 + $0x48] sm:$0xff]  ;;  %v5022_v28 = vld [vmem:[#allocation3 + $0x2b8] sm:$0xff] }
 0x12b   : > { %4387 = vmatmul.mubr.msk.f32.gmra.mxu1 %vm6575_vm1, %v702_v21  ;;  %1285 = vmatprep.subr.mxu1 %v957_v27  ;;  %v1014_v21 = vld [vmem:[#allocation3 + $0x2a0] sm:$0xff]  ;;  %v1007_v27 = vld [vmem:[#allocation3 + $0x268] sm:$0xff] }
 0x12c   : > { %v703_v31 = vmax.f32 %v681_v29, 0.0  ;;  %1286 = vmatpush1.msra.mxu1 %v956_v32  ;;  %1128 = vmatprep.subr.mxu0 %v939_v22  ;;  %v1006_v29 = vld [vmem:[#allocation3 + $0x260] sm:$0xff]  ;;  %v5039_v22 = vld [vmem:[#allocation3 + $0x270] sm:$0xff] }
 0x12d   : > { %1287 = vmatprep.subr.mxu1 %v949_v34  ;;  %1129 = vmatpush1.msra.mxu0 %v938_v38  ;;  %v999_v34 = vld [vmem:[#allocation3 + $0x228] sm:$0xff] }
 0x12e   : > { %4389 = vmatprep.mubr.msk.f32.mxu1 %vm6575_vm1, %v703_v31  ;;  %1288 = vmatpush1.msra.mxu1 %v948_v36  ;;  %v998_v36 = vld [vmem:[#allocation3 + $0x220] sm:$0xff] }
 0x12f   : > { %4390 = vmatmul.mubr.msk.f32.gmra.mxu1 %vm6575_vm1, %v704_v30  ;;  %1289 = vmatprep.subr.mxu1 %v941_v37  ;;  %v5026_v30 = vld [vmem:[#allocation3 + $0x2b0] sm:$0xff] }
 0x130   : > { %1290 = vmatpush1.msra.mxu1 %v940_v39  ;;  %1130 = vmatprep.subr.mxu0 %v931_v40  ;;  %v991_v40 = vld [vmem:[#allocation3 + $0x1e8] sm:$0xff] }
 0x131   : > { %1291 = vmatprep.subr.mxu1 %v933_v41  ;;  %1131 = vmatpush1.msra.mxu0 %v930_v42  ;;  %v5048_v41 = vld [vmem:[#allocation3 + $0x238] sm:$0xff]  ;;  %v990_v42 = vld [vmem:[#allocation3 + $0x1e0] sm:$0xff] }
 0x132   : > { %1292 = vmatpush1.msra.mxu1 %v932_v43  ;;  %1325 = vmatprep.mubr.f32.mxu1 %v4657_v44  ;;  %v5052_v43 = vld [vmem:[#allocation3 + $0x230] sm:$0xff] }
 0x133   : > { %1422 = vmatprep.subr.mxu0 %v1055_v45  ;;  %4460 = vmatprep.subr.mxu1 %v4948_v46 }
 0x1d3   : > { %v4370_v47 = vpop.f32.mrf.mxu1 }
 0x1d4   : > { %v841_v52 = vadd.f32 %v4370_v47, %v4954_v48 }
 0x1d5   : > { %v835_v49 = vpop.f32.mrf.mxu1 }
 0x1d6   : > { %v836_v50 = vadd.f32 %v4954_v48, %v835_v49  ;;  %v4965_v59 = vmax.f32 %v841_v52, 0.0  ;;  %v982_v52 = vld [vmem:[#allocation3 + $0x1a0] sm:$0xff] }
 0x1d7   : > { %v4373_v51 = vpop.f32.mrf.mxu1 }
 0x1d8   : > { %v4958_v53 = vmax.f32 %v836_v50, 0.0  ;;  %v851_v2 = vadd.f32 %v4373_v51, %v4954_v48  ;;  %v983_v50 = vld [vmem:[#allocation3 + $0x1a8] sm:$0xff]  ;;  %v5061_v51 = vld [vmem:[#allocation3 + $0x1f8] sm:$0xff] }
 0x1d9   : > { %v845_v55 = vpop.f32.mrf.mxu1 }
 0x1da   : > { %1165 = vmatmul.mubr.f32.vlgmr.msra.gmra.mxu0 %v4958_v53  ;;  %1326 = vmatmul.mubr.f32.vlgmr.msra.gmra.mxu1 %v4958_v53  ;;  %v846_v60 = vadd.f32 %v4954_v48, %v845_v55  ;;  %v4991_v9 = vmax.f32 %v851_v2, 0.0 }
 0x1db   : > { %1423 = vmatpush1.msra.mxu0 %v1054_v54  ;;  %1170 = vmatprep.mubr.f32.mxu0 %v4657_v44  ;;  %v4376_v61 = vpop.f32.mrf.mxu1  ;;  %v5065_v54 = vld [vmem:[#allocation3 + $0x1f0] sm:$0xff] }
 0x1dc   : > { %1331 = vmatprep.mubr.f32.mxu1 %v4657_v44  ;;  %1424 = vmatprep.subr.mxu0 %v1047_v56  ;;  %v4979_v3 = vmax.f32 %v846_v60, 0.0  ;;  %v861_v16 = vadd.f32 %v4376_v61, %v4954_v48  ;;  %v975_v60 = vld [vmem:[#allocation3 + $0x168] sm:$0xff]  ;;  %v5074_v61 = vld [vmem:[#allocation3 + $0x1b8] sm:$0xff] }
 0x1dd   : > { %1425 = vmatpush1.msra.mxu0 %v1046_v57  ;;  %4476 = vmatpush1.msra.mxu1 %v4962_v58  ;;  %v855_v4 = vpop.f32.mrf.mxu1 }
 0x1de   : > { %1171 = vmatmul.mubr.f32.gmra.mxu0 %v4965_v59  ;;  %1332 = vmatmul.mubr.f32.gmra.mxu1 %v4965_v59  ;;  %v856_v10 = vadd.f32 %v4954_v48, %v855_v4  ;;  %v5017_v24 = vmax.f32 %v861_v16, 0.0 }
 0x1df   : > { %1176 = vmatprep.mubr.f32.mxu0 %v4657_v44  ;;  %1337 = vmatprep.mubr.f32.mxu1 %v4657_v44  ;;  %v4379_v11 = vpop.f32.mrf.mxu1 }
 0x1e0   : > { %1426 = vmatprep.subr.mxu0 %v1039_v62  ;;  %4461 = vmatprep.subr.mxu1 %v4970_v63  ;;  %v5005_v17 = vmax.f32 %v856_v10, 0.0  ;;  %v871_v31 = vadd.f32 %v4379_v11, %v4954_v48  ;;  %v974_v62 = vld [vmem:[#allocation3 + $0x160] sm:$0xff]  ;;  %v5087_v10 = vld [vmem:[#allocation3 + $0x178] sm:$0xff] }
 0x1e1   : > { %1427 = vmatpush1.msra.mxu0 %v1038_v0  ;;  %4477 = vmatpush1.msra.mxu1 %v4974_v1  ;;  %v865_v18 = vpop.f32.mrf.mxu1  ;;  %v5078_v0 = vld [vmem:[#allocation3 + $0x1b0] sm:$0xff]  ;;  %v966_v11 = vld [vmem:[#allocation3 + $0x120] sm:$0xff] }
 0x1e2   : > { %1177 = vmatmul.mubr.f32.gmra.mxu0 %v4979_v3  ;;  %1338 = vmatmul.mubr.f32.gmra.mxu1 %v4979_v3  ;;  %v866_v25 = vadd.f32 %v4954_v48, %v865_v18  ;;  %v5043_v37 = vmax.f32 %v871_v31, 0.0 }
 0x1e3   : > { %1182 = vmatprep.mubr.f32.mxu0 %v4657_v44  ;;  %1343 = vmatprep.mubr.f32.mxu1 %v4657_v44  ;;  %v4382_v26 = vpop.f32.mrf.mxu1 }
 0x1e4   : > { %1428 = vmatprep.subr.mxu0 %v1031_v5  ;;  %4462 = vmatprep.subr.mxu1 %v4983_v6  ;;  %v5031_v32 = vmax.f32 %v866_v25, 0.0  ;;  %v881_v45 = vadd.f32 %v4382_v26, %v4954_v48  ;;  %v958_v25 = vld [vmem:[#allocation3 + $0xe0] sm:$0xff]  ;;  %v5104_v26 = vld [vmem:[#allocation3 + $0x130] sm:$0xff] }
 0x1e5   : > { %1429 = vmatpush1.msra.mxu0 %v1030_v7  ;;  %4478 = vmatpush1.msra.mxu1 %v4987_v8  ;;  %v875_v33 = vpop.f32.mrf.mxu1  ;;  %v967_v7 = vld [vmem:[#allocation3 + $0x128] sm:$0xff] }
 0x1e6   : > { %1183 = vmatmul.mubr.f32.gmra.mxu0 %v4991_v9  ;;  %1344 = vmatmul.mubr.f32.gmra.mxu1 %v4991_v9  ;;  %v876_v38 = vadd.f32 %v4954_v48, %v875_v33  ;;  %v5069_v55 = vmax.f32 %v881_v45, 0.0  ;;  %v951_v33 = vld [vmem:[#allocation3 + $0xa8] sm:$0xff]  ;;  %v5126_v45 = vld [vmem:[#allocation3 + $0xb8] sm:$0xff] }
 0x1e7   : > { %1188 = vmatprep.mubr.f32.mxu0 %v4657_v44  ;;  %1349 = vmatprep.mubr.f32.mxu1 %v4657_v44  ;;  %v4385_v39 = vpop.f32.mrf.mxu1 }
 0x1e8   : > { %1430 = vmatprep.subr.mxu0 %v1023_v12  ;;  %4463 = vmatprep.subr.mxu1 %v4996_v13  ;;  %v5057_v47 = vmax.f32 %v876_v38, 0.0  ;;  %v891_v2 = vadd.f32 %v4385_v39, %v4954_v48  ;;  %v5091_v12 = vld [vmem:[#allocation3 + $0x170] sm:$0xff] }
 0x1e9   : > { %1431 = vmatpush1.msra.mxu0 %v1022_v14  ;;  %4479 = vmatpush1.msra.mxu1 %v5000_v15  ;;  %v885_v49 = vpop.f32.mrf.mxu1  ;;  %v5117_v38 = vld [vmem:[#allocation3 + $0xf0] sm:$0xff] }
 0x1ea   : > { %1189 = vmatmul.mubr.f32.gmra.mxu0 %v5005_v17  ;;  %1350 = vmatmul.mubr.f32.gmra.mxu1 %v5005_v17  ;;  %v886_v56 = vadd.f32 %v4954_v48, %v885_v49  ;;  %v5095_v14 = vmax.f32 %v891_v2, 0.0  ;;  %v942_v49 = vld [vmem:[#allocation3 + $0x60] sm:$0xff]  ;;  %v5143_v2 = vld [vmem:[#allocation3 + $0x70] sm:$0xff] }
 0x1eb   : > { %1194 = vmatprep.mubr.f32.mxu0 %v4657_v44  ;;  %1355 = vmatprep.mubr.f32.mxu1 %v4657_v44  ;;  %v4388_v57 = vpop.f32.mrf.mxu1 }
 0x1ec   : > { %1432 = vmatprep.subr.mxu0 %v1015_v19  ;;  %4464 = vmatprep.subr.mxu1 %v5009_v20  ;;  %v5083_v4 = vmax.f32 %v886_v56, 0.0  ;;  %v959_v19 = vld [vmem:[#allocation3 + $0xe8] sm:$0xff] }
 0x1ed   : > { %1433 = vmatpush1.msra.mxu0 %v1014_v21  ;;  %4480 = vmatpush1.msra.mxu1 %v5013_v23  ;;  %v895_v5 = vpop.f32.mrf.mxu1  ;;  %v5100_v21 = vld [vmem:[#allocation3 + $0x138] sm:$0xff] }
 0x1ee   : > { %1195 = vmatmul.mubr.f32.gmra.mxu0 %v5017_v24  ;;  %1356 = vmatmul.mubr.f32.gmra.mxu1 %v5017_v24  ;;  %v896_v16 = vadd.f32 %v4954_v48, %v895_v5  ;;  %v5150_v5 = vld [vmem:[#allocation3 + $0x38] sm:$0xff] }
 0x1ef   : > { %1200 = vmatprep.mubr.f32.mxu0 %v4657_v44  ;;  %1361 = vmatprep.mubr.f32.mxu1 %v4657_v44  ;;  %v4391_v18 = vpop.f32.mrf.mxu1 }
 0x1f0   : > { %1434 = vmatprep.subr.mxu0 %v1007_v27  ;;  %4465 = vmatprep.subr.mxu1 %v5022_v28  ;;  %v901_v27 = vadd.f32 %v4388_v57, %v4954_v48  ;;  %v935_v57 = vld [vmem:[#allocation3 + $0x28] sm:$0xff] }
 0x1f1   : > { %1435 = vmatpush1.msra.mxu0 %v1006_v29  ;;  %4481 = vmatpush1.msra.mxu1 %v5026_v30  ;;  %v5109_v29 = vmax.f32 %v896_v16, 0.0  ;;  %v905_v31 = vpop.f32.mrf.mxu1 }
 0x1f2   : > { %1201 = vmatmul.mubr.f32.gmra.mxu0 %v5031_v32  ;;  %1362 = vmatmul.mubr.f32.gmra.mxu1 %v5031_v32  ;;  %v5121_v39 = vmax.f32 %v901_v27, 0.0 }
 0x1f3   : > { %1206 = vmatprep.mubr.f32.mxu0 %v4657_v44  ;;  %1367 = vmatprep.mubr.f32.mxu1 %v4657_v44 }
 0x1f4   : > { %1436 = vmatprep.subr.mxu0 %v999_v34  ;;  %4466 = vmatprep.subr.mxu1 %v5035_v35  ;;  %v5113_v34 = vld [vmem:[#allocation3 + $0xf8] sm:$0xff] }
 0x1f5   : > { %1437 = vmatpush1.msra.mxu0 %v998_v36  ;;  %4482 = vmatpush1.msra.mxu1 %v5039_v22  ;;  %v950_v36 = vld [vmem:[#allocation3 + $0xa0] sm:$0xff] }
 0x1f6   : > { %1207 = vmatmul.mubr.f32.gmra.mxu0 %v5043_v37  ;;  %1368 = vmatmul.mubr.f32.gmra.mxu1 %v5043_v37 }
 0x1f7   : > { %1212 = vmatprep.mubr.f32.mxu0 %v4657_v44  ;;  %1373 = vmatprep.mubr.f32.mxu1 %v4657_v44 }
 0x1f8   : > { %1438 = vmatprep.subr.mxu0 %v991_v40  ;;  %4467 = vmatprep.subr.mxu1 %v5048_v41  ;;  %v906_v40 = vadd.f32 %v4954_v48, %v905_v31 }
 0x1f9   : > { %1439 = vmatpush1.msra.mxu0 %v990_v42  ;;  %4483 = vmatpush1.msra.mxu1 %v5052_v43  ;;  %v943_v42 = vld [vmem:[#allocation3 + $0x68] sm:$0xff] }
 0x1fa   : > { %1213 = vmatmul.mubr.f32.gmra.mxu0 %v5057_v47  ;;  %1374 = vmatmul.mubr.f32.gmra.mxu1 %v5057_v47  ;;  %v5135_v56 = vmax.f32 %v906_v40, 0.0 }
 0x1fb   : > { %1218 = vmatprep.mubr.f32.mxu0 %v4657_v44  ;;  %1379 = vmatprep.mubr.f32.mxu1 %v4657_v44 }
 0x1fc   : > { %1440 = vmatprep.subr.mxu0 %v983_v50  ;;  %4468 = vmatprep.subr.mxu1 %v5061_v51  ;;  %v5130_v50 = vld [vmem:[#allocation3 + $0xb0] sm:$0xff] }
 0x1fd   : > { %1441 = vmatpush1.msra.mxu0 %v982_v52  ;;  %4484 = vmatpush1.msra.mxu1 %v5065_v54  ;;  %v911_v52 = vadd.f32 %v4391_v18, %v4954_v48 }
 0x1fe   : > { %1219 = vmatmul.mubr.f32.gmra.mxu0 %v5069_v55  ;;  %1380 = vmatmul.mubr.f32.gmra.mxu1 %v5069_v55 }
 0x1ff   : > { %1224 = vmatprep.mubr.f32.mxu0 %v4657_v44  ;;  %1385 = vmatprep.mubr.f32.mxu1 %v4657_v44  ;;  %v5147_v48 = vmax.f32 %v911_v52, 0.0 }
 0x200   : > { %1442 = vmatprep.subr.mxu0 %v975_v60  ;;  %4469 = vmatprep.subr.mxu1 %v5074_v61  ;;  %v5139_v60 = vld [vmem:[#allocation3 + $0x78] sm:$0xff] }
 0x201   : > { %1443 = vmatpush1.msra.mxu0 %v974_v62  ;;  %4485 = vmatpush1.msra.mxu1 %v5078_v0  ;;  %v934_v62 = vld [vmem:[#allocation3 + $0x20] sm:$0xff] }
 0x202   : > { %1225 = vmatmul.mubr.f32.gmra.mxu0 %v5083_v4  ;;  %1386 = vmatmul.mubr.f32.gmra.mxu1 %v5083_v4 }
 0x203   : > { %1230 = vmatprep.mubr.f32.mxu0 %v4657_v44  ;;  %1391 = vmatprep.mubr.f32.mxu1 %v4657_v44 }
 0x204   : > { %1444 = vmatprep.subr.mxu0 %v967_v7  ;;  %4470 = vmatprep.subr.mxu1 %v5087_v10  ;;  %v5153_v7 = vld [vmem:[#allocation3 + $0x30] sm:$0xff] }
 0x205   : > { %1445 = vmatpush1.msra.mxu0 %v966_v11  ;;  %4486 = vmatpush1.msra.mxu1 %v5091_v12 }
 0x206   : > { %1231 = vmatmul.mubr.f32.gmra.mxu0 %v5095_v14  ;;  %1392 = vmatmul.mubr.f32.gmra.mxu1 %v5095_v14 }
 0x207   : > { %1236 = vmatprep.mubr.f32.mxu0 %v4657_v44  ;;  %1397 = vmatprep.mubr.f32.mxu1 %v4657_v44 }
 0x208   : > { %1446 = vmatprep.subr.mxu0 %v959_v19  ;;  %4471 = vmatprep.subr.mxu1 %v5100_v21 }
 0x209   : > { %1447 = vmatpush1.msra.mxu0 %v958_v25  ;;  %4487 = vmatpush1.msra.mxu1 %v5104_v26 }
 0x20a   : > { %1237 = vmatmul.mubr.f32.gmra.mxu0 %v5109_v29  ;;  %1398 = vmatmul.mubr.f32.gmra.mxu1 %v5109_v29 }
 0x20b   : > { %1242 = vmatprep.mubr.f32.mxu0 %v4657_v44  ;;  %1403 = vmatprep.mubr.f32.mxu1 %v4657_v44 }
 0x20c   : > { %1448 = vmatprep.subr.mxu0 %v951_v33  ;;  %4472 = vmatprep.subr.mxu1 %v5113_v34 }
 0x20d   : > { %1449 = vmatpush1.msra.mxu0 %v950_v36  ;;  %4488 = vmatpush1.msra.mxu1 %v5117_v38 }
 0x20e   : > { %1243 = vmatmul.mubr.f32.gmra.mxu0 %v5121_v39  ;;  %1404 = vmatmul.mubr.f32.gmra.mxu1 %v5121_v39 }
 0x20f   : > { %1248 = vmatprep.mubr.f32.mxu0 %v4657_v44  ;;  %1409 = vmatprep.mubr.f32.mxu1 %v4657_v44 }
 0x210   : > { %1450 = vmatprep.subr.mxu0 %v943_v42  ;;  %4473 = vmatprep.subr.mxu1 %v5126_v45 }
 0x211   : > { %1451 = vmatpush1.msra.mxu0 %v942_v49  ;;  %4489 = vmatpush1.msra.mxu1 %v5130_v50 }
 0x212   : > { %1249 = vmatmul.mubr.f32.gmra.mxu0 %v5135_v56  ;;  %1410 = vmatmul.mubr.f32.gmra.mxu1 %v5135_v56 }
 0x213   : > { %1254 = vmatprep.mubr.f32.mxu0 %v4657_v44  ;;  %1415 = vmatprep.mubr.f32.mxu1 %v4657_v44 }
 0x214   : > { %1452 = vmatprep.subr.mxu0 %v935_v57  ;;  %4474 = vmatprep.subr.mxu1 %v5139_v60 }
 0x215   : > { %1453 = vmatpush1.msra.mxu0 %v934_v62  ;;  %4490 = vmatpush1.msra.mxu1 %v5143_v2 }
 0x216   : > { %1255 = vmatmul.mubr.f32.gmra.mxu0 %v5147_v48  ;;  %1416 = vmatmul.mubr.f32.gmra.mxu1 %v5147_v48 }
 0x217   : > { %4475 = vmatprep.subr.mxu1 %v5150_v5  ;;  %1486 = vmatprep.mubr.f32.mxu0 %v4657_v44 }
 0x218   : > { %1583 = vmatprep.subr.mxu0 %v4948_v46  ;;  %4491 = vmatpush1.msra.mxu1 %v5153_v7  ;;  %v2308_v46 = vld [vmem:[%s6568_s1 + $0x8] sm:$0xff] }
 0x219   : > { %1653 = vmatprep.mubr.f32.mxu1 %v4657_v44 }
 0x21a   : > { %1487 = vmatmul.mubr.f32.vlgmr.msra.gmra.mxu0 %v4958_v53  ;;  %1654 = vmatmul.mubr.f32.vlgmr.msra.gmra.mxu1 %v4965_v59 }
 0x21b   : > { %1584 = vmatpush1.msra.mxu0 %v4962_v58  ;;  %1492 = vmatprep.mubr.f32.mxu0 %v4657_v44  ;;  %v4185_v58 = vld [vmem:[%s4840_s17 + $0x80] sm:$0xff] }
 0x21c   : > { %1585 = vmatprep.subr.mxu0 %v4970_v63  ;;  %1659 = vmatprep.mubr.f32.mxu1 %v4657_v44  ;;  %v4186_v63 = vld [vmem:[%s4840_s17 + $0x88] sm:$0xff] }
 0x21d   : > { %1586 = vmatpush1.msra.mxu0 %v4974_v1  ;;  %v4187_v1 = vld [vmem:[%s4840_s17 + $0x90] sm:$0xff] }
 0x21e   : > { %1493 = vmatmul.mubr.f32.gmra.mxu0 %v4965_v59  ;;  %1660 = vmatmul.mubr.f32.gmra.mxu1 %v4979_v3  ;;  %v2307_v59 = vld [vmem:[%s6568_s1] sm:$0xff] }
 0x21f   : > { %1498 = vmatprep.mubr.f32.mxu0 %v4657_v44  ;;  %1587 = vmatprep.subr.mxu0 %v4983_v6  ;;  %v4189_v6 = vld [vmem:[%s4840_s17 + $0xa0] sm:$0xff] }
 0x220   : > { %1665 = vmatprep.mubr.f32.mxu1 %v4657_v44  ;;  %1588 = vmatpush1.msra.mxu0 %v4987_v8  ;;  %v4191_v8 = vld [vmem:[%s4840_s17 + $0xb0] sm:$0xff] }
 0x221   : > { %1589 = vmatprep.subr.mxu0 %v4996_v13  ;;  %v4193_v13 = vld [vmem:[%s4840_s17 + $0xc0] sm:$0xff] }
 0x222   : > { %1499 = vmatmul.mubr.f32.gmra.mxu0 %v4979_v3  ;;  %1666 = vmatmul.mubr.f32.gmra.mxu1 %v4991_v9  ;;  %v4188_v3 = vld [vmem:[%s4840_s17 + $0x98] sm:$0xff] }
 0x223   : > { %1504 = vmatprep.mubr.f32.mxu0 %v4657_v44  ;;  %1671 = vmatprep.mubr.f32.mxu1 %v4657_v44 }
 0x224   : > { %1590 = vmatpush1.msra.mxu0 %v5000_v15  ;;  %v4194_v15 = vld [vmem:[%s4840_s17 + $0xc8] sm:$0xff] }
 0x225   : > { %1591 = vmatprep.subr.mxu0 %v5009_v20  ;;  %v4196_v20 = vld [vmem:[%s4840_s17 + $0xd8] sm:$0xff] }
 0x226   : > { %1505 = vmatmul.mubr.f32.gmra.mxu0 %v4991_v9  ;;  %1672 = vmatmul.mubr.f32.gmra.mxu1 %v5005_v17  ;;  %v4192_v9 = vld [vmem:[%s4840_s17 + $0xb8] sm:$0xff] }
 0x227   : > { %1510 = vmatprep.mubr.f32.mxu0 %v4657_v44  ;;  %1677 = vmatprep.mubr.f32.mxu1 %v4657_v44 }
 0x228   : > { %1592 = vmatpush1.msra.mxu0 %v5013_v23  ;;  %v4197_v23 = vld [vmem:[%s4840_s17 + $0xe0] sm:$0xff] }
 0x229   : > { %1593 = vmatprep.subr.mxu0 %v5022_v28  ;;  %v4199_v28 = vld [vmem:[%s4840_s17 + $0xf0] sm:$0xff] }
 0x22a   : > { %1511 = vmatmul.mubr.f32.gmra.mxu0 %v5005_v17  ;;  %1678 = vmatmul.mubr.f32.gmra.mxu1 %v5017_v24  ;;  %v4195_v17 = vld [vmem:[%s4840_s17 + $0xd0] sm:$0xff] }
 0x22b   : > { %1516 = vmatprep.mubr.f32.mxu0 %v4657_v44  ;;  %1683 = vmatprep.mubr.f32.mxu1 %v4657_v44 }
 0x22c   : > { %1594 = vmatpush1.msra.mxu0 %v5026_v30  ;;  %v2532_v30 = vld [vmem:[%s6570_s3 + $0x38] sm:$0xff] }
 0x22d   : > { %1595 = vmatprep.subr.mxu0 %v5035_v35  ;;  %4420 = vmatprep.subr.mxu1 %v2532_v30  ;;  %v2531_v35 = vld [vmem:[%s6570_s3 + $0x30] sm:$0xff] }
 0x22e   : > { %1517 = vmatmul.mubr.f32.gmra.mxu0 %v5017_v24  ;;  %1684 = vmatmul.mubr.f32.gmra.mxu1 %v5031_v32  ;;  %v4198_v24 = vld [vmem:[%s4840_s17 + $0xe8] sm:$0xff] }
 0x22f   : > { %1522 = vmatprep.mubr.f32.mxu0 %v4657_v44  ;;  %1689 = vmatprep.mubr.f32.mxu1 %v4657_v44 }
 0x230   : > { %1596 = vmatpush1.msra.mxu0 %v5039_v22  ;;  %4421 = vmatpush3.msra.mxu1 %v2532_v30  ;;  %v2530_v22 = vld [vmem:[%s6570_s3 + $0x28] sm:$0xff] }
 0x231   : > { %1597 = vmatprep.subr.mxu0 %v5048_v41  ;;  %4422 = vmatprep.subr.mxu1 %v2531_v35 }
 0x232   : > { %1523 = vmatmul.mubr.f32.gmra.mxu0 %v5031_v32  ;;  %1690 = vmatmul.mubr.f32.gmra.mxu1 %v5043_v37  ;;  %v4200_v32 = vld [vmem:[%s4840_s17 + $0xf8] sm:$0xff] }
 0x233   : > { %1528 = vmatprep.mubr.f32.mxu0 %v4657_v44  ;;  %1695 = vmatprep.mubr.f32.mxu1 %v4657_v44 }
 0x234   : > { %1598 = vmatpush1.msra.mxu0 %v5052_v43  ;;  %4423 = vmatpush3.msra.mxu1 %v2531_v35  ;;  %v2529_v43 = vld [vmem:[%s6570_s3 + $0x20] sm:$0xff] }
 0x235   : > { %1599 = vmatprep.subr.mxu0 %v5061_v51  ;;  %4424 = vmatprep.subr.mxu1 %v2530_v22 }
 0x236   : > { %1529 = vmatmul.mubr.f32.gmra.mxu0 %v5043_v37  ;;  %1696 = vmatmul.mubr.f32.gmra.mxu1 %v5057_v47  ;;  %v1060_v37 = vlaneseq }
 0x237   : > { %1534 = vmatprep.mubr.f32.mxu0 %v4657_v44  ;;  %1701 = vmatprep.mubr.f32.mxu1 %v4657_v44 }
 0x238   : > { %1600 = vmatpush1.msra.mxu0 %v5065_v54  ;;  %4425 = vmatpush3.msra.mxu1 %v2530_v22  ;;  %v5303_v41 = vshrl.u32 %v1060_v37, 7  ;;  %v5311_v54 = vstv %s4184_s20  ;;  %s4659_s20 = smov [#allocation6]  }
 0x239   : > { %1601 = vmatprep.subr.mxu0 %v5074_v61  ;;  %4426 = vmatprep.subr.mxu1 %v2529_v43  ;;  %v5317_v61 = vld [vmem:[%s6573_s6] sm:$0xff]  ;;  %s4067_s21 = sshll.u32 %s4659_s20, 4  ;;  %s4068_s21 = int_to_ptr.vmem [resolvable:$true] %s4067_s21 }
 0x23a   : > { %1535 = vmatmul.mubr.f32.gmra.mxu0 %v5057_v47  ;;  %1702 = vmatmul.mubr.f32.gmra.mxu1 %v5069_v55  ;;  %v1876_v47 = vadd.s32 8, %v5303_v41  ;;  %v1062_v51 = vsub.s32 0, %v5303_v41  ;;  %v1878_v11 = vadd.s32 24, %v5303_v41  ;;  %v1880_v16 = vadd.s32 40, %v5303_v41  ;;  %s4581_s26 = scalar_lea.vmem %s4068_s21, 256  ;;  %p4588_p11 = scmp.lt.s32.totalorder %s4068_s21, %s4068_s21 }
 0x23b   : > { %1540 = vmatprep.mubr.f32.mxu0 %v4657_v44  ;;  %1707 = vmatprep.mubr.f32.mxu1 %v4657_v44  ;;  %v5330_v18 = vadd.s32 %v5311_v54, %v5303_v41  ;;  %v1882_v25 = vadd.s32 56, %v5303_v41  ;;  %v1884_v40 = vadd.s32 72, %v5303_v41  ;;  %v1885_v42 = vadd.s32 80, %v5303_v41  ;;  %p4582_p8 = scmp.ne.s32.totalorder %s4068_s21, %s4581_s26  ;;  %p4589_p12 = scmp.lt.s32.totalorder %s4581_s26, %s4581_s26 }
 0x23c   : > { %1602 = vmatpush1.msra.mxu0 %v5078_v0  ;;  %4427 = vmatpush3.msra.mxu1 %v2529_v43  ;;  %v1066_v0 = vsub.s32 1, %v5303_v41  ;;  %v5333_v19 = vadd.s32 %v5311_v54, %v1876_v47  ;;  %v5362_v36 = vadd.s32 %v5311_v54, %v1878_v11  ;;  %v1887_v52 = vadd.s32 96, %v5303_v41 }
 0x23d   : > { %1603 = vmatprep.subr.mxu0 %v5087_v10  ;;  %v1877_v10 = vadd.s32 16, %v5303_v41  ;;  %vm1908_vm2 = vcmp.lt.s32.totalorder %v5330_v18, 250  ;;  %v5378_v49 = vadd.s32 %v5311_v54, %v1882_v25  ;;  %v1888_v62 = vadd.s32 104, %v5303_v41  ;;  %p4583_p9 = pnand %p4582_p8, %p6537_p7  ;;  %p4590_p13 = por %p4589_p12, %p4588_p11 }
 0x23e   : > { %1541 = vmatmul.mubr.f32.gmra.mxu0 %v5069_v55  ;;  %1708 = vmatmul.mubr.f32.gmra.mxu1 %v5083_v4  ;;  %v1070_v55 = vsub.s32 2, %v5303_v41  ;;  %v5351_v31 = vrot.slane %v5317_v61, %v1066_v0  ;;  %vm1909_vm3 = vcmp.lt.s32.totalorder %v5333_v19, 250  ;;  %vm1911_vm5 = vcmp.lt.s32.totalorder %v5362_v36, 250 }
 0x23f   : > { %1546 = vmatprep.mubr.f32.mxu0 %v4657_v44  ;;  %1713 = vmatprep.mubr.f32.mxu1 %v4657_v44  ;;  %v5415_v30 = vadd.s32 %v5311_v54, %v1888_v62  ;;  %vm1915_vm9 = vcmp.lt.s32.totalorder %v5378_v49, 250  ;;  %p4584_p10 = pneg %p4583_p9 }
 0x240   : > { %1604 = vmatpush1.msra.mxu0 %v5091_v12  ;;  %v2528_v12 = vld [vmem:[%s6570_s3 + $0x18] sm:$0xff]  ;;  %v5345_v27 = vrot.slane %v5317_v61, %v1070_v55 }
 0x241   : > { %1605 = vmatprep.subr.mxu0 %v5100_v21  ;;  %4428 = vmatprep.subr.mxu1 %v2528_v12  ;;  %v1881_v21 = vadd.s32 48, %v5303_v41  ;;  %vm6582_vm15 = vcmp.lt.s32.totalorder %v5415_v30, 250  ;;  %p4591_p0 = pnand %p4590_p13, %p4584_p10 }
 0x242   : > { %1547 = vmatmul.mubr.f32.gmra.mxu0 %v5083_v4  ;;  %1714 = vmatmul.mubr.f32.gmra.mxu1 %v5095_v14  ;;  %v1074_v4 = vsub.s32 3, %v5303_v41 }
 0x243   : > { %1552 = vmatprep.mubr.f32.mxu0 %v4657_v44  ;;  %1719 = vmatprep.mubr.f32.mxu1 %v4657_v44 }
 0x244   : > { %1606 = vmatpush1.msra.mxu0 %v5104_v26  ;;  %4429 = vmatpush3.msra.mxu1 %v2528_v12  ;;  %v5340_v26 = vrot.slane %v5317_v61, %v1062_v51  ;;  %v5356_v33 = vrot.slane %v5317_v61, %v1074_v4 }
 0x245   : > { %1607 = vmatprep.subr.mxu0 %v5113_v34  ;;  %v5359_v34 = vadd.s32 %v5311_v54, %v1877_v10 }
 0x246   : > { %1553 = vmatmul.mubr.f32.gmra.mxu0 %v5095_v14  ;;  %1720 = vmatmul.mubr.f32.gmra.mxu1 %v5109_v29  ;;  %v1879_v14 = vadd.s32 32, %v5303_v41 }
 0x247   : > { %1558 = vmatprep.mubr.f32.mxu0 %v4657_v44  ;;  %1725 = vmatprep.mubr.f32.mxu1 %v4657_v44  ;;  %vm1910_vm4 = vcmp.lt.s32.totalorder %v5359_v34, 250 }
 0x248   : > { %1608 = vmatpush1.msra.mxu0 %v5117_v38  ;;  %v5365_v38 = vadd.s32 %v5311_v54, %v1879_v14 }
 0x249   : > { %1609 = vmatprep.subr.mxu0 %v5126_v45  ;;  %v5375_v45 = vadd.s32 %v5311_v54, %v1881_v21 }
 0x24a   : > { %1559 = vmatmul.mubr.f32.gmra.mxu0 %v5109_v29  ;;  %1726 = vmatmul.mubr.f32.gmra.mxu1 %v5121_v39  ;;  %v1883_v29 = vadd.s32 64, %v5303_v41  ;;  %vm1912_vm6 = vcmp.lt.s32.totalorder %v5365_v38, 250 }
 0x24b   : > { %1564 = vmatprep.mubr.f32.mxu0 %v4657_v44  ;;  %1731 = vmatprep.mubr.f32.mxu1 %v4657_v44  ;;  %vm1914_vm8 = vcmp.lt.s32.totalorder %v5375_v45, 250 }
 0x24c   : > { %1610 = vmatpush1.msra.mxu0 %v5130_v50  ;;  %v1886_v50 = vadd.s32 88, %v5303_v41 }
 0x24d   : > { %1611 = vmatprep.subr.mxu0 %v5139_v60  ;;  %v5383_v60 = vadd.s32 %v5311_v54, %v1883_v29 }
 0x24e   : > { %1565 = vmatmul.mubr.f32.gmra.mxu0 %v5121_v39  ;;  %1732 = vmatmul.mubr.f32.gmra.mxu1 %v5135_v56  ;;  %v5368_v39 = vadd.s32 %v5311_v54, %v1880_v16 }
 0x24f   : > { %1570 = vmatprep.mubr.f32.mxu0 %v4657_v44  ;;  %1737 = vmatprep.mubr.f32.mxu1 %v4657_v44  ;;  %vm1916_vm10 = vcmp.lt.s32.totalorder %v5383_v60, 250 }
 0x250   : > { %1612 = vmatpush1.msra.mxu0 %v5143_v2  ;;  %v1889_v2 = vadd.s32 112, %v5303_v41  ;;  %vm1913_vm7 = vcmp.lt.s32.totalorder %v5368_v39, 250 }
 0x251   : > { %1613 = vmatprep.subr.mxu0 %v5150_v5  ;;  %v6579_v5 = vsub.s32 4, %v5303_v41 }
 0x252   : > { %1571 = vmatmul.mubr.f32.gmra.mxu0 %v5135_v56  ;;  %1738 = vmatmul.mubr.f32.gmra.mxu1 %v5147_v48 }
 0x253   : > { %1576 = vmatprep.mubr.f32.mxu0 %v4657_v44  ;;  %1614 = vmatpush1.msra.mxu0 %v5153_v7  ;;  %v6578_v7 = vsub.s32 6, %v5303_v41  ;;  %v5426_v22 = vrot.slane %v5317_v61, %v6579_v5 }
 0x254   : > { %4392 = vmatprep.subr.mxu0 %v2308_v46 }
 0x255   : > { %v5431_v37 = vrot.slane %v5317_v61, %v6578_v7 }
 0x256   : > { %1577 = vmatmul.mubr.f32.gmra.mxu0 %v5147_v48  ;;  %v1890_v48 = vadd.s32 120, %v5303_v41 }
 0x257   : > { %1647 = vmatprep.mubr.f32.mxu0 %v4657_v44 }
 0x258   : > { %v5421_v35 = vadd.s32 %v5311_v54, %v1890_v48 }
 0x25a   : > { %1648 = vmatmul.mubr.f32.vlgmr.msra.gmra.mxu0 %v4958_v53  ;;  %v4190_v53 = vld [vmem:[%s4840_s17 + $0xa8] sm:$0xff]  ;;  %vm6580_vm1 = vcmp.lt.s32.totalorder %v5421_v35, 250 }
 0x25b   : > { %4393 = vmatpush3.msra.mxu0 %v2308_v46  ;;  %4396 = vmatprep.mubr.msk.f32.mxu0 %vm495_vm0, %v4185_v58  ;;  %v6577_v46 = vsub.s32 5, %v5303_v41  ;;  %v2527_v58 = vld [vmem:[%s6570_s3 + $0x10] sm:$0xff] }
 0x25c   : > { %4394 = vmatprep.subr.mxu0 %v2307_v59  ;;  %4430 = vmatprep.subr.mxu1 %v2527_v58 }
 0x25d   : > { %4395 = vmatpush3.msra.mxu0 %v2307_v59  ;;  %4431 = vmatpush3.msra.mxu1 %v2527_v58  ;;  %v5436_v43 = vrot.slane %v5317_v61, %v6577_v46 }
 0x25e   : > { %4397 = vmatmul.mubr.msk.f32.vlgmr.msra.gmra.mxu0 %vm495_vm0, %v4186_v63 }
 0x25f   : > { %4399 = vmatprep.mubr.msk.f32.mxu0 %vm495_vm0, %v4187_v1 }
 0x262   : > { %4400 = vmatmul.mubr.msk.f32.gmra.mxu0 %vm495_vm0, %v4188_v3 }
 0x263   : > { %4402 = vmatprep.mubr.msk.f32.mxu0 %vm495_vm0, %v4189_v6  ;;  %v5397_v6 = vadd.s32 %v5311_v54, %v1884_v40 }
 0x265   : > { %vm1917_vm11 = vcmp.lt.s32.totalorder %v5397_v6, 250 }
 0x266   : > { %4403 = vmatmul.mubr.msk.f32.gmra.mxu0 %vm495_vm0, %v4190_v53  ;;  %v5400_v53 = vadd.s32 %v5311_v54, %v1885_v42 }
 0x267   : > { %4405 = vmatprep.mubr.msk.f32.mxu0 %vm495_vm0, %v4191_v8  ;;  %v5404_v8 = vadd.s32 %v5311_v54, %v1886_v50 }
 0x268   : > { %vm1918_vm12 = vcmp.lt.s32.totalorder %v5400_v53, 250 }
 0x269   : > { %vm1919_vm13 = vcmp.lt.s32.totalorder %v5404_v8, 250 }
 0x26a   : > { %4406 = vmatmul.mubr.msk.f32.gmra.mxu0 %vm495_vm0, %v4192_v9  ;;  %v5407_v9 = vadd.s32 %v5311_v54, %v1887_v52 }
 0x26b   : > { %4408 = vmatprep.mubr.msk.f32.mxu0 %vm495_vm0, %v4193_v13  ;;  %v6576_v13 = vsub.s32 7, %v5303_v41 }
 0x26c   : > { %vm6583_vm14 = vcmp.lt.s32.totalorder %v5407_v9, 250 }
 0x26d   : > { %v5446_v25 = vrot.slane %v5317_v61, %v6576_v13 }
 0x26e   : > { %4409 = vmatmul.mubr.msk.f32.gmra.mxu0 %vm495_vm0, %v4194_v15  ;;  %v4658_v15 = vmov 1966171168  }
 0x26f   : > { %4411 = vmatprep.mubr.msk.f32.mxu0 %vm495_vm0, %v4195_v17  ;;  %v5410_v17 = vunpack.c.l.s4 %v4658_v15 }
 0x271   : > { %v2243_v29 = vunpack.c.0.s8 %v5410_v17 }
 0x272   : > { %4412 = vmatmul.mubr.msk.f32.gmra.mxu0 %vm495_vm0, %v4196_v20 }
 0x273   : > { %4414 = vmatprep.mubr.msk.f32.mxu0 %vm495_vm0, %v4197_v23 }
 0x276   : > { %4415 = vmatmul.mubr.msk.f32.gmra.mxu0 %vm495_vm0, %v4198_v24 }
 0x277   : > { %4417 = vmatprep.mubr.msk.f32.mxu0 %vm495_vm0, %v4199_v28 }
 0x27a   : > { %4418 = vmatmul.mubr.msk.f32.gmra.mxu0 %vm495_vm0, %v4200_v32  ;;  %v5418_v32 = vadd.s32 %v5311_v54, %v1889_v2 }
 0x27b   : > { %2983 = vmatprep.mubr.f32.mxu0 %v4657_v44 }
 0x27c   : > { %vm6581_vm0 = vcmp.lt.s32.totalorder %v5418_v32, 250 }
 0x29a   : > { %v1166_v56 = vpop.f32.mrf.mxu0  ;;  %v1327_v57 = vpop.f32.mrf.mxu1 }
 0x29b   : > { %v1167_v59 = vadd.f32 %v1166_v56, %v5340_v26  ;;  %v1328_v63 = vadd.f32 %v1327_v57, %v5345_v27 }
 0x29c   : > { %v1168_v1 = vpop.f32.mrf.mxu0  ;;  %v1329_v3 = vpop.f32.mrf.mxu1 }
 0x29d   : > { %v1169_v20 = vadd.f32 %v1168_v1, %v5351_v31  ;;  %v1330_v23 = vadd.f32 %v1329_v3, %v5356_v33  ;;  %v1744_v47 = vmax.f32 %v1167_v59, 0.0  ;;  %v1746_v10 = vmax.f32 %v1328_v63, 0.0 }
 0x29e   : > { %v1172_v24 = vpop.f32.mrf.mxu0  ;;  %v1333_v28 = vpop.f32.mrf.mxu1 }
 0x29f   : > { %v1173_v54 = vadd.f32 %v1172_v24, %v5340_v26  ;;  %v1334_v11 = vadd.f32 %v1333_v28, %v5345_v27  ;;  %v1745_v40 = vmax.f32 %v1169_v20, 0.0  ;;  %v1747_v42 = vmax.f32 %v1330_v23, 0.0 }
 0x2a0   : > { %v1174_v12 = vpop.f32.mrf.mxu0  ;;  %v1335_v14 = vpop.f32.mrf.mxu1  ;;  %v1924_v59 = vsel %vm1908_vm2, %v1744_v47, 0.0  ;;  %v1926_v61 = vsel %vm1908_vm2, %v1746_v10, 0.0 }
 0x2a1   : > { %v1175_v16 = vadd.f32 %v1174_v12, %v5351_v31  ;;  %v1336_v21 = vadd.f32 %v1335_v14, %v5356_v33  ;;  %v1752_v50 = vmax.f32 %v1173_v54, 0.0  ;;  %v1754_v52 = vmax.f32 %v1334_v11, 0.0 }
 0x2a2   : > { %v1178_v56 = vpop.f32.mrf.mxu0  ;;  %v1339_v57 = vpop.f32.mrf.mxu1  ;;  %v1925_v47 = vsel %vm1908_vm2, %v1745_v40, 0.0  ;;  %v1927_v10 = vsel %vm1908_vm2, %v1747_v42, 0.0 }
 0x2a3   : > { %v1753_v62 = vmax.f32 %v1175_v16, 0.0  ;;  %v1755_v2 = vmax.f32 %v1336_v21, 0.0  ;;  %v1179_v48 = vadd.f32 %v1178_v56, %v5340_v26  ;;  %v1340_v58 = vadd.f32 %v1339_v57, %v5345_v27 }
 0x2a4   : > { %v1932_v63 = vsel %vm1909_vm3, %v1752_v50, 0.0  ;;  %v1934_v1 = vsel %vm1909_vm3, %v1754_v52, 0.0  ;;  %v1180_v3 = vpop.f32.mrf.mxu0  ;;  %v1341_v15 = vpop.f32.mrf.mxu1 }
 0x2a5   : > { %v2052_v20 = vmax.f32 %v1924_v59, %v1932_v63  ;;  %v2094_v23 = vmax.f32 %v1926_v61, %v1934_v1  ;;  %v1933_v24 = vsel %vm1909_vm3, %v1753_v62, 0.0  ;;  %v1935_v28 = vsel %vm1909_vm3, %v1755_v2, 0.0 }
 0x2a6   : > { %v1760_v54 = vmax.f32 %v1179_v48, 0.0  ;;  %v1762_v11 = vmax.f32 %v1340_v58, 0.0  ;;  %v1184_v12 = vpop.f32.mrf.mxu0  ;;  %v1345_v14 = vpop.f32.mrf.mxu1  ;;  %v1181_v16 = vadd.f32 %v1180_v3, %v5351_v31  ;;  %v1342_v21 = vadd.f32 %v1341_v15, %v5356_v33 }
 0x2a7   : > { %v1185_v50 = vadd.f32 %v1184_v12, %v5340_v26  ;;  %v1346_v52 = vadd.f32 %v1345_v14, %v5345_v27  ;;  %v2073_v56 = vmax.f32 %v1925_v47, %v1933_v24  ;;  %v2115_v57 = vmax.f32 %v1927_v10, %v1935_v28  ;;  %v2526_v47 = vld [vmem:[%s6570_s3 + $0x8] sm:$0xff] }
 0x2a8   : > { %v1940_v40 = vsel %vm1910_vm4, %v1760_v54, 0.0  ;;  %v1942_v42 = vsel %vm1910_vm4, %v1762_v11, 0.0  ;;  %v1186_v62 = vpop.f32.mrf.mxu0  ;;  %v1347_v2 = vpop.f32.mrf.mxu1  ;;  %v1761_v59 = vmax.f32 %v1181_v16, 0.0  ;;  %v1763_v61 = vmax.f32 %v1342_v21, 0.0  ;;  %4432 = vmatprep.subr.mxu1 %v2526_v47 }
 0x2a9   : > { %v2053_v48 = vmax.f32 %v2052_v20, %v1940_v40  ;;  %v2095_v58 = vmax.f32 %v2094_v23, %v1942_v42  ;;  %v1768_v63 = vmax.f32 %v1185_v50, 0.0  ;;  %v1770_v1 = vmax.f32 %v1346_v52, 0.0  ;;  %4433 = vmatpush3.msra.mxu1 %v2526_v47  ;;  %v2525_v52 = vld [vmem:[%s6570_s3] sm:$0xff] }
 0x2aa   : > { %v1187_v3 = vadd.f32 %v1186_v62, %v5351_v31  ;;  %v1348_v15 = vadd.f32 %v1347_v2, %v5356_v33  ;;  %v1190_v24 = vpop.f32.mrf.mxu0  ;;  %v1351_v28 = vpop.f32.mrf.mxu1  ;;  %v1941_v20 = vsel %vm1910_vm4, %v1761_v59, 0.0  ;;  %v1943_v23 = vsel %vm1910_vm4, %v1763_v61, 0.0  ;;  %4434 = vmatprep.subr.mxu1 %v2525_v52 }
 0x2ab   : > { %v1191_v10 = vadd.f32 %v1190_v24, %v5340_v26  ;;  %v1352_v54 = vadd.f32 %v1351_v28, %v5345_v27  ;;  %v2074_v11 = vmax.f32 %v2073_v56, %v1941_v20  ;;  %v2116_v12 = vmax.f32 %v2115_v57, %v1943_v23  ;;  %4435 = vmatpush3.msra.mxu1 %v2525_v52 }
 0x2ac   : > { %v1948_v14 = vsel %vm1911_vm5, %v1768_v63, 0.0  ;;  %v1950_v16 = vsel %vm1911_vm5, %v1770_v1, 0.0  ;;  %v1192_v21 = vpop.f32.mrf.mxu0  ;;  %v1353_v50 = vpop.f32.mrf.mxu1  ;;  %v1769_v62 = vmax.f32 %v1187_v3, 0.0  ;;  %v1771_v2 = vmax.f32 %v1348_v15, 0.0 }
 0x2ad   : > { %v2054_v40 = vmax.f32 %v2053_v48, %v1948_v14  ;;  %v2096_v42 = vmax.f32 %v2095_v58, %v1950_v16  ;;  %v1776_v56 = vmax.f32 %v1191_v10, 0.0  ;;  %v1778_v57 = vmax.f32 %v1352_v54, 0.0 }
 0x2ae   : > { %v1193_v59 = vadd.f32 %v1192_v21, %v5351_v31  ;;  %v1354_v61 = vadd.f32 %v1353_v50, %v5356_v33  ;;  %v1196_v63 = vpop.f32.mrf.mxu0  ;;  %v1357_v1 = vpop.f32.mrf.mxu1  ;;  %v1949_v24 = vsel %vm1911_vm5, %v1769_v62, 0.0  ;;  %v1951_v48 = vsel %vm1911_vm5, %v1771_v2, 0.0 }
 0x2af   : > { %v1197_v58 = vadd.f32 %v1196_v63, %v5340_v26  ;;  %v1358_v3 = vadd.f32 %v1357_v1, %v5345_v27  ;;  %v2075_v15 = vmax.f32 %v2074_v11, %v1949_v24  ;;  %v2117_v28 = vmax.f32 %v2116_v12, %v1951_v48 }
 0x2b0   : > { %v1956_v47 = vsel %vm1912_vm6, %v1776_v56, 0.0  ;;  %v1958_v20 = vsel %vm1912_vm6, %v1778_v57, 0.0  ;;  %v1198_v23 = vpop.f32.mrf.mxu0  ;;  %v1359_v10 = vpop.f32.mrf.mxu1  ;;  %v1777_v16 = vmax.f32 %v1193_v59, 0.0  ;;  %v1779_v21 = vmax.f32 %v1354_v61, 0.0 }
 0x2b1   : > { %v2055_v54 = vmax.f32 %v2054_v40, %v1956_v47  ;;  %v2097_v14 = vmax.f32 %v2096_v42, %v1958_v20  ;;  %v1784_v50 = vmax.f32 %v1197_v58, 0.0  ;;  %v1786_v52 = vmax.f32 %v1358_v3, 0.0 }
 0x2b2   : > { %v1199_v62 = vadd.f32 %v1198_v23, %v5351_v31  ;;  %v1360_v11 = vadd.f32 %v1359_v10, %v5356_v33  ;;  %v1202_v12 = vpop.f32.mrf.mxu0  ;;  %v1363_v2 = vpop.f32.mrf.mxu1  ;;  %v1957_v56 = vsel %vm1912_vm6, %v1777_v16, 0.0  ;;  %v1959_v57 = vsel %vm1912_vm6, %v1779_v21, 0.0 }
 0x2b3   : > { %v1203_v40 = vadd.f32 %v1202_v12, %v5340_v26  ;;  %v1364_v42 = vadd.f32 %v1363_v2, %v5345_v27  ;;  %v2076_v59 = vmax.f32 %v2075_v15, %v1957_v56  ;;  %v2118_v61 = vmax.f32 %v2117_v28, %v1959_v57 }
 0x2b4   : > { %v1964_v63 = vsel %vm1913_vm7, %v1784_v50, 0.0  ;;  %v1966_v1 = vsel %vm1913_vm7, %v1786_v52, 0.0  ;;  %v1204_v24 = vpop.f32.mrf.mxu0  ;;  %v1365_v48 = vpop.f32.mrf.mxu1  ;;  %v1785_v47 = vmax.f32 %v1199_v62, 0.0  ;;  %v1787_v20 = vmax.f32 %v1360_v11, 0.0 }
 0x2b5   : > { %v2056_v58 = vmax.f32 %v2055_v54, %v1964_v63  ;;  %v2098_v3 = vmax.f32 %v2097_v14, %v1966_v1  ;;  %v1792_v23 = vmax.f32 %v1203_v40, 0.0  ;;  %v1794_v10 = vmax.f32 %v1364_v42, 0.0 }
 0x2b6   : > { %v1205_v16 = vadd.f32 %v1204_v24, %v5351_v31  ;;  %v1366_v15 = vadd.f32 %v1365_v48, %v5356_v33  ;;  %v1208_v28 = vpop.f32.mrf.mxu0  ;;  %v1369_v21 = vpop.f32.mrf.mxu1  ;;  %v1965_v50 = vsel %vm1913_vm7, %v1785_v47, 0.0  ;;  %v1967_v52 = vsel %vm1913_vm7, %v1787_v20, 0.0 }
 0x2b7   : > { %v1209_v54 = vadd.f32 %v1208_v28, %v5340_v26  ;;  %v1370_v14 = vadd.f32 %v1369_v21, %v5345_v27  ;;  %v2077_v62 = vmax.f32 %v2076_v59, %v1965_v50  ;;  %v2119_v11 = vmax.f32 %v2118_v61, %v1967_v52 }
 0x2b8   : > { %v1972_v12 = vsel %vm1914_vm8, %v1792_v23, 0.0  ;;  %v1974_v2 = vsel %vm1914_vm8, %v1794_v10, 0.0  ;;  %v1210_v56 = vpop.f32.mrf.mxu0  ;;  %v1371_v57 = vpop.f32.mrf.mxu1  ;;  %v1793_v63 = vmax.f32 %v1205_v16, 0.0  ;;  %v1795_v1 = vmax.f32 %v1366_v15, 0.0 }
 0x2b9   : > { %v2057_v40 = vmax.f32 %v2056_v58, %v1972_v12  ;;  %v2099_v42 = vmax.f32 %v2098_v3, %v1974_v2  ;;  %v1800_v24 = vmax.f32 %v1209_v54, 0.0  ;;  %v1802_v48 = vmax.f32 %v1370_v14, 0.0 }
 0x2ba   : > { %v1211_v47 = vadd.f32 %v1210_v56, %v5351_v31  ;;  %v1372_v59 = vadd.f32 %v1371_v57, %v5356_v33  ;;  %v1214_v61 = vpop.f32.mrf.mxu0  ;;  %v1375_v20 = vpop.f32.mrf.mxu1  ;;  %v1973_v23 = vsel %vm1914_vm8, %v1793_v63, 0.0  ;;  %v1975_v10 = vsel %vm1914_vm8, %v1795_v1, 0.0 }
 0x2bb   : > { %v1215_v58 = vadd.f32 %v1214_v61, %v5340_v26  ;;  %v1376_v3 = vadd.f32 %v1375_v20, %v5345_v27  ;;  %v2078_v16 = vmax.f32 %v2077_v62, %v1973_v23  ;;  %v2120_v15 = vmax.f32 %v2119_v11, %v1975_v10 }
 0x2bc   : > { %v1980_v28 = vsel %vm1915_vm9, %v1800_v24, 0.0  ;;  %v1982_v21 = vsel %vm1915_vm9, %v1802_v48, 0.0  ;;  %v1216_v50 = vpop.f32.mrf.mxu0  ;;  %v1377_v52 = vpop.f32.mrf.mxu1  ;;  %v1801_v12 = vmax.f32 %v1211_v47, 0.0  ;;  %v1803_v2 = vmax.f32 %v1372_v59, 0.0 }
 0x2bd   : > { %v2058_v54 = vmax.f32 %v2057_v40, %v1980_v28  ;;  %v2100_v14 = vmax.f32 %v2099_v42, %v1982_v21  ;;  %v1808_v56 = vmax.f32 %v1215_v58, 0.0  ;;  %v1810_v57 = vmax.f32 %v1376_v3, 0.0 }
 0x2be   : > { %v1217_v63 = vadd.f32 %v1216_v50, %v5351_v31  ;;  %v1378_v62 = vadd.f32 %v1377_v52, %v5356_v33  ;;  %v1220_v11 = vpop.f32.mrf.mxu0  ;;  %v1381_v1 = vpop.f32.mrf.mxu1  ;;  %v1981_v24 = vsel %vm1915_vm9, %v1801_v12, 0.0  ;;  %v1983_v48 = vsel %vm1915_vm9, %v1803_v2, 0.0 }
 0x2bf   : > { %v1221_v40 = vadd.f32 %v1220_v11, %v5340_v26  ;;  %v1382_v42 = vadd.f32 %v1381_v1, %v5345_v27  ;;  %v2079_v47 = vmax.f32 %v2078_v16, %v1981_v24  ;;  %v2121_v59 = vmax.f32 %v2120_v15, %v1983_v48 }
 0x2c0   : > { %v1988_v61 = vsel %vm1916_vm10, %v1808_v56, 0.0  ;;  %v1990_v20 = vsel %vm1916_vm10, %v1810_v57, 0.0  ;;  %v1222_v23 = vpop.f32.mrf.mxu0  ;;  %v1383_v10 = vpop.f32.mrf.mxu1  ;;  %v1809_v28 = vmax.f32 %v1217_v63, 0.0  ;;  %v1811_v21 = vmax.f32 %v1378_v62, 0.0 }
 0x2c1   : > { %v2059_v58 = vmax.f32 %v2058_v54, %v1988_v61  ;;  %v2101_v3 = vmax.f32 %v2100_v14, %v1990_v20  ;;  %v1816_v50 = vmax.f32 %v1221_v40, 0.0  ;;  %v1818_v52 = vmax.f32 %v1382_v42, 0.0 }
 0x2c2   : > { %v1223_v12 = vadd.f32 %v1222_v23, %v5351_v31  ;;  %v1384_v16 = vadd.f32 %v1383_v10, %v5356_v33  ;;  %v1226_v15 = vpop.f32.mrf.mxu0  ;;  %v1387_v2 = vpop.f32.mrf.mxu1  ;;  %v1989_v56 = vsel %vm1916_vm10, %v1809_v28, 0.0  ;;  %v1991_v57 = vsel %vm1916_vm10, %v1811_v21, 0.0  ;;  %v2870_v23 = vld [vmem:[#allocation3 + $0x3c8] sm:$0xff]  ;;  %v2872_v10 = vld [vmem:[#allocation3 + $0x3d8] sm:$0xff]  ;;  %v2869_v28 = vld [vmem:[#allocation3 + $0x3c0] sm:$0xff] }
 0x2c3   : > { %v1227_v54 = vadd.f32 %v1226_v15, %v5340_v26  ;;  %v1388_v14 = vadd.f32 %v1387_v2, %v5345_v27  ;;  %v2080_v63 = vmax.f32 %v2079_v47, %v1989_v56  ;;  %v2122_v62 = vmax.f32 %v2121_v59, %v1991_v57  ;;  %2919 = vmatprep.subr.mxu0 %v2870_v23  ;;  %v2861_v56 = vld [vmem:[#allocation3 + $0x380] sm:$0xff]  ;;  %v2854_v57 = vld [vmem:[#allocation3 + $0x348] sm:$0xff] }
 0x2c4   : > { %v1996_v11 = vsel %vm1917_vm11, %v1816_v50, 0.0  ;;  %v1998_v1 = vsel %vm1917_vm11, %v1818_v52, 0.0  ;;  %v1228_v24 = vpop.f32.mrf.mxu0  ;;  %v1389_v48 = vpop.f32.mrf.mxu1  ;;  %v1817_v61 = vmax.f32 %v1223_v12, 0.0  ;;  %v1819_v20 = vmax.f32 %v1384_v16, 0.0  ;;  %3080 = vmatprep.subr.mxu1 %v2872_v10  ;;  %v2862_v52 = vld [vmem:[#allocation3 + $0x388] sm:$0xff]  ;;  %2920 = vmatpush1.msra.mxu0 %v2869_v28 }
 0x2c5   : > { %v2060_v40 = vmax.f32 %v2059_v58, %v1996_v11  ;;  %v2102_v42 = vmax.f32 %v2101_v3, %v1998_v1  ;;  %v1824_v21 = vmax.f32 %v1227_v54, 0.0  ;;  %v1826_v47 = vmax.f32 %v1388_v14, 0.0  ;;  %2921 = vmatprep.subr.mxu0 %v2862_v52  ;;  %v2846_v28 = vld [vmem:[#allocation3 + $0x308] sm:$0xff] }
 0x2c6   : > { %v1229_v59 = vadd.f32 %v1228_v24, %v5351_v31  ;;  %v1390_v50 = vadd.f32 %v1389_v48, %v5356_v33  ;;  %v1232_v15 = vpop.f32.mrf.mxu0  ;;  %v1393_v2 = vpop.f32.mrf.mxu1  ;;  %v1997_v58 = vsel %vm1917_vm11, %v1817_v61, 0.0  ;;  %v1999_v3 = vsel %vm1917_vm11, %v1819_v20, 0.0  ;;  %v2853_v61 = vld [vmem:[#allocation3 + $0x340] sm:$0xff]  ;;  %2922 = vmatpush1.msra.mxu0 %v2861_v56  ;;  %v2838_v52 = vld [vmem:[#allocation3 + $0x2c8] sm:$0xff] }
 0x2c7   : > { %v1233_v12 = vadd.f32 %v1232_v15, %v5340_v26  ;;  %v1394_v16 = vadd.f32 %v1393_v2, %v5345_v27  ;;  %v2081_v54 = vmax.f32 %v2080_v63, %v1997_v58  ;;  %v2123_v14 = vmax.f32 %v2122_v62, %v1999_v3  ;;  %2923 = vmatprep.subr.mxu0 %v2854_v57  ;;  %v2845_v3 = vld [vmem:[#allocation3 + $0x300] sm:$0xff] }
 0x2c8   : > { %v2004_v11 = vsel %vm1918_vm12, %v1824_v21, 0.0  ;;  %v2006_v1 = vsel %vm1918_vm12, %v1826_v47, 0.0  ;;  %v1234_v24 = vpop.f32.mrf.mxu0  ;;  %v1395_v48 = vpop.f32.mrf.mxu1  ;;  %v1825_v10 = vmax.f32 %v1229_v59, 0.0  ;;  %v1827_v15 = vmax.f32 %v1390_v50, 0.0  ;;  %2924 = vmatpush1.msra.mxu0 %v2853_v61  ;;  %v2830_v61 = vld [vmem:[#allocation3 + $0x288] sm:$0xff] }
 0x2c9   : > { %v2061_v20 = vmax.f32 %v2060_v40, %v2004_v11  ;;  %v2103_v23 = vmax.f32 %v2102_v42, %v2006_v1  ;;  %v1832_v63 = vmax.f32 %v1233_v12, 0.0  ;;  %v1834_v62 = vmax.f32 %v1394_v16, 0.0  ;;  %2925 = vmatprep.subr.mxu0 %v2846_v28 }
 0x2ca   : > { %v1235_v2 = vadd.f32 %v1234_v24, %v5351_v31  ;;  %v1396_v21 = vadd.f32 %v1395_v48, %v5356_v33  ;;  %v1238_v58 = vpop.f32.mrf.mxu0  ;;  %v1399_v47 = vpop.f32.mrf.mxu1  ;;  %v2005_v40 = vsel %vm1918_vm12, %v1825_v10, 0.0  ;;  %v2007_v42 = vsel %vm1918_vm12, %v1827_v15, 0.0  ;;  %v2837_v24 = vld [vmem:[#allocation3 + $0x2c0] sm:$0xff]  ;;  %2926 = vmatpush1.msra.mxu0 %v2845_v3 }
 0x2cb   : > { %v1239_v59 = vadd.f32 %v1238_v58, %v5340_v26  ;;  %v1400_v50 = vadd.f32 %v1399_v47, %v5345_v27  ;;  %v2082_v12 = vmax.f32 %v2081_v54, %v2005_v40  ;;  %v2124_v16 = vmax.f32 %v2123_v14, %v2007_v42  ;;  %2927 = vmatprep.subr.mxu0 %v2838_v52  ;;  %v2829_v42 = vld [vmem:[#allocation3 + $0x280] sm:$0xff] }
 0x2cc   : > { %v2012_v56 = vsel %vm1919_vm13, %v1832_v63, 0.0  ;;  %v2014_v57 = vsel %vm1919_vm13, %v1834_v62, 0.0  ;;  %v1240_v11 = vpop.f32.mrf.mxu0  ;;  %v1401_v1 = vpop.f32.mrf.mxu1  ;;  %v1833_v15 = vmax.f32 %v1235_v2, 0.0  ;;  %v1835_v58 = vmax.f32 %v1396_v21, 0.0  ;;  %2928 = vmatpush1.msra.mxu0 %v2837_v24  ;;  %v2822_v21 = vld [vmem:[#allocation3 + $0x248] sm:$0xff] }
 0x2cd   : > { %v2062_v48 = vmax.f32 %v2061_v20, %v2012_v56  ;;  %v2104_v10 = vmax.f32 %v2103_v23, %v2014_v57  ;;  %v1840_v54 = vmax.f32 %v1239_v59, 0.0  ;;  %v1842_v14 = vmax.f32 %v1400_v50, 0.0  ;;  %2929 = vmatprep.subr.mxu0 %v2830_v61  ;;  %v2814_v24 = vld [vmem:[#allocation3 + $0x208] sm:$0xff] }
 0x2ce   : > { %v1241_v47 = vadd.f32 %v1240_v11, %v5351_v31  ;;  %v1402_v63 = vadd.f32 %v1401_v1, %v5356_v33  ;;  %v1244_v40 = vpop.f32.mrf.mxu0  ;;  %v1405_v62 = vpop.f32.mrf.mxu1  ;;  %v2013_v20 = vsel %vm1919_vm13, %v1833_v15, 0.0  ;;  %v2015_v23 = vsel %vm1919_vm13, %v1835_v58, 0.0  ;;  %v2821_v11 = vld [vmem:[#allocation3 + $0x240] sm:$0xff]  ;;  %2930 = vmatpush1.msra.mxu0 %v2829_v42 }
 0x2cf   : > { %v1245_v28 = vadd.f32 %v1244_v40, %v5340_v26  ;;  %v1406_v2 = vadd.f32 %v1405_v62, %v5345_v27  ;;  %v2083_v3 = vmax.f32 %v2082_v12, %v2013_v20  ;;  %v2125_v59 = vmax.f32 %v2124_v16, %v2015_v23  ;;  %2931 = vmatprep.subr.mxu0 %v2822_v21  ;;  %v2813_v23 = vld [vmem:[#allocation3 + $0x200] sm:$0xff] }
 0x2d0   : > { %v2020_v50 = vsel %vm6583_vm14, %v1840_v54, 0.0  ;;  %v2022_v52 = vsel %vm6583_vm14, %v1842_v14, 0.0  ;;  %v1246_v56 = vpop.f32.mrf.mxu0  ;;  %v1407_v57 = vpop.f32.mrf.mxu1  ;;  %v1841_v58 = vmax.f32 %v1241_v47, 0.0  ;;  %v1843_v40 = vmax.f32 %v1402_v63, 0.0  ;;  %2932 = vmatpush1.msra.mxu0 %v2821_v11  ;;  %v2806_v63 = vld [vmem:[#allocation3 + $0x1c8] sm:$0xff] }
 0x2d1   : > { %v2063_v1 = vmax.f32 %v2062_v48, %v2020_v50  ;;  %v2105_v15 = vmax.f32 %v2104_v10, %v2022_v52  ;;  %v1848_v12 = vmax.f32 %v1245_v28, 0.0  ;;  %v1850_v16 = vmax.f32 %v1406_v2, 0.0  ;;  %2933 = vmatprep.subr.mxu0 %v2814_v24 }
 0x2d2   : > { %v1247_v62 = vadd.f32 %v1246_v56, %v5351_v31  ;;  %v1408_v54 = vadd.f32 %v1407_v57, %v5356_v33  ;;  %v1250_v20 = vpop.f32.mrf.mxu0  ;;  %v1411_v14 = vpop.f32.mrf.mxu1  ;;  %v2021_v48 = vsel %vm6583_vm14, %v1841_v58, 0.0  ;;  %v2023_v10 = vsel %vm6583_vm14, %v1843_v40, 0.0  ;;  %v2805_v56 = vld [vmem:[#allocation3 + $0x1c0] sm:$0xff]  ;;  %2934 = vmatpush1.msra.mxu0 %v2813_v23 }
 0x2d3   : > { %v1251_v61 = vadd.f32 %v1250_v20, %v5340_v26  ;;  %v1412_v47 = vadd.f32 %v1411_v14, %v5345_v27  ;;  %v2084_v42 = vmax.f32 %v2083_v3, %v2021_v48  ;;  %v2126_v28 = vmax.f32 %v2125_v59, %v2023_v10  ;;  %v2798_v14 = vld [vmem:[#allocation3 + $0x188] sm:$0xff]  ;;  %2935 = vmatprep.subr.mxu0 %v2806_v63 }
 0x2d4   : > { %v2028_v2 = vsel %vm6582_vm15, %v1848_v12, 0.0  ;;  %v2030_v21 = vsel %vm6582_vm15, %v1850_v16, 0.0  ;;  %v1252_v50 = vpop.f32.mrf.mxu0  ;;  %v1413_v52 = vpop.f32.mrf.mxu1  ;;  %v1849_v40 = vmax.f32 %v1247_v62, 0.0  ;;  %v1851_v20 = vmax.f32 %v1408_v54, 0.0  ;;  %v2797_v16 = vld [vmem:[#allocation3 + $0x180] sm:$0xff]  ;;  %2936 = vmatpush1.msra.mxu0 %v2805_v56  ;;  %v2790_v54 = vld [vmem:[#allocation3 + $0x148] sm:$0xff] }
 0x2d5   : > { %v2064_v57 = vmax.f32 %v2063_v1, %v2028_v2  ;;  %v2106_v58 = vmax.f32 %v2105_v15, %v2030_v21  ;;  %v1856_v11 = vmax.f32 %v1251_v61, 0.0  ;;  %v1858_v13 = vmax.f32 %v1412_v47, 0.0  ;;  %2937 = vmatprep.subr.mxu0 %v2798_v14  ;;  %v2789_v21 = vld [vmem:[#allocation3 + $0x140] sm:$0xff] }
 0x2d6   : > { %v1253_v3 = vadd.f32 %v1252_v50, %v5351_v31  ;;  %v1414_v59 = vadd.f32 %v1413_v52, %v5356_v33  ;;  %v1256_v12 = vpop.f32.mrf.mxu0  ;;  %v1417_v48 = vpop.f32.mrf.mxu1  ;;  %v2029_v24 = vsel %vm6582_vm15, %v1849_v40, 0.0  ;;  %v2031_v1 = vsel %vm6582_vm15, %v1851_v20, 0.0  ;;  %2938 = vmatpush1.msra.mxu0 %v2797_v16 }
 0x2d7   : > { %v1257_v15 = vadd.f32 %v1256_v12, %v5340_v26  ;;  %v1418_v62 = vadd.f32 %v1417_v48, %v5345_v27  ;;  %v2085_v23 = vmax.f32 %v2084_v42, %v2029_v24  ;;  %v2127_v10 = vmax.f32 %v2126_v28, %v2031_v1  ;;  %v2782_v27 = vld [vmem:[#allocation3 + $0x108] sm:$0xff]  ;;  %2939 = vmatprep.subr.mxu0 %v2790_v54 }
 0x2d8   : > { %v2036_v61 = vsel %vm6581_vm0, %v1856_v11, 0.0  ;;  %v2038_v47 = vsel %vm6581_vm0, %v1858_v13, 0.0  ;;  %v1258_v63 = vpop.f32.mrf.mxu0  ;;  %v1419_v2 = vpop.f32.mrf.mxu1  ;;  %v1857_v40 = vmax.f32 %v1253_v3, 0.0  ;;  %v1859_v26 = vmax.f32 %v1414_v59, 0.0  ;;  %v2781_v13 = vld [vmem:[#allocation3 + $0x100] sm:$0xff]  ;;  %2940 = vmatpush1.msra.mxu0 %v2789_v21  ;;  %v2774_v59 = vld [vmem:[#allocation3 + $0xc8] sm:$0xff] }
 0x2d9   : > { %v2065_v50 = vmax.f32 %v2064_v57, %v2036_v61  ;;  %v2107_v52 = vmax.f32 %v2106_v58, %v2038_v47  ;;  %v1864_v56 = vmax.f32 %v1257_v15, 0.0  ;;  %v1866_v20 = vmax.f32 %v1418_v62, 0.0  ;;  %2941 = vmatprep.subr.mxu0 %v2782_v27  ;;  %v2773_v15 = vld [vmem:[#allocation3 + $0xc0] sm:$0xff] }
 0x2da   : > { %v1259_v42 = vadd.f32 %v1258_v63, %v5351_v31  ;;  %v1420_v28 = vadd.f32 %v1419_v2, %v5356_v33  ;;  %v1488_v11 = vpop.f32.mrf.mxu0  ;;  %v1655_v12 = vpop.f32.mrf.mxu1  ;;  %v2037_v14 = vsel %vm6581_vm0, %v1857_v40, 0.0  ;;  %v2039_v57 = vsel %vm6581_vm0, %v1859_v26, 0.0  ;;  %2942 = vmatpush1.msra.mxu0 %v2781_v13 }
 0x2db   : > { %v1489_v58 = vadd.f32 %v1488_v11, %v5426_v22  ;;  %v1656_v3 = vadd.f32 %v1655_v12, %v5431_v37  ;;  %v2086_v48 = vmax.f32 %v2085_v23, %v2037_v14  ;;  %v2128_v31 = vmax.f32 %v2127_v10, %v2039_v57  ;;  %2943 = vmatprep.subr.mxu0 %v2774_v59 }
 0x2dc   : > { %v2044_v33 = vsel %vm6580_vm1, %v1864_v56, 0.0  ;;  %v2046_v16 = vsel %vm6580_vm1, %v1866_v20, 0.0  ;;  %v1490_v24 = vpop.f32.mrf.mxu0  ;;  %v1657_v1 = vpop.f32.mrf.mxu1  ;;  %v1865_v61 = vmax.f32 %v1259_v42, 0.0  ;;  %v1867_v47 = vmax.f32 %v1420_v28, 0.0  ;;  %2944 = vmatpush1.msra.mxu0 %v2773_v15 }
 0x2dd   : > { %v2066_v62 = vmax.f32 %v2065_v50, %v2044_v33  ;;  %v2108_v54 = vmax.f32 %v2107_v52, %v2046_v16  ;;  %v1748_v63 = vmax.f32 %v1489_v58, 0.0  ;;  %v1758_v2 = vmax.f32 %v1656_v3, 0.0 }
 0x2de   : > { %v1491_v23 = vadd.f32 %v1490_v24, %v5436_v43  ;;  %v1658_v10 = vadd.f32 %v1657_v1, %v5446_v25  ;;  %v1494_v21 = vpop.f32.mrf.mxu0  ;;  %v1661_v40 = vpop.f32.mrf.mxu1  ;;  %v2045_v27 = vsel %vm6580_vm1, %v1865_v61, 0.0  ;;  %v2047_v50 = vsel %vm6580_vm1, %v1867_v47, 0.0 }
 0x2df   : > { %v2067_v26 = vrot.slane %v2066_v62, 4  ;;  %v2109_v56 = vrot.slane %v2108_v54, 4  ;;  %v2087_v52 = vmax.f32 %v2086_v48, %v2045_v27  ;;  %v2129_v20 = vmax.f32 %v2128_v31, %v2047_v50 }
 0x2e0   : > { %v5657_v42 = vsel %vm1908_vm2, %v1748_v63, 0.0  ;;  %v1496_v28 = vpop.f32.mrf.mxu0  ;;  %v1663_v11 = vpop.f32.mrf.mxu1  ;;  %v5662_v12 = vsub.s32 %v2243_v29, %v5303_v41  ;;  %v1749_v57 = vmax.f32 %v1491_v23, 0.0  ;;  %v1759_v58 = vmax.f32 %v1658_v10, 0.0 }
 0x2e1   : > { %v2068_v13 = vmax.f32 %v2066_v62, %v2067_v26  ;;  %v2110_v14 = vmax.f32 %v2108_v54, %v2109_v56  ;;  %v2088_v3 = vrot.slane %v2087_v52, 4  ;;  %v2130_v59 = vrot.slane %v2129_v20, 4 }
 0x2e2   : > { %v1495_v48 = vadd.f32 %v1494_v21, %v5426_v22  ;;  %v1662_v31 = vadd.f32 %v1661_v40, %v5431_v37  ;;  %v1500_v33 = vpop.f32.mrf.mxu0  ;;  %v1667_v16 = vpop.f32.mrf.mxu1  ;;  %v5668_v15 = vsel %vm1909_vm3, %v1758_v2, 0.0  ;;  %v5672_v17 = vsel %vm1908_vm2, %v1749_v57, 0.0 }
 0x2e3   : > { %v2069_v24 = vrot.slane %v2068_v13, 2  ;;  %v2111_v1 = vrot.slane %v2110_v14, 2  ;;  %v2089_v29 = vmax.f32 %v2087_v52, %v2088_v3  ;;  %v2131_v62 = vmax.f32 %v2129_v20, %v2130_v59 }
 0x2e4   : > { %v1756_v54 = vmax.f32 %v1495_v48, 0.0  ;;  %v1766_v61 = vmax.f32 %v1662_v31, 0.0  ;;  %v1502_v47 = vpop.f32.mrf.mxu0  ;;  %v1669_v63 = vpop.f32.mrf.mxu1  ;;  %v1497_v21 = vadd.f32 %v1496_v28, %v5436_v43  ;;  %v1664_v40 = vadd.f32 %v1663_v11, %v5446_v25 }
 0x2e5   : > { %v2070_v23 = vmax.f32 %v2068_v13, %v2069_v24  ;;  %v2112_v10 = vmax.f32 %v2110_v14, %v2111_v1  ;;  %v2090_v26 = vrot.slane %v2089_v29, 2  ;;  %v2132_v56 = vrot.slane %v2131_v62, 2 }
 0x2e6   : > { %v5678_v2 = vsel %vm1909_vm3, %v1759_v58, 0.0  ;;  %v1936_v27 = vsel %vm1909_vm3, %v1756_v54, 0.0  ;;  %v1506_v50 = vpop.f32.mrf.mxu0  ;;  %v1673_v52 = vpop.f32.mrf.mxu1  ;;  %v1946_v28 = vsel %vm1910_vm4, %v1766_v61, 0.0  ;;  %v1757_v3 = vmax.f32 %v1497_v21, 0.0 }
 0x2e7   : > { %v2071_v20 = vrot.slane %v2070_v23, 1  ;;  %v2113_v57 = vrot.slane %v2112_v10, 1  ;;  %v2136_v13 = vmax.f32 %v5657_v42, %v1936_v27  ;;  %v2091_v14 = vmax.f32 %v2089_v29, %v2090_v26 }
 0x2e8   : > { %v2133_v11 = vmax.f32 %v2131_v62, %v2132_v56  ;;  %v1767_v59 = vmax.f32 %v1664_v40, 0.0  ;;  %v1508_v48 = vpop.f32.mrf.mxu0  ;;  %v1675_v31 = vpop.f32.mrf.mxu1  ;;  %v1501_v1 = vadd.f32 %v1500_v33, %v5426_v22  ;;  %v1668_v54 = vadd.f32 %v1667_v16, %v5431_v37 }
 0x2e9   : > { %v2072_v58 = vmax.f32 %v2070_v23, %v2071_v20  ;;  %v2114_v24 = vmax.f32 %v2112_v10, %v2113_v57  ;;  %v2092_v46 = vrot.slane %v2091_v14, 1  ;;  %v2178_v5 = vmax.f32 %v1946_v28, %v5668_v15 }
 0x2ea   : > { %v2134_v7 = vrot.slane %v2133_v11, 1  ;;  %v1937_v42 = vsel %vm1909_vm3, %v1757_v3, 0.0  ;;  %v1512_v61 = vpop.f32.mrf.mxu0  ;;  %v1679_v29 = vpop.f32.mrf.mxu1  ;;  %v1947_v23 = vsel %vm1910_vm4, %v1767_v59, 0.0  ;;  %v1764_v26 = vmax.f32 %v1501_v1, 0.0 }
 0x2eb   : > { %v2220_v62 = vmax.f32 %v2072_v58, 0.0  ;;  %v2222_v21 = vmax.f32 %v2114_v24, 0.0  ;;  %v2157_v40 = vmax.f32 %v5672_v17, %v1937_v42  ;;  %v2093_v10 = vmax.f32 %v2091_v14, %v2092_v46 }
 0x2ec   : > { %v2135_v33 = vmax.f32 %v2133_v11, %v2134_v7  ;;  %v1774_v16 = vmax.f32 %v1668_v54, 0.0  ;;  %v1514_v56 = vpop.f32.mrf.mxu0  ;;  %v1681_v27 = vpop.f32.mrf.mxu1  ;;  %v1503_v15 = vadd.f32 %v1502_v47, %v5436_v43  ;;  %v1670_v20 = vadd.f32 %v1669_v63, %v5446_v25 }
 0x2ed   : > { %v1507_v57 = vadd.f32 %v1506_v50, %v5426_v22  ;;  %v1674_v28 = vadd.f32 %v1673_v52, %v5431_v37  ;;  %v2221_v3 = vmax.f32 %v2093_v10, 0.0  ;;  %v1944_v17 = vsel %vm1910_vm4, %v1764_v26, 0.0 }
 0x2ee   : > { %v2223_v58 = vmax.f32 %v2135_v33, 0.0  ;;  %v1954_v7 = vsel %vm1911_vm5, %v1774_v16, 0.0  ;;  %v1518_v46 = vpop.f32.mrf.mxu0  ;;  %v1685_v14 = vpop.f32.mrf.mxu1  ;;  %v2199_v11 = vmax.f32 %v1947_v23, %v5678_v2  ;;  %v2137_v59 = vmax.f32 %v2136_v13, %v1944_v17 }
 0x2ef   : > { %v1765_v47 = vmax.f32 %v1503_v15, 0.0  ;;  %v1775_v24 = vmax.f32 %v1670_v20, 0.0  ;;  %v5702_v63 = vcombine.low %v2220_v62, %v2221_v3  ;;  %v2179_v50 = vmax.f32 %v2178_v5, %v1954_v7 }
 0x2f0   : > { %v1772_v1 = vmax.f32 %v1507_v57, 0.0  ;;  %v1782_v52 = vmax.f32 %v1674_v28, 0.0  ;;  %v1520_v54 = vpop.f32.mrf.mxu0  ;;  %v1687_v42 = vpop.f32.mrf.mxu1  ;;  %v1509_v26 = vadd.f32 %v1508_v48, %v5436_v43  ;;  %v1676_v2 = vadd.f32 %v1675_v31, %v5446_v25 }
 0x2f1   : > { %v1945_v10 = vsel %vm1910_vm4, %v1765_v47, 0.0  ;;  %v1955_v33 = vsel %vm1911_vm5, %v1775_v24, 0.0  ;;  %v5710_v13 = vcombine.low %v2222_v21, %v2223_v58  ;;  %v1513_v17 = vadd.f32 %v1512_v61, %v5426_v22 }
 0x2f2   : > { %v2158_v23 = vmax.f32 %v2157_v40, %v1945_v10  ;;  %v1952_v5 = vsel %vm1911_vm5, %v1772_v1, 0.0  ;;  %v1962_v62 = vsel %vm1912_vm6, %v1782_v52, 0.0  ;;  %v1524_v16 = vpop.f32.mrf.mxu0  ;;  %v1691_v15 = vpop.f32.mrf.mxu1  ;;  %v2200_v20 = vmax.f32 %v2199_v11, %v1955_v33 }
 0x2f3   : > { %v2138_v57 = vmax.f32 %v2137_v59, %v1952_v5  ;;  %v1773_v28 = vmax.f32 %v1509_v26, 0.0  ;;  %v1783_v3 = vmax.f32 %v1676_v2, 0.0  ;;  %v1680_v48 = vadd.f32 %v1679_v29, %v5431_v37 }
 0x2f4   : > { %v1515_v31 = vadd.f32 %v1514_v56, %v5436_v43  ;;  %v1682_v21 = vadd.f32 %v1681_v27, %v5446_v25  ;;  %v1526_v40 = vpop.f32.mrf.mxu0  ;;  %v1693_v58 = vpop.f32.mrf.mxu1  ;;  %v2180_v7 = vmax.f32 %v2179_v50, %v1962_v62  ;;  %v1519_v24 = vadd.f32 %v1518_v46, %v5426_v22 }
 0x2f5   : > { %v1953_v47 = vsel %vm1911_vm5, %v1773_v28, 0.0  ;;  %v1686_v11 = vadd.f32 %v1685_v14, %v5431_v37  ;;  %v1963_v61 = vsel %vm1912_vm6, %v1783_v3, 0.0  ;;  %v1780_v1 = vmax.f32 %v1513_v17, 0.0 }
 0x2f6   : > { %v2159_v59 = vmax.f32 %v2158_v23, %v1953_v47  ;;  %v1790_v29 = vmax.f32 %v1680_v48, 0.0  ;;  %v1530_v52 = vpop.f32.mrf.mxu0  ;;  %v1697_v56 = vpop.f32.mrf.mxu1  ;;  %v1781_v10 = vmax.f32 %v1515_v31, 0.0  ;;  %v1791_v27 = vmax.f32 %v1682_v21, 0.0 }
 0x2f7   : > { %v1788_v33 = vmax.f32 %v1519_v24, 0.0  ;;  %v1798_v26 = vmax.f32 %v1686_v11, 0.0  ;;  %v1960_v50 = vsel %vm1912_vm6, %v1780_v1, 0.0  ;;  %v1521_v14 = vadd.f32 %v1520_v54, %v5436_v43 }
 0x2f8   : > { %v1970_v46 = vsel %vm1913_vm7, %v1790_v29, 0.0  ;;  %v1688_v2 = vadd.f32 %v1687_v42, %v5446_v25  ;;  %v1532_v23 = vpop.f32.mrf.mxu0  ;;  %v1699_v5 = vpop.f32.mrf.mxu1  ;;  %v2201_v62 = vmax.f32 %v2200_v20, %v1963_v61  ;;  %v2139_v28 = vmax.f32 %v2138_v57, %v1960_v50 }
 0x2f9   : > { %v1961_v3 = vsel %vm1912_vm6, %v1781_v10, 0.0  ;;  %v1971_v17 = vsel %vm1913_vm7, %v1791_v27, 0.0  ;;  %v2181_v48 = vmax.f32 %v2180_v7, %v1970_v46  ;;  %v1968_v21 = vsel %vm1913_vm7, %v1788_v33, 0.0 }
 0x2fa   : > { %v2160_v31 = vmax.f32 %v2159_v59, %v1961_v3  ;;  %v1978_v54 = vsel %vm1914_vm8, %v1798_v26, 0.0  ;;  %v1536_v47 = vpop.f32.mrf.mxu0  ;;  %v1703_v42 = vpop.f32.mrf.mxu1  ;;  %v2202_v24 = vmax.f32 %v2201_v62, %v1971_v17  ;;  %v2140_v11 = vmax.f32 %v2139_v28, %v1968_v21 }
 0x2fb   : > { %v1789_v20 = vmax.f32 %v1521_v14, 0.0  ;;  %v1799_v57 = vmax.f32 %v1688_v2, 0.0  ;;  %v1525_v61 = vadd.f32 %v1524_v16, %v5426_v22  ;;  %v1692_v1 = vadd.f32 %v1691_v15, %v5431_v37 }
 0x2fc   : > { %v1527_v29 = vadd.f32 %v1526_v40, %v5436_v43  ;;  %v1694_v7 = vadd.f32 %v1693_v58, %v5446_v25  ;;  %v1538_v59 = vpop.f32.mrf.mxu0  ;;  %v1705_v10 = vpop.f32.mrf.mxu1  ;;  %v2182_v27 = vmax.f32 %v2181_v48, %v1978_v54  ;;  %v1531_v26 = vadd.f32 %v1530_v52, %v5426_v22 }
 0x2fd   : > { %v1969_v33 = vsel %vm1913_vm7, %v1789_v20, 0.0  ;;  %v1698_v50 = vadd.f32 %v1697_v56, %v5431_v37  ;;  %v1979_v16 = vsel %vm1914_vm8, %v1799_v57, 0.0  ;;  %v1796_v14 = vmax.f32 %v1525_v61, 0.0 }
 0x2fe   : > { %v2161_v46 = vmax.f32 %v2160_v31, %v1969_v33  ;;  %v1806_v15 = vmax.f32 %v1692_v1, 0.0  ;;  %v1542_v2 = vpop.f32.mrf.mxu0  ;;  %v1709_v40 = vpop.f32.mrf.mxu1  ;;  %v1797_v62 = vmax.f32 %v1527_v29, 0.0  ;;  %v1807_v58 = vmax.f32 %v1694_v7, 0.0 }
 0x2ff   : > { %v1804_v28 = vmax.f32 %v1531_v26, 0.0  ;;  %v1814_v3 = vmax.f32 %v1698_v50, 0.0  ;;  %v1976_v17 = vsel %vm1914_vm8, %v1796_v14, 0.0  ;;  %v1533_v56 = vadd.f32 %v1532_v23, %v5436_v43 }
 0x300   : > { %v1986_v52 = vsel %vm1915_vm9, %v1806_v15, 0.0  ;;  %v1700_v48 = vadd.f32 %v1699_v5, %v5446_v25  ;;  %v1544_v31 = vpop.f32.mrf.mxu0  ;;  %v1711_v21 = vpop.f32.mrf.mxu1  ;;  %v2203_v54 = vmax.f32 %v2202_v24, %v1979_v16  ;;  %v2141_v20 = vmax.f32 %v2140_v11, %v1976_v17 }
 0x301   : > { %v1977_v57 = vsel %vm1914_vm8, %v1797_v62, 0.0  ;;  %v1987_v61 = vsel %vm1915_vm9, %v1807_v58, 0.0  ;;  %v2183_v1 = vmax.f32 %v2182_v27, %v1986_v52  ;;  %v1984_v7 = vsel %vm1915_vm9, %v1804_v28, 0.0 }
 0x302   : > { %v2162_v29 = vmax.f32 %v2161_v46, %v1977_v57  ;;  %v1994_v23 = vsel %vm1916_vm10, %v1814_v3, 0.0  ;;  %v1548_v33 = vpop.f32.mrf.mxu0  ;;  %v1715_v5 = vpop.f32.mrf.mxu1  ;;  %v2204_v26 = vmax.f32 %v2203_v54, %v1987_v61  ;;  %v2142_v50 = vmax.f32 %v2141_v20, %v1984_v7 }
 0x303   : > { %v1805_v24 = vmax.f32 %v1533_v56, 0.0  ;;  %v1815_v11 = vmax.f32 %v1700_v48, 0.0  ;;  %v1537_v16 = vadd.f32 %v1536_v47, %v5426_v22  ;;  %v1704_v14 = vadd.f32 %v1703_v42, %v5431_v37 }
 0x304   : > { %v1539_v15 = vadd.f32 %v1538_v59, %v5436_v43  ;;  %v1706_v27 = vadd.f32 %v1705_v10, %v5446_v25  ;;  %v1550_v46 = vpop.f32.mrf.mxu0  ;;  %v1717_v62 = vpop.f32.mrf.mxu1  ;;  %v2184_v58 = vmax.f32 %v2183_v1, %v1994_v23  ;;  %v1543_v3 = vadd.f32 %v1542_v2, %v5426_v22 }
 0x305   : > { %v1985_v28 = vsel %vm1915_vm9, %v1805_v24, 0.0  ;;  %v1710_v17 = vadd.f32 %v1709_v40, %v5431_v37  ;;  %v1995_v47 = vsel %vm1916_vm10, %v1815_v11, 0.0  ;;  %v1812_v56 = vmax.f32 %v1537_v16, 0.0 }
 0x306   : > { %v2163_v52 = vmax.f32 %v2162_v29, %v1985_v28  ;;  %v1822_v42 = vmax.f32 %v1704_v14, 0.0  ;;  %v1554_v48 = vpop.f32.mrf.mxu0  ;;  %v1721_v59 = vpop.f32.mrf.mxu1  ;;  %v1813_v54 = vmax.f32 %v1539_v15, 0.0  ;;  %v1823_v10 = vmax.f32 %v1706_v27, 0.0 }
 0x307   : > { %v1820_v20 = vmax.f32 %v1543_v3, 0.0  ;;  %v1830_v57 = vmax.f32 %v1710_v17, 0.0  ;;  %v1992_v61 = vsel %vm1916_vm10, %v1812_v56, 0.0  ;;  %v1545_v40 = vadd.f32 %v1544_v31, %v5436_v43 }
 0x308   : > { %v2002_v2 = vsel %vm1917_vm11, %v1822_v42, 0.0  ;;  %v1712_v1 = vadd.f32 %v1711_v21, %v5446_v25  ;;  %v1556_v29 = vpop.f32.mrf.mxu0  ;;  %v1723_v7 = vpop.f32.mrf.mxu1  ;;  %v2205_v23 = vmax.f32 %v2204_v26, %v1995_v47  ;;  %v2143_v24 = vmax.f32 %v2142_v50, %v1992_v61 }
 0x309   : > { %v1993_v11 = vsel %vm1916_vm10, %v1813_v54, 0.0  ;;  %v2003_v16 = vsel %vm1917_vm11, %v1823_v10, 0.0  ;;  %v2185_v14 = vmax.f32 %v2184_v58, %v2002_v2  ;;  %v2000_v27 = vsel %vm1917_vm11, %v1820_v20, 0.0 }
 0x30a   : > { %v2164_v15 = vmax.f32 %v2163_v52, %v1993_v11  ;;  %v2010_v31 = vsel %vm1918_vm12, %v1830_v57, 0.0  ;;  %v1560_v28 = vpop.f32.mrf.mxu0  ;;  %v1727_v21 = vpop.f32.mrf.mxu1  ;;  %v2206_v3 = vmax.f32 %v2205_v23, %v2003_v16  ;;  %v2144_v17 = vmax.f32 %v2143_v24, %v2000_v27 }
 0x30b   : > { %v1821_v26 = vmax.f32 %v1545_v40, 0.0  ;;  %v1831_v50 = vmax.f32 %v1712_v1, 0.0  ;;  %v1549_v47 = vadd.f32 %v1548_v33, %v5426_v22  ;;  %v1716_v56 = vadd.f32 %v1715_v5, %v5431_v37 }
 0x30c   : > { %v1551_v42 = vadd.f32 %v1550_v46, %v5436_v43  ;;  %v1718_v58 = vadd.f32 %v1717_v62, %v5446_v25  ;;  %v1562_v52 = vpop.f32.mrf.mxu0  ;;  %v1729_v54 = vpop.f32.mrf.mxu1  ;;  %v2186_v10 = vmax.f32 %v2185_v14, %v2010_v31  ;;  %v1555_v57 = vadd.f32 %v1554_v48, %v5426_v22 }
 0x30d   : > { %v2001_v20 = vsel %vm1917_vm11, %v1821_v26, 0.0  ;;  %v1722_v61 = vadd.f32 %v1721_v59, %v5431_v37  ;;  %v2011_v33 = vsel %vm1918_vm12, %v1831_v50, 0.0  ;;  %v1828_v40 = vmax.f32 %v1549_v47, 0.0 }
 0x30e   : > { %v2165_v2 = vmax.f32 %v2164_v15, %v2001_v20  ;;  %v1838_v5 = vmax.f32 %v1716_v56, 0.0  ;;  %v1566_v1 = vpop.f32.mrf.mxu0  ;;  %v1733_v46 = vpop.f32.mrf.mxu1  ;;  %v1829_v23 = vmax.f32 %v1551_v42, 0.0  ;;  %v1839_v62 = vmax.f32 %v1718_v58, 0.0 }
 0x30f   : > { %v1836_v24 = vmax.f32 %v1555_v57, 0.0  ;;  %v1846_v11 = vmax.f32 %v1722_v61, 0.0  ;;  %v2008_v16 = vsel %vm1918_vm12, %v1828_v40, 0.0  ;;  %v1557_v59 = vadd.f32 %v1556_v29, %v5436_v43 }
 0x310   : > { %v2018_v48 = vsel %vm1919_vm13, %v1838_v5, 0.0  ;;  %v1724_v14 = vadd.f32 %v1723_v7, %v5446_v25  ;;  %v1568_v15 = vpop.f32.mrf.mxu0  ;;  %v2207_v27 = vmax.f32 %v2206_v3, %v2011_v33  ;;  %v2145_v31 = vmax.f32 %v2144_v17, %v2008_v16  ;;  %v1735_v47 = vpop.f32.mrf.mxu1 }
 0x311   : > { %v2009_v26 = vsel %vm1918_vm12, %v1829_v23, 0.0  ;;  %v2019_v50 = vsel %vm1919_vm13, %v1839_v62, 0.0  ;;  %v2187_v56 = vmax.f32 %v2186_v10, %v2018_v48  ;;  %v2016_v58 = vsel %vm1919_vm13, %v1836_v24, 0.0 }
 0x312   : > { %v2166_v42 = vmax.f32 %v2165_v2, %v2009_v26  ;;  %v2026_v29 = vsel %vm6583_vm14, %v1846_v11, 0.0  ;;  %v1572_v20 = vpop.f32.mrf.mxu0  ;;  %v2208_v7 = vmax.f32 %v2207_v27, %v2019_v50  ;;  %v2146_v57 = vmax.f32 %v2145_v31, %v2016_v58  ;;  %v1739_v11 = vpop.f32.mrf.mxu1 }
 0x313   : > { %v1837_v3 = vmax.f32 %v1557_v59, 0.0  ;;  %v1847_v17 = vmax.f32 %v1724_v14, 0.0  ;;  %v1561_v61 = vadd.f32 %v1560_v28, %v5426_v22  ;;  %v1728_v33 = vadd.f32 %v1727_v21, %v5431_v37 }
 0x314   : > { %v1563_v40 = vadd.f32 %v1562_v52, %v5436_v43  ;;  %v1730_v10 = vadd.f32 %v1729_v54, %v5446_v25  ;;  %v1574_v2 = vpop.f32.mrf.mxu0  ;;  %v2188_v5 = vmax.f32 %v2187_v56, %v2026_v29  ;;  %v1567_v62 = vadd.f32 %v1566_v1, %v5426_v22 }
 0x315   : > { %v2017_v23 = vsel %vm1919_vm13, %v1837_v3, 0.0  ;;  %v1734_v24 = vadd.f32 %v1733_v46, %v5431_v37  ;;  %v2027_v28 = vsel %vm6583_vm14, %v1847_v17, 0.0  ;;  %v1844_v48 = vmax.f32 %v1561_v61, 0.0  ;;  %v1741_v3 = vpop.f32.mrf.mxu1 }
 0x316   : > { %v2167_v16 = vmax.f32 %v2166_v42, %v2017_v23  ;;  %v1854_v21 = vmax.f32 %v1728_v33, 0.0  ;;  %v1578_v59 = vpop.f32.mrf.mxu0  ;;  %v1845_v52 = vmax.f32 %v1563_v40, 0.0  ;;  %v1855_v14 = vmax.f32 %v1730_v10, 0.0 }
 0x317   : > { %v1852_v54 = vmax.f32 %v1567_v62, 0.0  ;;  %v1862_v27 = vmax.f32 %v1734_v24, 0.0  ;;  %v2024_v31 = vsel %vm6583_vm14, %v1844_v48, 0.0  ;;  %v1569_v46 = vadd.f32 %v1568_v15, %v5436_v43 }
 0x318   : > { %v2034_v1 = vsel %vm6582_vm15, %v1854_v21, 0.0  ;;  %v1736_v26 = vadd.f32 %v1735_v47, %v5446_v25  ;;  %v1580_v50 = vpop.f32.mrf.mxu0  ;;  %v2209_v56 = vmax.f32 %v2208_v7, %v2027_v28  ;;  %v2147_v42 = vmax.f32 %v2146_v57, %v2024_v31 }
 0x319   : > { %v2025_v58 = vsel %vm6583_vm14, %v1845_v52, 0.0  ;;  %v2035_v29 = vsel %vm6582_vm15, %v1855_v14, 0.0  ;;  %v2189_v17 = vmax.f32 %v2188_v5, %v2034_v1  ;;  %v2032_v33 = vsel %vm6582_vm15, %v1852_v54, 0.0 }
 0x31a   : > { %v2168_v61 = vmax.f32 %v2167_v16, %v2025_v58  ;;  %v2042_v15 = vsel %vm6581_vm0, %v1862_v27, 0.0  ;;  %v1649_v40 = vpop.f32.mrf.mxu0  ;;  %v2210_v47 = vmax.f32 %v2209_v56, %v2035_v29  ;;  %v2148_v10 = vmax.f32 %v2147_v42, %v2032_v33 }
 0x31b   : > { %v1853_v7 = vmax.f32 %v1569_v46, 0.0  ;;  %v1863_v57 = vmax.f32 %v1736_v26, 0.0  ;;  %v1573_v23 = vadd.f32 %v1572_v20, %v5426_v22  ;;  %v1740_v62 = vadd.f32 %v1739_v11, %v5431_v37 }
 0x31c   : > { %v1575_v24 = vadd.f32 %v1574_v2, %v5436_v43  ;;  %v1742_v5 = vadd.f32 %v1741_v3, %v5446_v25  ;;  %v1651_v16 = vpop.f32.mrf.mxu0  ;;  %v2190_v28 = vmax.f32 %v2189_v17, %v2042_v15  ;;  %v1579_v21 = vadd.f32 %v1578_v59, %v5426_v22  ;;  %v5855_v59 = vld [vmem:[%s6569_s2] ss:$0 sm:$0xff] }
 0x31d   : > { %v2033_v48 = vsel %vm6582_vm15, %v1853_v7, 0.0  ;;  %v1581_v52 = vadd.f32 %v1580_v50, %v5436_v43  ;;  %v2043_v54 = vsel %vm6581_vm0, %v1863_v57, 0.0  ;;  %v1860_v20 = vmax.f32 %v1573_v23, 0.0 }
 0x31e   : > { %v2169_v14 = vmax.f32 %v2168_v61, %v2033_v48  ;;  %v1870_v27 = vmax.f32 %v1740_v62, 0.0  ;;  %v4398_v11 = vpop.f32.mrf.mxu0  ;;  %v1861_v31 = vmax.f32 %v1575_v24, 0.0  ;;  %v1871_v2 = vmax.f32 %v1742_v5, 0.0 }
 0x31f   : > { %v1868_v1 = vmax.f32 %v1579_v21, 0.0  ;;  %v1869_v46 = vmax.f32 %v1581_v52, 0.0  ;;  %v2040_v26 = vsel %vm6581_vm0, %v1860_v20, 0.0  ;;  %v1650_v22 = vadd.f32 %v1649_v40, %v5431_v37 }
 0x320   : > { %v2050_v56 = vsel %vm6580_vm1, %v1870_v27, 0.0  ;;  %v1652_v43 = vadd.f32 %v1651_v16, %v5446_v25  ;;  %v2430_v50 = vpop.f32.mrf.mxu0  ;;  %v2211_v42 = vmax.f32 %v2210_v47, %v2043_v54  ;;  %v2149_v58 = vmax.f32 %v2148_v10, %v2040_v26 }
 0x321   : > { %v2041_v29 = vsel %vm6581_vm0, %v1861_v31, 0.0  ;;  %v2051_v3 = vsel %vm6580_vm1, %v1871_v2, 0.0  ;;  %v2191_v17 = vmax.f32 %v2190_v28, %v2050_v56  ;;  %v2048_v37 = vsel %vm6580_vm1, %v1868_v1, 0.0  ;;  %v2871_v1 = vld [vmem:[#allocation3 + $0x3d0] sm:$0xff]  ;;  %v2864_v56 = vld [vmem:[#allocation3 + $0x398] sm:$0xff] }
 0x322   : > { %v2170_v61 = vmax.f32 %v2169_v14, %v2041_v29  ;;  %v2049_v25 = vsel %vm6580_vm1, %v1869_v46, 0.0  ;;  %v4401_v33 = vpop.f32.mrf.mxu0  ;;  %v2150_v15 = vmax.f32 %v2149_v58, %v2048_v37  ;;  %v1750_v40 = vmax.f32 %v1650_v22, 0.0  ;;  %v2856_v37 = vld [vmem:[#allocation3 + $0x358] sm:$0xff] }
 0x323   : > { %v1751_v7 = vmax.f32 %v1652_v43, 0.0  ;;  %v2436_v47 = vadd.f32 %v4398_v11, %v5855_v59  ;;  %v2212_v10 = vmax.f32 %v2211_v42, %v2051_v3  ;;  %v2431_v23 = vadd.f32 %v5855_v59, %v2430_v50  ;;  %v2863_v3 = vld [vmem:[#allocation3 + $0x390] sm:$0xff] }
 0x324   : > { %v2171_v57 = vmax.f32 %v2170_v61, %v2049_v25  ;;  %v2446_v62 = vadd.f32 %v4401_v33, %v5855_v59  ;;  %v2440_v24 = vpop.f32.mrf.mxu0  ;;  %v2151_v5 = vrot.slane %v2150_v15, 4  ;;  %v1930_v16 = vsel %vm1908_vm2, %v1750_v40, 0.0 }
 0x325   : > { %v1931_v28 = vsel %vm1908_vm2, %v1751_v7, 0.0  ;;  %v2247_v48 = vrot.slane %v5702_v63, %v5662_v12  ;;  %v2192_v52 = vmax.f32 %v2191_v17, %v1930_v16  ;;  %v2509_v54 = vmax.f32 %v2431_v23, 0.0  ;;  %v2855_v7 = vld [vmem:[#allocation3 + $0x350] sm:$0xff] }
 0x326   : > { %v2172_v21 = vrot.slane %v2171_v57, 4  ;;  %v2213_v14 = vmax.f32 %v2212_v10, %v1931_v28  ;;  %v4404_v20 = vpop.f32.mrf.mxu0  ;;  %v2152_v27 = vmax.f32 %v2150_v15, %v2151_v5  ;;  %v2510_v11 = vmax.f32 %v2436_v47, 0.0 }
 0x327   : > { %v2512_v31 = vmax.f32 %v2446_v62, 0.0  ;;  %v2441_v2 = vadd.f32 %v5855_v59, %v2440_v24  ;;  %vm6587_vm1 = vcmask 523264   ;;  %v2193_v22 = vrot.slane %v2192_v52, 4 }
 0x328   : > { %v2173_v46 = vmax.f32 %v2171_v57, %v2172_v21  ;;  %4436 = vmatprep.mubr.msk.f32.mxu1 %vm6587_vm1, %v2509_v54  ;;  %v2450_v26 = vpop.f32.mrf.mxu0  ;;  %v2214_v43 = vrot.slane %v2213_v14, 4  ;;  %v2254_v63 = vrot.slane %v5710_v13, %v5662_v12  ;;  %v2153_v50 = vrot.slane %v2152_v27, 2  ;;  %vm6588_vm0 = vmmov %vm6587_vm1  ;;  %v2848_v57 = vld [vmem:[#allocation3 + $0x318] sm:$0xff] }
 0x329   : > { %v2511_v42 = vmax.f32 %v2441_v2, 0.0  ;;  %4437 = vmatmul.mubr.msk.f32.vlgmr.msra.gmra.mxu1 %vm6588_vm0, %v2510_v11  ;;  %v2456_v58 = vadd.f32 %v4404_v20, %v5855_v59  ;;  %v2451_v29 = vadd.f32 %v5855_v59, %v2450_v26  ;;  %v2194_v25 = vmax.f32 %v2192_v52, %v2193_v22  ;;  %vm6589_vm1 = vmmov %vm6588_vm0  ;;  %v2839_v2 = vld [vmem:[#allocation3 + $0x2d0] sm:$0xff] }
 0x32a   : > { %v2174_v17 = vrot.slane %v2173_v46, 2  ;;  %v4407_v61 = vpop.f32.mrf.mxu0  ;;  %3081 = vmatpush1.msra.mxu1 %v2871_v1  ;;  %v2215_v33 = vmax.f32 %v2213_v14, %v2214_v43  ;;  %v5881_v15 = vcombine.low %v2247_v48, %v2254_v63  ;;  %v2154_v40 = vmax.f32 %v2152_v27, %v2153_v50  ;;  %v2847_v48 = vld [vmem:[#allocation3 + $0x310] sm:$0xff]  ;;  %v2840_v14 = vld [vmem:[#allocation3 + $0x2d8] sm:$0xff]  ;;  %vm6595_vm15 = vmmov %vm6588_vm0 }
 0x32b   : > { %4439 = vmatprep.mubr.msk.f32.mxu1 %vm6589_vm1, %v2511_v42  ;;  %v2513_v13 = vmax.f32 %v2451_v29, 0.0  ;;  %3082 = vmatprep.subr.mxu1 %v2864_v56  ;;  %v2195_v23 = vrot.slane %v2194_v25, 2  ;;  %v2514_v5 = vmax.f32 %v2456_v58, 0.0  ;;  %v2466_v16 = vadd.f32 %v4407_v61, %v5855_v59  ;;  %vm6590_vm1 = vmmov %vm6588_vm0  ;;  %v2831_v50 = vld [vmem:[#allocation3 + $0x290] sm:$0xff] }
 0x32c   : > { %v2175_v47 = vmax.f32 %v2173_v46, %v2174_v17  ;;  %v2460_v10 = vpop.f32.mrf.mxu0  ;;  %3083 = vmatpush1.msra.mxu1 %v2863_v3  ;;  %v2216_v62 = vrot.slane %v2215_v33, 2  ;;  %v2155_v24 = vrot.slane %v2154_v40, 1  ;;  %v2832_v46 = vld [vmem:[#allocation3 + $0x298] sm:$0xff]  ;;  %vm6596_vm14 = vmmov %vm6588_vm0 }
 0x32d   : > { %4440 = vmatmul.mubr.msk.f32.gmra.mxu1 %vm6588_vm0, %v2512_v31  ;;  %v2461_v28 = vadd.f32 %v5855_v59, %v2460_v10  ;;  %3084 = vmatprep.subr.mxu1 %v2856_v37  ;;  %v2196_v54 = vmax.f32 %v2194_v25, %v2195_v23  ;;  %v2516_v22 = vmax.f32 %v2466_v16, 0.0  ;;  %v2824_v3 = vld [vmem:[#allocation3 + $0x258] sm:$0xff]  ;;  %v2823_v25 = vld [vmem:[#allocation3 + $0x250] sm:$0xff] }
 0x32e   : > { %v2176_v21 = vrot.slane %v2175_v47, 1  ;;  %4442 = vmatprep.mubr.msk.f32.mxu1 %vm6590_vm1, %v2513_v13  ;;  %v4410_v52 = vpop.f32.mrf.mxu0  ;;  %3085 = vmatpush1.msra.mxu1 %v2855_v7  ;;  %v2217_v20 = vmax.f32 %v2215_v33, %v2216_v62  ;;  %v2156_v27 = vmax.f32 %v2154_v40, %v2155_v24  ;;  %vm6591_vm1 = vmmov %vm6588_vm0  ;;  %v2816_v13 = vld [vmem:[#allocation3 + $0x218] sm:$0xff]  ;;  %v2815_v62 = vld [vmem:[#allocation3 + $0x210] sm:$0xff] }
 0x32f   : > { %v2515_v11 = vmax.f32 %v2461_v28, 0.0  ;;  %3086 = vmatprep.subr.mxu1 %v2848_v57  ;;  %v2197_v26 = vrot.slane %v2196_v54, 1  ;;  %v2476_v43 = vadd.f32 %v4410_v52, %v5855_v59  ;;  %v2800_v52 = vld [vmem:[#allocation3 + $0x198] sm:$0xff] }
 0x330   : > { %v2177_v1 = vmax.f32 %v2175_v47, %v2176_v21  ;;  %v2470_v31 = vpop.f32.mrf.mxu0  ;;  %3087 = vmatpush1.msra.mxu1 %v2847_v48  ;;  %v2218_v56 = vrot.slane %v2217_v20, 1  ;;  %v2224_v42 = vmax.f32 %v2156_v27, 0.0  ;;  %v2807_v48 = vld [vmem:[#allocation3 + $0x1d0] sm:$0xff] }
 0x331   : > { %4443 = vmatmul.mubr.msk.f32.gmra.mxu1 %vm6588_vm0, %v2514_v5  ;;  %v2471_v63 = vadd.f32 %v5855_v59, %v2470_v31  ;;  %3088 = vmatprep.subr.mxu1 %v2840_v14  ;;  %v2198_v17 = vmax.f32 %v2196_v54, %v2197_v26  ;;  %v2518_v10 = vmax.f32 %v2476_v43, 0.0  ;;  %v2808_v5 = vld [vmem:[#allocation3 + $0x1d8] sm:$0xff] }
 0x332   : > { %v2225_v58 = vmax.f32 %v2177_v1, 0.0  ;;  %4445 = vmatprep.mubr.msk.f32.mxu1 %vm6591_vm1, %v2515_v11  ;;  %v4413_v29 = vpop.f32.mrf.mxu0  ;;  %3089 = vmatpush1.msra.mxu1 %v2839_v2  ;;  %v2219_v61 = vmax.f32 %v2217_v20, %v2218_v56  ;;  %vm6592_vm1 = vmmov %vm6588_vm0  ;;  %v2799_v2 = vld [vmem:[#allocation3 + $0x190] sm:$0xff]  ;;  %v2792_v31 = vld [vmem:[#allocation3 + $0x158] sm:$0xff] }
 0x333   : > { %v2517_v37 = vmax.f32 %v2471_v63, 0.0  ;;  %3090 = vmatprep.subr.mxu1 %v2832_v46  ;;  %v2226_v7 = vmax.f32 %v2198_v17, 0.0  ;;  %v2486_v57 = vadd.f32 %v4413_v29, %v5855_v59  ;;  %v2791_v56 = vld [vmem:[#allocation3 + $0x150] sm:$0xff]  ;;  %v2784_v43 = vld [vmem:[#allocation3 + $0x118] sm:$0xff]  ;;  %v2277_v63 = vrot.slane %v5881_v15, %v5662_v12  ;;  %v2228_v17 = vld [vmem:[#allocation6] ss:$2 sm:$0xff] }
 0x334   : > { %v2239_v33 = vcombine.low %v2224_v42, %v2225_v58  ;;  %v2480_v40 = vpop.f32.mrf.mxu0  ;;  %3091 = vmatpush1.msra.mxu1 %v2831_v50  ;;  %v2227_v47 = vmax.f32 %v2219_v61, 0.0  ;;  %v2776_v61 = vld [vmem:[#allocation3 + $0xd8] sm:$0xff]  ;;  %v2775_v15 = vld [vmem:[#allocation3 + $0xd0] sm:$0xff] }
 0x335   : > { %4446 = vmatmul.mubr.msk.f32.gmra.mxu1 %vm6588_vm0, %v2516_v22  ;;  %v2481_v23 = vadd.f32 %v5855_v59, %v2480_v40  ;;  %3092 = vmatprep.subr.mxu1 %v2824_v3  ;;  %v2520_v20 = vmax.f32 %v2486_v57, 0.0  ;;  %v2783_v3 = vld [vmem:[#allocation3 + $0x110] sm:$0xff]  ;;  %v2760_v57 = vld [vmem:[#allocation3 + $0x58] sm:$0xff] }
 0x336   : > { %4448 = vmatprep.mubr.msk.f32.mxu1 %vm6592_vm1, %v2517_v37  ;;  %v4416_v24 = vpop.f32.mrf.mxu0  ;;  %3093 = vmatpush1.msra.mxu1 %v2823_v25  ;;  %v2240_v16 = vcombine.low %v2226_v7, %v2227_v47  ;;  %v2261_v14 = vrot.slane %v2239_v33, %v5662_v12  ;;  %vm6593_vm1 = vmmov %vm6588_vm0  ;;  %v2765_v7 = vld [vmem:[#allocation3 + $0x80] sm:$0xff]  ;;  %v2767_v47 = vld [vmem:[#allocation3 + $0x90] sm:$0xff] }
 0x337   : > { %v2519_v28 = vmax.f32 %v2481_v23, 0.0  ;;  %3094 = vmatprep.subr.mxu1 %v2816_v13  ;;  %v2496_v27 = vadd.f32 %v4416_v24, %v5855_v59  ;;  %v2768_v13 = vld [vmem:[#allocation3 + $0x98] sm:$0xff]  ;;  %v2757_v23 = vld [vmem:[#allocation3 + $0x40] sm:$0xff]  ;;  %v2750_v24 = vld [vmem:[#allocation3 + $0x8] sm:$0xff] }
 0x338   : > { %v2490_v21 = vpop.f32.mrf.mxu0  ;;  %3095 = vmatpush1.msra.mxu1 %v2815_v62  ;;  %v2268_v54 = vrot.slane %v2240_v16, %v5662_v12  ;;  %v2759_v62 = vld [vmem:[#allocation3 + $0x50] sm:$0xff]  ;;  %v2749_v16 = vld [vmem:[#allocation3] sm:$0xff] }
 0x339   : > { %4449 = vmatmul.mubr.msk.f32.gmra.mxu1 %vm6588_vm0, %v2518_v10  ;;  %v2491_v11 = vadd.f32 %v5855_v59, %v2490_v21  ;;  %3096 = vmatprep.subr.mxu1 %v2808_v5  ;;  %v2522_v42 = vmax.f32 %v2496_v27, 0.0  ;;  %v2758_v10 = vld [vmem:[#allocation3 + $0x48] sm:$0xff]  ;;  %v2752_v5 = vld [vmem:[#allocation3 + $0x18] sm:$0xff] }
 0x33a   : > { %4451 = vmatprep.mubr.msk.f32.mxu1 %vm6593_vm1, %v2519_v28  ;;  %v4419_v1 = vpop.f32.mrf.mxu0  ;;  %3097 = vmatpush1.msra.mxu1 %v2807_v48  ;;  %v2270_v46 = vcombine.low %v2261_v14, %v2268_v54  ;;  %vm6594_vm1 = vmmov %vm6588_vm0  ;;  %v2751_v28 = vld [vmem:[#allocation3 + $0x10] sm:$0xff]  ;;  %v2874_v48 = vld [vmem:[#allocation3 + $0x3e8] sm:$0xff] }
 0x33b   : > { %v2521_v26 = vmax.f32 %v2491_v11, 0.0  ;;  %3098 = vmatprep.subr.mxu1 %v2800_v52  ;;  %v2506_v58 = vadd.f32 %v4419_v1, %v5855_v59  ;;  %v2876_v21 = vld [vmem:[#allocation3 + $0x3f8] sm:$0xff]  ;;  %v5916_v14 = vld [vmem:[%s6571_s4] ss:$0 sm:$0xff] }
 0x33c   : > { %v2500_v22 = vpop.f32.mrf.mxu0  ;;  %3099 = vmatpush1.msra.mxu1 %v2799_v2  ;;  %v2284_v50 = vrot.slane %v2270_v46, %v5662_v12  ;;  %v2873_v1 = vld [vmem:[#allocation3 + $0x3e0] sm:$0xff] }
 0x33d   : > { %4452 = vmatmul.mubr.msk.f32.gmra.mxu1 %vm6588_vm0, %v2520_v20  ;;  %v2501_v29 = vadd.f32 %v5855_v59, %v2500_v22  ;;  %3100 = vmatprep.subr.mxu1 %v2792_v31  ;;  %v2524_v40 = vmax.f32 %v2506_v58, 0.0  ;;  %v2766_v59 = vld [vmem:[#allocation3 + $0x88] sm:$0xff]  ;;  %v2875_v31 = vld [vmem:[#allocation3 + $0x3f0] sm:$0xff] }
 0x33e   : > { %4454 = vmatprep.mubr.msk.f32.mxu1 %vm6594_vm1, %v2521_v26  ;;  %3101 = vmatpush1.msra.mxu1 %v2791_v56  ;;  %v2285_v37 = vcombine.low %v2277_v63, %v2284_v50  ;;  %v2866_v26 = vld [vmem:[#allocation3 + $0x3a8] sm:$0xff]  ;;  %v2868_v56 = vld [vmem:[#allocation3 + $0x3b8] sm:$0xff]  ;;  %v2865_v63 = vld [vmem:[#allocation3 + $0x3a0] sm:$0xff] }
 0x33f   : > { %v2523_v25 = vmax.f32 %v2501_v29, 0.0  ;;  %3102 = vmatprep.subr.mxu1 %v2784_v43  ;;  %2945 = vmatprep.subr.mxu0 %v2766_v59  ;;  %v2867_v50 = vld [vmem:[#allocation3 + $0x3b0] sm:$0xff]  ;;  %v2858_v58 = vld [vmem:[#allocation3 + $0x368] sm:$0xff]  ;;  %v2860_v29 = vld [vmem:[#allocation3 + $0x378] sm:$0xff] }
 0x340   : > { %3103 = vmatpush1.msra.mxu1 %v2783_v3  ;;  %v2287_v33 = vmax.f32 %v2228_v17, %v2285_v37  ;;  %2946 = vmatpush1.msra.mxu0 %v2765_v7  ;;  %v2859_v37 = vld [vmem:[#allocation3 + $0x370] sm:$0xff] }
 0x341   : > { %4455 = vmatmul.mubr.msk.f32.gmra.mxu1 %vm6595_vm15, %v2522_v42  ;;  %3104 = vmatprep.subr.mxu1 %v2776_v61  ;;  %v2857_v61 = vld [vmem:[#allocation3 + $0x360] sm:$0xff]  ;;  %v2851_v7 = vld [vmem:[#allocation3 + $0x330] sm:$0xff] }
 0x342   : > { %4457 = vmatprep.mubr.msk.f32.mxu1 %vm6588_vm0, %v2523_v25  ;;  %3105 = vmatpush1.msra.mxu1 %v2775_v15  ;;  %2288 = vst [vmem:[#allocation6] ss:$2 sm:$0xff] %v2287_v33  ;;  %v2850_v15 = vld [vmem:[#allocation3 + $0x328] sm:$0xff]  ;;  %v2852_v33 = vld [vmem:[#allocation3 + $0x338] sm:$0xff] }
 0x343   : > { %3106 = vmatprep.subr.mxu1 %v2768_v13  ;;  %2947 = vmatprep.subr.mxu0 %v2758_v10  ;;  %v2849_v13 = vld [vmem:[#allocation3 + $0x320] sm:$0xff]  ;;  %v2842_v10 = vld [vmem:[#allocation3 + $0x2e8] sm:$0xff] }
 0x344   : > { %3107 = vmatpush1.msra.mxu1 %v2767_v47  ;;  %2948 = vmatpush1.msra.mxu0 %v2757_v23 }
 0x345   : > { %4458 = vmatmul.mubr.msk.f32.gmra.mxu1 %vm6596_vm14, %v2524_v40  ;;  %3108 = vmatprep.subr.mxu1 %v2760_v57  ;;  %v2844_v57 = vld [vmem:[#allocation3 + $0x2f8] sm:$0xff]  ;;  %vm6601_vm14 = vcmp.lt.s32.totalorder %v5407_v9, 250 }
 0x346   : > { %3144 = vmatprep.mubr.f32.mxu1 %v4657_v44  ;;  %3109 = vmatpush1.msra.mxu1 %v2759_v62  ;;  %vm6602_vm15 = vmmov %vm6601_vm14 }
 0x347   : > { %2949 = vmatprep.subr.mxu0 %v2750_v24  ;;  %3110 = vmatprep.subr.mxu1 %v2752_v5  ;;  %v2841_v24 = vld [vmem:[#allocation3 + $0x2e0] sm:$0xff]  ;;  %v2843_v5 = vld [vmem:[#allocation3 + $0x2f0] sm:$0xff]  ;;  %vm6603_vm1 = vmmov %vm6601_vm14 }
 0x348   : > { %2950 = vmatpush1.msra.mxu0 %v2749_v16  ;;  %3111 = vmatpush1.msra.mxu1 %v2751_v28  ;;  %v2834_v28 = vld [vmem:[#allocation3 + $0x2a8] sm:$0xff]  ;;  %vm6604_vm0 = vmmov %vm6603_vm1 }
 0x349   : > { %3241 = vmatprep.subr.mxu0 %v2874_v48  ;;  %3402 = vmatprep.subr.mxu1 %v2876_v21  ;;  %v2836_v48 = vld [vmem:[#allocation3 + $0x2b8] sm:$0xff] }
 0x3e9   : > { %v4438_v52 = vpop.f32.mrf.mxu1 }
 0x3ea   : > { %v2660_v11 = vadd.f32 %v4438_v52, %v5916_v14 }
 0x3eb   : > { %v2654_v54 = vpop.f32.mrf.mxu1 }
 0x3ec   : > { %v2655_v20 = vadd.f32 %v5916_v14, %v2654_v54  ;;  %v5924_v22 = vmax.f32 %v2660_v11, 0.0  ;;  %v2833_v54 = vld [vmem:[#allocation3 + $0x2a0] sm:$0xff]  ;;  %v2826_v11 = vld [vmem:[#allocation3 + $0x268] sm:$0xff] }
 0x3ed   : > { %v4441_v27 = vpop.f32.mrf.mxu1 }
 0x3ee   : > { %v5920_v2 = vmax.f32 %v2655_v20, 0.0  ;;  %v2670_v3 = vadd.f32 %v4441_v27, %v5916_v14  ;;  %v2835_v20 = vld [vmem:[#allocation3 + $0x2b0] sm:$0xff] }
 0x3ef   : > { %v2664_v46 = vpop.f32.mrf.mxu1 }
 0x3f0   : > { %2984 = vmatmul.mubr.f32.vlgmr.msra.gmra.mxu0 %v5920_v2  ;;  %3145 = vmatmul.mubr.f32.vlgmr.msra.gmra.mxu1 %v5920_v2  ;;  %v2665_v43 = vadd.f32 %v5916_v14, %v2664_v46  ;;  %v5938_v40 = vmax.f32 %v2670_v3, 0.0  ;;  %v2819_v3 = vld [vmem:[#allocation3 + $0x230] sm:$0xff] }
 0x3f1   : > { %3242 = vmatpush1.msra.mxu0 %v2873_v1  ;;  %3403 = vmatpush1.msra.mxu1 %v2875_v31  ;;  %v4444_v42 = vpop.f32.mrf.mxu1  ;;  %v2828_v1 = vld [vmem:[#allocation3 + $0x278] sm:$0xff] }
 0x3f2   : > { %2989 = vmatprep.mubr.f32.mxu0 %v4657_v44  ;;  %3150 = vmatprep.mubr.f32.mxu1 %v4657_v44  ;;  %v5932_v17 = vmax.f32 %v2665_v43, 0.0  ;;  %v2680_v23 = vadd.f32 %v4444_v42, %v5916_v14 }
 0x3f3   : > { %3243 = vmatprep.subr.mxu0 %v2866_v26  ;;  %3404 = vmatprep.subr.mxu1 %v2868_v56  ;;  %v2674_v25 = vpop.f32.mrf.mxu1  ;;  %v2825_v26 = vld [vmem:[#allocation3 + $0x260] sm:$0xff]  ;;  %v2827_v56 = vld [vmem:[#allocation3 + $0x270] sm:$0xff] }
 0x3f4   : > { %2990 = vmatmul.mubr.f32.gmra.mxu0 %v5924_v22  ;;  %3151 = vmatmul.mubr.f32.gmra.mxu1 %v5924_v22  ;;  %v2675_v59 = vadd.f32 %v5916_v14, %v2674_v25  ;;  %v5952_v21 = vmax.f32 %v2680_v23, 0.0  ;;  %v2812_v25 = vld [vmem:[#allocation3 + $0x1f8] sm:$0xff] }
 0x3f5   : > { %3244 = vmatpush1.msra.mxu0 %v2865_v63  ;;  %3405 = vmatpush1.msra.mxu1 %v2867_v50  ;;  %v4447_v47 = vpop.f32.mrf.mxu1  ;;  %v2818_v63 = vld [vmem:[#allocation3 + $0x228] sm:$0xff]  ;;  %v2820_v50 = vld [vmem:[#allocation3 + $0x238] sm:$0xff] }
 0x3f6   : > { %2995 = vmatprep.mubr.f32.mxu0 %v4657_v44  ;;  %3156 = vmatprep.mubr.f32.mxu1 %v4657_v44  ;;  %v5946_v62 = vmax.f32 %v2675_v59, 0.0  ;;  %v2690_v31 = vadd.f32 %v4447_v47, %v5916_v14  ;;  %v2809_v59 = vld [vmem:[#allocation3 + $0x1e0] sm:$0xff]  ;;  %v2802_v47 = vld [vmem:[#allocation3 + $0x1a8] sm:$0xff] }
 0x3f7   : > { %3245 = vmatprep.subr.mxu0 %v2858_v58  ;;  %3406 = vmatprep.subr.mxu1 %v2860_v29  ;;  %v2684_v16 = vpop.f32.mrf.mxu1  ;;  %v2817_v29 = vld [vmem:[#allocation3 + $0x220] sm:$0xff] }
 0x3f8   : > { %2996 = vmatmul.mubr.f32.gmra.mxu0 %v5932_v17  ;;  %3157 = vmatmul.mubr.f32.gmra.mxu1 %v5932_v17  ;;  %v2685_v52 = vadd.f32 %v5916_v14, %v2684_v16  ;;  %v5966_v42 = vmax.f32 %v2690_v31, 0.0  ;;  %v2788_v31 = vld [vmem:[#allocation3 + $0x138] sm:$0xff] }
 0x3f9   : > { %3246 = vmatpush1.msra.mxu0 %v2857_v61  ;;  %3407 = vmatpush1.msra.mxu1 %v2859_v37  ;;  %v4450_v27 = vpop.f32.mrf.mxu1  ;;  %v2810_v37 = vld [vmem:[#allocation3 + $0x1e8] sm:$0xff] }
 0x3fa   : > { %3001 = vmatprep.mubr.f32.mxu0 %v4657_v44  ;;  %3162 = vmatprep.mubr.f32.mxu1 %v4657_v44  ;;  %v5960_v46 = vmax.f32 %v2685_v52, 0.0 }
 0x3fb   : > { %3247 = vmatprep.subr.mxu0 %v2850_v15  ;;  %3408 = vmatprep.subr.mxu1 %v2852_v33  ;;  %v2694_v43 = vpop.f32.mrf.mxu1  ;;  %v2700_v15 = vadd.f32 %v4450_v27, %v5916_v14  ;;  %v2795_v27 = vld [vmem:[#allocation3 + $0x170] sm:$0xff] }
 0x3fc   : > { %3002 = vmatmul.mubr.f32.gmra.mxu0 %v5938_v40  ;;  %3163 = vmatmul.mubr.f32.gmra.mxu1 %v5938_v40  ;;  %v2695_v58 = vadd.f32 %v5916_v14, %v2694_v43  ;;  %v2785_v43 = vld [vmem:[#allocation3 + $0x120] sm:$0xff] }
 0x3fd   : > { %3248 = vmatpush1.msra.mxu0 %v2849_v13  ;;  %3409 = vmatpush1.msra.mxu1 %v2851_v7  ;;  %v4453_v61 = vpop.f32.mrf.mxu1  ;;  %v2811_v13 = vld [vmem:[#allocation3 + $0x1f0] sm:$0xff] }
 0x3fe   : > { %3007 = vmatprep.mubr.f32.mxu0 %v4657_v44  ;;  %3168 = vmatprep.mubr.f32.mxu1 %v4657_v44  ;;  %v5974_v33 = vmax.f32 %v2695_v58, 0.0  ;;  %v2710_v52 = vadd.f32 %v4453_v61, %v5916_v14  ;;  %v2778_v58 = vld [vmem:[#allocation3 + $0xe8] sm:$0xff] }
 0x3ff   : > { %3249 = vmatprep.subr.mxu0 %v2842_v10  ;;  %3410 = vmatprep.subr.mxu1 %v2844_v57  ;;  %v2704_v7 = vpop.f32.mrf.mxu1  ;;  %v2804_v10 = vld [vmem:[#allocation3 + $0x1b8] sm:$0xff]  ;;  %v5980_v57 = vmax.f32 %v2700_v15, 0.0 }
 0x400   : > { %3008 = vmatmul.mubr.f32.gmra.mxu0 %v5946_v62  ;;  %3169 = vmatmul.mubr.f32.gmra.mxu1 %v5946_v62  ;;  %v2705_v23 = vadd.f32 %v5916_v14, %v2704_v7 }
 0x401   : > { %3250 = vmatpush1.msra.mxu0 %v2841_v24  ;;  %3411 = vmatpush1.msra.mxu1 %v2843_v5  ;;  %v2801_v24 = vld [vmem:[#allocation3 + $0x1a0] sm:$0xff]  ;;  %v2803_v5 = vld [vmem:[#allocation3 + $0x1b0] sm:$0xff]  ;;  %v4456_v16 = vpop.f32.mrf.mxu1 }
 0x402   : > { %3013 = vmatprep.mubr.f32.mxu0 %v4657_v44  ;;  %3174 = vmatprep.mubr.f32.mxu1 %v4657_v44 }
 0x403   : > { %3251 = vmatprep.subr.mxu0 %v2834_v28  ;;  %3412 = vmatprep.subr.mxu1 %v2836_v48  ;;  %v2794_v28 = vld [vmem:[#allocation3 + $0x168] sm:$0xff]  ;;  %v2796_v48 = vld [vmem:[#allocation3 + $0x178] sm:$0xff] }
 0x404   : > { %3014 = vmatmul.mubr.f32.gmra.mxu0 %v5952_v21  ;;  %3175 = vmatmul.mubr.f32.gmra.mxu1 %v5952_v21 }
 0x405   : > { %3252 = vmatpush1.msra.mxu0 %v2833_v54  ;;  %3413 = vmatpush1.msra.mxu1 %v2835_v20  ;;  %v5988_v54 = vmax.f32 %v2705_v23, 0.0  ;;  %v2793_v20 = vld [vmem:[#allocation3 + $0x160] sm:$0xff]  ;;  %v2771_v23 = vld [vmem:[#allocation3 + $0xb0] sm:$0xff] }
 0x406   : > { %3019 = vmatprep.mubr.f32.mxu0 %v4657_v44  ;;  %3180 = vmatprep.mubr.f32.mxu1 %v4657_v44 }
 0x407   : > { %3253 = vmatprep.subr.mxu0 %v2826_v11  ;;  %3414 = vmatprep.subr.mxu1 %v2828_v1  ;;  %v2714_v11 = vpop.f32.mrf.mxu1  ;;  %v2786_v1 = vld [vmem:[#allocation3 + $0x128] sm:$0xff] }
 0x408   : > { %3020 = vmatmul.mubr.f32.gmra.mxu0 %v5960_v46  ;;  %3181 = vmatmul.mubr.f32.gmra.mxu1 %v5960_v46 }
 0x409   : > { %3254 = vmatpush1.msra.mxu0 %v2825_v26  ;;  %3415 = vmatpush1.msra.mxu1 %v2827_v56  ;;  %v5994_v26 = vmax.f32 %v2710_v52, 0.0  ;;  %v2715_v56 = vadd.f32 %v5916_v14, %v2714_v11  ;;  %v2763_v52 = vld [vmem:[#allocation3 + $0x70] sm:$0xff] }
 0x40a   : > { %3025 = vmatprep.mubr.f32.mxu0 %v4657_v44  ;;  %3186 = vmatprep.mubr.f32.mxu1 %v4657_v44 }
 0x40b   : > { %3255 = vmatprep.subr.mxu0 %v2818_v63  ;;  %3416 = vmatprep.subr.mxu1 %v2820_v50  ;;  %v2787_v63 = vld [vmem:[#allocation3 + $0x130] sm:$0xff]  ;;  %v4459_v50 = vpop.f32.mrf.mxu1  ;;  %v6002_v61 = vmax.f32 %v2715_v56, 0.0 }
 0x40c   : > { %3026 = vmatmul.mubr.f32.gmra.mxu0 %v5966_v42  ;;  %3187 = vmatmul.mubr.f32.gmra.mxu1 %v5966_v42 }
 0x40d   : > { %3256 = vmatpush1.msra.mxu0 %v2817_v29  ;;  %3417 = vmatpush1.msra.mxu1 %v2819_v3  ;;  %v2780_v29 = vld [vmem:[#allocation3 + $0xf8] sm:$0xff]  ;;  %v2720_v3 = vadd.f32 %v4456_v16, %v5916_v14  ;;  %v2724_v15 = vpop.f32.mrf.mxu1  ;;  %v2730_v16 = vadd.f32 %v4459_v50, %v5916_v14 }
 0x40e   : > { %3031 = vmatprep.mubr.f32.mxu0 %v4657_v44  ;;  %3192 = vmatprep.mubr.f32.mxu1 %v4657_v44 }
 0x40f   : > { %3257 = vmatprep.subr.mxu0 %v2810_v37  ;;  %3418 = vmatprep.subr.mxu1 %v2812_v25  ;;  %v2777_v37 = vld [vmem:[#allocation3 + $0xe0] sm:$0xff]  ;;  %v2779_v25 = vld [vmem:[#allocation3 + $0xf0] sm:$0xff]  ;;  %v6008_v7 = vmax.f32 %v2720_v3, 0.0  ;;  %v6022_v11 = vmax.f32 %v2730_v16, 0.0 }
 0x410   : > { %3032 = vmatmul.mubr.f32.gmra.mxu0 %v5974_v33  ;;  %3193 = vmatmul.mubr.f32.gmra.mxu1 %v5974_v33 }
 0x411   : > { %3258 = vmatpush1.msra.mxu0 %v2809_v59  ;;  %3419 = vmatpush1.msra.mxu1 %v2811_v13  ;;  %v2770_v59 = vld [vmem:[#allocation3 + $0xa8] sm:$0xff]  ;;  %v2772_v13 = vld [vmem:[#allocation3 + $0xb8] sm:$0xff] }
 0x412   : > { %3037 = vmatprep.mubr.f32.mxu0 %v4657_v44  ;;  %3198 = vmatprep.mubr.f32.mxu1 %v4657_v44 }
 0x413   : > { %3259 = vmatprep.subr.mxu0 %v2802_v47  ;;  %3420 = vmatprep.subr.mxu1 %v2804_v10  ;;  %v2725_v47 = vadd.f32 %v5916_v14, %v2724_v15  ;;  %v2769_v10 = vld [vmem:[#allocation3 + $0xa0] sm:$0xff] }
 0x414   : > { %3038 = vmatmul.mubr.f32.gmra.mxu0 %v5980_v57  ;;  %3199 = vmatmul.mubr.f32.gmra.mxu1 %v5980_v57  ;;  %v2753_v14 = vld [vmem:[#allocation3 + $0x20] sm:$0xff] }
 0x415   : > { %3260 = vmatpush1.msra.mxu0 %v2801_v24  ;;  %3421 = vmatpush1.msra.mxu1 %v2803_v5  ;;  %v2762_v24 = vld [vmem:[#allocation3 + $0x68] sm:$0xff]  ;;  %v2764_v5 = vld [vmem:[#allocation3 + $0x78] sm:$0xff] }
 0x416   : > { %3043 = vmatprep.mubr.f32.mxu0 %v4657_v44  ;;  %3204 = vmatprep.mubr.f32.mxu1 %v4657_v44 }
 0x417   : > { %3261 = vmatprep.subr.mxu0 %v2794_v28  ;;  %3422 = vmatprep.subr.mxu1 %v2796_v48  ;;  %v6016_v28 = vmax.f32 %v2725_v47, 0.0  ;;  %v2761_v48 = vld [vmem:[#allocation3 + $0x60] sm:$0xff] }
 0x418   : > { %3044 = vmatmul.mubr.f32.gmra.mxu0 %v5988_v54  ;;  %3205 = vmatmul.mubr.f32.gmra.mxu1 %v5988_v54 }
 0x419   : > { %3262 = vmatpush1.msra.mxu0 %v2793_v20  ;;  %3423 = vmatpush1.msra.mxu1 %v2795_v27  ;;  %v2754_v20 = vld [vmem:[#allocation3 + $0x28] sm:$0xff]  ;;  %v2756_v27 = vld [vmem:[#allocation3 + $0x38] sm:$0xff] }
 0x41a   : > { %3049 = vmatprep.mubr.f32.mxu0 %v4657_v44  ;;  %3210 = vmatprep.mubr.f32.mxu1 %v4657_v44 }
 0x41b   : > { %3263 = vmatprep.subr.mxu0 %v2786_v1  ;;  %3424 = vmatprep.subr.mxu1 %v2788_v31  ;;  %v2755_v1 = vld [vmem:[#allocation3 + $0x30] sm:$0xff] }
 0x41c   : > { %3050 = vmatmul.mubr.f32.gmra.mxu0 %v5994_v26  ;;  %3211 = vmatmul.mubr.f32.gmra.mxu1 %v5994_v26 }
 0x41d   : > { %3264 = vmatpush1.msra.mxu0 %v2785_v43  ;;  %3425 = vmatpush1.msra.mxu1 %v2787_v63 }
 0x41e   : > { %3055 = vmatprep.mubr.f32.mxu0 %v4657_v44  ;;  %3216 = vmatprep.mubr.f32.mxu1 %v4657_v44 }
 0x41f   : > { %3265 = vmatprep.subr.mxu0 %v2778_v58  ;;  %3426 = vmatprep.subr.mxu1 %v2780_v29 }
 0x420   : > { %3056 = vmatmul.mubr.f32.gmra.mxu0 %v6002_v61  ;;  %3217 = vmatmul.mubr.f32.gmra.mxu1 %v6002_v61 }
 0x421   : > { %3266 = vmatpush1.msra.mxu0 %v2777_v37  ;;  %3427 = vmatpush1.msra.mxu1 %v2779_v25  ;;  %v6598_v25 = vsub.s32 6, %v5303_v41 }
 0x422   : > { %3061 = vmatprep.mubr.f32.mxu0 %v4657_v44  ;;  %3222 = vmatprep.mubr.f32.mxu1 %v4657_v44 }
 0x423   : > { %3267 = vmatprep.subr.mxu0 %v2770_v59  ;;  %3428 = vmatprep.subr.mxu1 %v2772_v13 }
 0x424   : > { %3062 = vmatmul.mubr.f32.gmra.mxu0 %v6008_v7  ;;  %3223 = vmatmul.mubr.f32.gmra.mxu1 %v6008_v7 }
 0x425   : > { %3268 = vmatpush1.msra.mxu0 %v2769_v10  ;;  %3429 = vmatpush1.msra.mxu1 %v2771_v23 }
 0x426   : > { %3067 = vmatprep.mubr.f32.mxu0 %v4657_v44  ;;  %3228 = vmatprep.mubr.f32.mxu1 %v4657_v44 }
 0x427   : > { %3269 = vmatprep.subr.mxu0 %v2762_v24  ;;  %3430 = vmatprep.subr.mxu1 %v2764_v5 }
 0x428   : > { %3068 = vmatmul.mubr.f32.gmra.mxu0 %v6016_v28  ;;  %3229 = vmatmul.mubr.f32.gmra.mxu1 %v6016_v28 }
 0x429   : > { %3270 = vmatpush1.msra.mxu0 %v2761_v48  ;;  %3431 = vmatpush1.msra.mxu1 %v2763_v52 }
 0x42a   : > { %3073 = vmatprep.mubr.f32.mxu0 %v4657_v44  ;;  %3234 = vmatprep.mubr.f32.mxu1 %v4657_v44 }
 0x42b   : > { %3271 = vmatprep.subr.mxu0 %v2754_v20  ;;  %3432 = vmatprep.subr.mxu1 %v2756_v27 }
 0x42c   : > { %3074 = vmatmul.mubr.f32.gmra.mxu0 %v6022_v11  ;;  %3235 = vmatmul.mubr.f32.gmra.mxu1 %v6022_v11 }
 0x42d   : > { %3272 = vmatpush1.msra.mxu0 %v2753_v14  ;;  %3433 = vmatpush1.msra.mxu1 %v2755_v1 }
 0x42e   : > { %3305 = vmatprep.mubr.f32.mxu0 %v4657_v44  ;;  %3466 = vmatprep.mubr.f32.mxu1 %v4657_v44 }
 0x430   : > { %3306 = vmatmul.mubr.f32.vlgmr.msra.gmra.mxu0 %v5920_v2  ;;  %3467 = vmatmul.mubr.f32.vlgmr.msra.gmra.mxu1 %v5920_v2  ;;  %v2877_v2 = vld [vmem:[%s6573_s6] sm:$0xff] }
 0x431   : > { %3311 = vmatprep.mubr.f32.mxu0 %v4657_v44  ;;  %3472 = vmatprep.mubr.f32.mxu1 %v4657_v44  ;;  %v6125_v15 = vrot.slane %v2877_v2, %v6598_v25 }
 0x434   : > { %3312 = vmatmul.mubr.f32.gmra.mxu0 %v5924_v22  ;;  %3473 = vmatmul.mubr.f32.gmra.mxu1 %v5924_v22  ;;  %v6097_v22 = vrot.slane %v2877_v2, %v1062_v51 }
 0x435   : > { %3317 = vmatprep.mubr.f32.mxu0 %v4657_v44  ;;  %3478 = vmatprep.mubr.f32.mxu1 %v4657_v44 }
 0x438   : > { %3318 = vmatmul.mubr.f32.gmra.mxu0 %v5932_v17  ;;  %3479 = vmatmul.mubr.f32.gmra.mxu1 %v5932_v17  ;;  %v6101_v17 = vrot.slane %v2877_v2, %v1070_v55 }
 0x439   : > { %3323 = vmatprep.mubr.f32.mxu0 %v4657_v44  ;;  %3484 = vmatprep.mubr.f32.mxu1 %v4657_v44 }
 0x43c   : > { %3324 = vmatmul.mubr.f32.gmra.mxu0 %v5938_v40  ;;  %3485 = vmatmul.mubr.f32.gmra.mxu1 %v5938_v40  ;;  %v6105_v40 = vrot.slane %v2877_v2, %v1066_v0 }
 0x43d   : > { %3329 = vmatprep.mubr.f32.mxu0 %v4657_v44  ;;  %3490 = vmatprep.mubr.f32.mxu1 %v4657_v44 }
 0x440   : > { %3330 = vmatmul.mubr.f32.gmra.mxu0 %v5946_v62  ;;  %3491 = vmatmul.mubr.f32.gmra.mxu1 %v5946_v62 }
 0x441   : > { %3335 = vmatprep.mubr.f32.mxu0 %v4657_v44  ;;  %3496 = vmatprep.mubr.f32.mxu1 %v4657_v44 }
 0x444   : > { %3336 = vmatmul.mubr.f32.gmra.mxu0 %v5952_v21  ;;  %3497 = vmatmul.mubr.f32.gmra.mxu1 %v5952_v21 }
 0x445   : > { %3341 = vmatprep.mubr.f32.mxu0 %v4657_v44  ;;  %3502 = vmatprep.mubr.f32.mxu1 %v4657_v44 }
 0x448   : > { %3342 = vmatmul.mubr.f32.gmra.mxu0 %v5960_v46  ;;  %3503 = vmatmul.mubr.f32.gmra.mxu1 %v5960_v46 }
 0x449   : > { %3347 = vmatprep.mubr.f32.mxu0 %v4657_v44  ;;  %3508 = vmatprep.mubr.f32.mxu1 %v4657_v44 }
 0x44c   : > { %3348 = vmatmul.mubr.f32.gmra.mxu0 %v5966_v42  ;;  %3509 = vmatmul.mubr.f32.gmra.mxu1 %v5966_v42 }
 0x44d   : > { %3353 = vmatprep.mubr.f32.mxu0 %v4657_v44  ;;  %3514 = vmatprep.mubr.f32.mxu1 %v4657_v44 }
 0x450   : > { %3354 = vmatmul.mubr.f32.gmra.mxu0 %v5974_v33  ;;  %3515 = vmatmul.mubr.f32.gmra.mxu1 %v5974_v33 }
 0x451   : > { %3359 = vmatprep.mubr.f32.mxu0 %v4657_v44  ;;  %3520 = vmatprep.mubr.f32.mxu1 %v4657_v44 }
 0x454   : > { %3360 = vmatmul.mubr.f32.gmra.mxu0 %v5980_v57  ;;  %3521 = vmatmul.mubr.f32.gmra.mxu1 %v5980_v57 }
 0x455   : > { %3365 = vmatprep.mubr.f32.mxu0 %v4657_v44  ;;  %3526 = vmatprep.mubr.f32.mxu1 %v4657_v44 }
 0x458   : > { %3366 = vmatmul.mubr.f32.gmra.mxu0 %v5988_v54  ;;  %3527 = vmatmul.mubr.f32.gmra.mxu1 %v5988_v54 }
 0x459   : > { %3371 = vmatprep.mubr.f32.mxu0 %v4657_v44  ;;  %3532 = vmatprep.mubr.f32.mxu1 %v4657_v44 }
 0x45c   : > { %3372 = vmatmul.mubr.f32.gmra.mxu0 %v5994_v26  ;;  %3533 = vmatmul.mubr.f32.gmra.mxu1 %v5994_v26 }
 0x45d   : > { %3377 = vmatprep.mubr.f32.mxu0 %v4657_v44  ;;  %3538 = vmatprep.mubr.f32.mxu1 %v4657_v44 }
 0x460   : > { %3378 = vmatmul.mubr.f32.gmra.mxu0 %v6002_v61  ;;  %3539 = vmatmul.mubr.f32.gmra.mxu1 %v6002_v61  ;;  %v6597_v61 = vsub.s32 4, %v5303_v41 }
 0x461   : > { %3383 = vmatprep.mubr.f32.mxu0 %v4657_v44  ;;  %3544 = vmatprep.mubr.f32.mxu1 %v4657_v44 }
 0x462   : > { %v6121_v37 = vrot.slane %v2877_v2, %v6597_v61 }
 0x464   : > { %3384 = vmatmul.mubr.f32.gmra.mxu0 %v6008_v7  ;;  %3545 = vmatmul.mubr.f32.gmra.mxu1 %v6008_v7 }
 0x465   : > { %3389 = vmatprep.mubr.f32.mxu0 %v4657_v44  ;;  %3550 = vmatprep.mubr.f32.mxu1 %v4657_v44 }
 0x468   : > { %3390 = vmatmul.mubr.f32.gmra.mxu0 %v6016_v28  ;;  %3551 = vmatmul.mubr.f32.gmra.mxu1 %v6016_v28 }
 0x469   : > { %3395 = vmatprep.mubr.f32.mxu0 %v4657_v44  ;;  %3556 = vmatprep.mubr.f32.mxu1 %v4657_v44  ;;  %v6109_v44 = vrot.slane %v2877_v2, %v1074_v4 }
 0x46c   : > { %3396 = vmatmul.mubr.f32.gmra.mxu0 %v6022_v11  ;;  %3557 = vmatmul.mubr.f32.gmra.mxu1 %v6022_v11 }
 0x4b0   : > { %v2985_v62 = vpop.f32.mrf.mxu0  ;;  %v3146_v21 = vpop.f32.mrf.mxu1 }
 0x4b1   : > { %v2986_v46 = vadd.f32 %v2985_v62, %v6097_v22  ;;  %v3147_v42 = vadd.f32 %v3146_v21, %v6101_v17 }
 0x4b2   : > { %v2987_v51 = vpop.f32.mrf.mxu0  ;;  %v3148_v33 = vpop.f32.mrf.mxu1 }
 0x4b3   : > { %v2988_v57 = vadd.f32 %v2987_v51, %v6105_v40  ;;  %v3149_v55 = vadd.f32 %v3148_v33, %v6109_v44  ;;  %v3563_v54 = vmax.f32 %v2986_v46, 0.0  ;;  %v3565_v31 = vmax.f32 %v3147_v42, 0.0 }
 0x4b4   : > { %v2991_v0 = vpop.f32.mrf.mxu0  ;;  %v3152_v26 = vpop.f32.mrf.mxu1 }
 0x4b5   : > { %v3564_v56 = vmax.f32 %v2988_v57, 0.0  ;;  %v3566_v43 = vmax.f32 %v3149_v55, 0.0  ;;  %v2992_v4 = vadd.f32 %v2991_v0, %v6097_v22  ;;  %v3153_v63 = vadd.f32 %v3152_v26, %v6101_v17 }
 0x4b6   : > { %v2993_v50 = vpop.f32.mrf.mxu0  ;;  %v3154_v58 = vpop.f32.mrf.mxu1  ;;  %v3691_v59 = vsel %vm1908_vm2, %v3563_v54, 0.0  ;;  %v3693_v13 = vsel %vm1908_vm2, %v3565_v31, 0.0 }
 0x4b7   : > { %v2994_v29 = vadd.f32 %v2993_v50, %v6105_v40  ;;  %v3155_v3 = vadd.f32 %v3154_v58, %v6109_v44  ;;  %v3571_v7 = vmax.f32 %v2992_v4, 0.0  ;;  %v3573_v47 = vmax.f32 %v3153_v63, 0.0 }
 0x4b8   : > { %v2997_v10 = vpop.f32.mrf.mxu0  ;;  %v3158_v23 = vpop.f32.mrf.mxu1  ;;  %v3692_v48 = vsel %vm1908_vm2, %v3564_v56, 0.0  ;;  %v3694_v52 = vsel %vm1908_vm2, %v3566_v43, 0.0  ;;  %v6599_v58 = vsub.s32 5, %v5303_v41 }
 0x4b9   : > { %v3572_v24 = vmax.f32 %v2994_v29, 0.0  ;;  %v3574_v5 = vmax.f32 %v3155_v3, 0.0  ;;  %v2998_v16 = vadd.f32 %v2997_v10, %v6097_v22  ;;  %v3159_v28 = vadd.f32 %v3158_v23, %v6101_v17 }
 0x4ba   : > { %v3699_v20 = vsel %vm1909_vm3, %v3571_v7, 0.0  ;;  %v3701_v27 = vsel %vm1909_vm3, %v3573_v47, 0.0  ;;  %v2999_v11 = vpop.f32.mrf.mxu0  ;;  %v3160_v14 = vpop.f32.mrf.mxu1  ;;  %v6155_v29 = vrot.slane %v2877_v2, %v6599_v58  ;;  %v6600_v3 = vsub.s32 7, %v5303_v41 }
 0x4bb   : > { %v3819_v1 = vmax.f32 %v3691_v59, %v3699_v20  ;;  %v3861_v62 = vmax.f32 %v3693_v13, %v3701_v27  ;;  %v3700_v21 = vsel %vm1909_vm3, %v3572_v24, 0.0  ;;  %v3702_v46 = vsel %vm1909_vm3, %v3574_v5, 0.0 }
 0x4bc   : > { %v3840_v42 = vmax.f32 %v3692_v48, %v3700_v21  ;;  %v3882_v51 = vmax.f32 %v3694_v52, %v3702_v46  ;;  %v3579_v33 = vmax.f32 %v2998_v16, 0.0  ;;  %v3581_v57 = vmax.f32 %v3159_v28, 0.0  ;;  %v3003_v55 = vpop.f32.mrf.mxu0  ;;  %v3164_v54 = vpop.f32.mrf.mxu1 }
 0x4bd   : > { %v3000_v31 = vadd.f32 %v2999_v11, %v6105_v40  ;;  %v3161_v0 = vadd.f32 %v3160_v14, %v6109_v44  ;;  %v3004_v26 = vadd.f32 %v3003_v55, %v6097_v22  ;;  %v3165_v56 = vadd.f32 %v3164_v54, %v6101_v17 }
 0x4be   : > { %v3707_v43 = vsel %vm1910_vm4, %v3579_v33, 0.0  ;;  %v3709_v4 = vsel %vm1910_vm4, %v3581_v57, 0.0  ;;  %v3005_v63 = vpop.f32.mrf.mxu0  ;;  %v3166_v50 = vpop.f32.mrf.mxu1  ;;  %v6159_v61 = vrot.slane %v2877_v2, %v6600_v3 }
 0x4bf   : > { %v3820_v25 = vmax.f32 %v3819_v1, %v3707_v43  ;;  %v3862_v59 = vmax.f32 %v3861_v62, %v3709_v4  ;;  %v3580_v13 = vmax.f32 %v3000_v31, 0.0  ;;  %v3582_v7 = vmax.f32 %v3161_v0, 0.0 }
 0x4c0   : > { %v3587_v47 = vmax.f32 %v3004_v26, 0.0  ;;  %v3589_v10 = vmax.f32 %v3165_v56, 0.0  ;;  %v3006_v23 = vadd.f32 %v3005_v63, %v6105_v40  ;;  %v3167_v24 = vadd.f32 %v3166_v50, %v6109_v44  ;;  %v3009_v5 = vpop.f32.mrf.mxu0  ;;  %v3170_v16 = vpop.f32.mrf.mxu1 }
 0x4c1   : > { %v3708_v28 = vsel %vm1910_vm4, %v3580_v13, 0.0  ;;  %v3710_v41 = vsel %vm1910_vm4, %v3582_v7, 0.0  ;;  %v3010_v2 = vadd.f32 %v3009_v5, %v6097_v22  ;;  %v3171_v48 = vadd.f32 %v3170_v16, %v6101_v17 }
 0x4c2   : > { %v3841_v52 = vmax.f32 %v3840_v42, %v3708_v28  ;;  %v3883_v20 = vmax.f32 %v3882_v51, %v3710_v41  ;;  %v3715_v27 = vsel %vm1911_vm5, %v3587_v47, 0.0  ;;  %v3717_v11 = vsel %vm1911_vm5, %v3589_v10, 0.0  ;;  %v3011_v14 = vpop.f32.mrf.mxu0  ;;  %v3172_v1 = vpop.f32.mrf.mxu1 }
 0x4c3   : > { %v3821_v62 = vmax.f32 %v3820_v25, %v3715_v27  ;;  %v3863_v21 = vmax.f32 %v3862_v59, %v3717_v11  ;;  %v3588_v46 = vmax.f32 %v3006_v23, 0.0  ;;  %v3590_v33 = vmax.f32 %v3167_v24, 0.0 }
 0x4c4   : > { %v3595_v57 = vmax.f32 %v3010_v2, 0.0  ;;  %v3597_v55 = vmax.f32 %v3171_v48, 0.0  ;;  %v3012_v54 = vadd.f32 %v3011_v14, %v6105_v40  ;;  %v3173_v31 = vadd.f32 %v3172_v1, %v6109_v44  ;;  %v3015_v42 = vpop.f32.mrf.mxu0  ;;  %v3176_v51 = vpop.f32.mrf.mxu1 }
 0x4c5   : > { %v3716_v0 = vsel %vm1911_vm5, %v3588_v46, 0.0  ;;  %v3718_v26 = vsel %vm1911_vm5, %v3590_v33, 0.0  ;;  %v3016_v56 = vadd.f32 %v3015_v42, %v6097_v22  ;;  %v3177_v43 = vadd.f32 %v3176_v51, %v6101_v17 }
 0x4c6   : > { %v3842_v4 = vmax.f32 %v3841_v52, %v3716_v0  ;;  %v3884_v63 = vmax.f32 %v3883_v20, %v3718_v26  ;;  %v3723_v50 = vsel %vm1912_vm6, %v3595_v57, 0.0  ;;  %v3725_v58 = vsel %vm1912_vm6, %v3597_v55, 0.0  ;;  %v3017_v3 = vpop.f32.mrf.mxu0  ;;  %v3178_v25 = vpop.f32.mrf.mxu1 }
 0x4c7   : > { %v3822_v59 = vmax.f32 %v3821_v62, %v3723_v50  ;;  %v3864_v13 = vmax.f32 %v3863_v21, %v3725_v58  ;;  %v3596_v7 = vmax.f32 %v3012_v54, 0.0  ;;  %v3598_v47 = vmax.f32 %v3173_v31, 0.0 }
 0x4c8   : > { %v3603_v10 = vmax.f32 %v3016_v56, 0.0  ;;  %v3605_v23 = vmax.f32 %v3177_v43, 0.0  ;;  %v3018_v24 = vadd.f32 %v3017_v3, %v6105_v40  ;;  %v3179_v5 = vadd.f32 %v3178_v25, %v6109_v44  ;;  %v3021_v16 = vpop.f32.mrf.mxu0  ;;  %v3182_v28 = vpop.f32.mrf.mxu1 }
 0x4c9   : > { %v3724_v41 = vsel %vm1912_vm6, %v3596_v7, 0.0  ;;  %v3726_v2 = vsel %vm1912_vm6, %v3598_v47, 0.0  ;;  %v3022_v48 = vadd.f32 %v3021_v16, %v6097_v22  ;;  %v3183_v52 = vadd.f32 %v3182_v28, %v6101_v17 }
 0x4ca   : > { %v3843_v20 = vmax.f32 %v3842_v4, %v3724_v41  ;;  %v3885_v27 = vmax.f32 %v3884_v63, %v3726_v2  ;;  %v3731_v11 = vsel %vm1913_vm7, %v3603_v10, 0.0  ;;  %v3733_v14 = vsel %vm1913_vm7, %v3605_v23, 0.0  ;;  %v3023_v1 = vpop.f32.mrf.mxu0  ;;  %v3184_v62 = vpop.f32.mrf.mxu1 }
 0x4cb   : > { %v3823_v21 = vmax.f32 %v3822_v59, %v3731_v11  ;;  %v3865_v46 = vmax.f32 %v3864_v13, %v3733_v14  ;;  %v3604_v33 = vmax.f32 %v3018_v24, 0.0  ;;  %v3606_v57 = vmax.f32 %v3179_v5, 0.0 }
 0x4cc   : > { %v3611_v55 = vmax.f32 %v3022_v48, 0.0  ;;  %v3613_v54 = vmax.f32 %v3183_v52, 0.0  ;;  %v3024_v31 = vadd.f32 %v3023_v1, %v6105_v40  ;;  %v3185_v42 = vadd.f32 %v3184_v62, %v6109_v44  ;;  %v3027_v51 = vpop.f32.mrf.mxu0  ;;  %v3188_v0 = vpop.f32.mrf.mxu1 }
 0x4cd   : > { %v3732_v26 = vsel %vm1913_vm7, %v3604_v33, 0.0  ;;  %v3734_v56 = vsel %vm1913_vm7, %v3606_v57, 0.0  ;;  %v3028_v43 = vadd.f32 %v3027_v51, %v6097_v22  ;;  %v3189_v4 = vadd.f32 %v3188_v0, %v6101_v17 }
 0x4ce   : > { %v3844_v63 = vmax.f32 %v3843_v20, %v3732_v26  ;;  %v3886_v50 = vmax.f32 %v3885_v27, %v3734_v56  ;;  %v3739_v58 = vsel %vm1914_vm8, %v3611_v55, 0.0  ;;  %v3741_v3 = vsel %vm1914_vm8, %v3613_v54, 0.0  ;;  %v3029_v25 = vpop.f32.mrf.mxu0  ;;  %v3190_v59 = vpop.f32.mrf.mxu1 }
 0x4cf   : > { %v3824_v13 = vmax.f32 %v3823_v21, %v3739_v58  ;;  %v3866_v7 = vmax.f32 %v3865_v46, %v3741_v3  ;;  %v3612_v47 = vmax.f32 %v3024_v31, 0.0  ;;  %v3614_v10 = vmax.f32 %v3185_v42, 0.0 }
 0x4d0   : > { %v3619_v23 = vmax.f32 %v3028_v43, 0.0  ;;  %v3621_v24 = vmax.f32 %v3189_v4, 0.0  ;;  %v3030_v5 = vadd.f32 %v3029_v25, %v6105_v40  ;;  %v3191_v16 = vadd.f32 %v3190_v59, %v6109_v44  ;;  %v3033_v28 = vpop.f32.mrf.mxu0  ;;  %v3194_v41 = vpop.f32.mrf.mxu1 }
 0x4d1   : > { %v3740_v2 = vsel %vm1914_vm8, %v3612_v47, 0.0  ;;  %v3742_v48 = vsel %vm1914_vm8, %v3614_v10, 0.0  ;;  %v3034_v52 = vadd.f32 %v3033_v28, %v6097_v22  ;;  %v3195_v20 = vadd.f32 %v3194_v41, %v6101_v17 }
 0x4d2   : > { %v3845_v27 = vmax.f32 %v3844_v63, %v3740_v2  ;;  %v3887_v11 = vmax.f32 %v3886_v50, %v3742_v48  ;;  %v3747_v14 = vsel %vm1915_vm9, %v3619_v23, 0.0  ;;  %v3749_v1 = vsel %vm1915_vm9, %v3621_v24, 0.0  ;;  %v3035_v62 = vpop.f32.mrf.mxu0  ;;  %v3196_v21 = vpop.f32.mrf.mxu1 }
 0x4d3   : > { %v3825_v46 = vmax.f32 %v3824_v13, %v3747_v14  ;;  %v3867_v33 = vmax.f32 %v3866_v7, %v3749_v1  ;;  %v3620_v57 = vmax.f32 %v3030_v5, 0.0  ;;  %v3622_v55 = vmax.f32 %v3191_v16, 0.0 }
 0x4d4   : > { %v3627_v54 = vmax.f32 %v3034_v52, 0.0  ;;  %v3629_v31 = vmax.f32 %v3195_v20, 0.0  ;;  %v3036_v42 = vadd.f32 %v3035_v62, %v6105_v40  ;;  %v3197_v51 = vadd.f32 %v3196_v21, %v6109_v44  ;;  %v3039_v0 = vpop.f32.mrf.mxu0  ;;  %v3200_v26 = vpop.f32.mrf.mxu1 }
 0x4d5   : > { %v3748_v56 = vsel %vm1915_vm9, %v3620_v57, 0.0  ;;  %v3750_v43 = vsel %vm1915_vm9, %v3622_v55, 0.0  ;;  %v3040_v4 = vadd.f32 %v3039_v0, %v6097_v22  ;;  %v3201_v63 = vadd.f32 %v3200_v26, %v6101_v17 }
 0x4d6   : > { %v3846_v50 = vmax.f32 %v3845_v27, %v3748_v56  ;;  %v3888_v58 = vmax.f32 %v3887_v11, %v3750_v43  ;;  %v3755_v3 = vsel %vm1916_vm10, %v3627_v54, 0.0  ;;  %v3757_v25 = vsel %vm1916_vm10, %v3629_v31, 0.0  ;;  %v3041_v59 = vpop.f32.mrf.mxu0  ;;  %v3202_v13 = vpop.f32.mrf.mxu1 }
 0x4d7   : > { %v3826_v7 = vmax.f32 %v3825_v46, %v3755_v3  ;;  %v3868_v47 = vmax.f32 %v3867_v33, %v3757_v25  ;;  %v3628_v10 = vmax.f32 %v3036_v42, 0.0  ;;  %v3630_v23 = vmax.f32 %v3197_v51, 0.0 }
 0x4d8   : > { %v3635_v24 = vmax.f32 %v3040_v4, 0.0  ;;  %v3637_v5 = vmax.f32 %v3201_v63, 0.0  ;;  %v3042_v16 = vadd.f32 %v3041_v59, %v6105_v40  ;;  %v3203_v28 = vadd.f32 %v3202_v13, %v6109_v44  ;;  %v3045_v41 = vpop.f32.mrf.mxu0  ;;  %v3206_v2 = vpop.f32.mrf.mxu1 }
 0x4d9   : > { %v3756_v48 = vsel %vm1916_vm10, %v3628_v10, 0.0  ;;  %v3758_v52 = vsel %vm1916_vm10, %v3630_v23, 0.0  ;;  %v3046_v20 = vadd.f32 %v3045_v41, %v6097_v22  ;;  %v3207_v27 = vadd.f32 %v3206_v2, %v6101_v17 }
 0x4da   : > { %v3847_v11 = vmax.f32 %v3846_v50, %v3756_v48  ;;  %v3889_v14 = vmax.f32 %v3888_v58, %v3758_v52  ;;  %v3763_v1 = vsel %vm1917_vm11, %v3635_v24, 0.0  ;;  %v3765_v62 = vsel %vm1917_vm11, %v3637_v5, 0.0  ;;  %v3047_v21 = vpop.f32.mrf.mxu0  ;;  %v3208_v46 = vpop.f32.mrf.mxu1 }
 0x4db   : > { %v3827_v33 = vmax.f32 %v3826_v7, %v3763_v1  ;;  %v3869_v57 = vmax.f32 %v3868_v47, %v3765_v62  ;;  %v3636_v55 = vmax.f32 %v3042_v16, 0.0  ;;  %v3638_v54 = vmax.f32 %v3203_v28, 0.0 }
 0x4dc   : > { %v3643_v31 = vmax.f32 %v3046_v20, 0.0  ;;  %v3645_v42 = vmax.f32 %v3207_v27, 0.0  ;;  %v3048_v51 = vadd.f32 %v3047_v21, %v6105_v40  ;;  %v3209_v0 = vadd.f32 %v3208_v46, %v6109_v44  ;;  %v3051_v26 = vpop.f32.mrf.mxu0  ;;  %v3212_v56 = vpop.f32.mrf.mxu1 }
 0x4dd   : > { %v3764_v43 = vsel %vm1917_vm11, %v3636_v55, 0.0  ;;  %v3766_v4 = vsel %vm1917_vm11, %v3638_v54, 0.0  ;;  %v3052_v63 = vadd.f32 %v3051_v26, %v6097_v22  ;;  %v3213_v50 = vadd.f32 %v3212_v56, %v6101_v17 }
 0x4de   : > { %v3848_v58 = vmax.f32 %v3847_v11, %v3764_v43  ;;  %v3890_v3 = vmax.f32 %v3889_v14, %v3766_v4  ;;  %v3771_v25 = vsel %vm1918_vm12, %v3643_v31, 0.0  ;;  %v3773_v59 = vsel %vm1918_vm12, %v3645_v42, 0.0  ;;  %v3053_v13 = vpop.f32.mrf.mxu0  ;;  %v3214_v7 = vpop.f32.mrf.mxu1 }
 0x4df   : > { %v3828_v47 = vmax.f32 %v3827_v33, %v3771_v25  ;;  %v3870_v10 = vmax.f32 %v3869_v57, %v3773_v59  ;;  %v3644_v23 = vmax.f32 %v3048_v51, 0.0  ;;  %v3646_v24 = vmax.f32 %v3209_v0, 0.0 }
 0x4e0   : > { %v3651_v5 = vmax.f32 %v3052_v63, 0.0  ;;  %v3653_v16 = vmax.f32 %v3213_v50, 0.0  ;;  %v3054_v28 = vadd.f32 %v3053_v13, %v6105_v40  ;;  %v3215_v41 = vadd.f32 %v3214_v7, %v6109_v44  ;;  %v3057_v2 = vpop.f32.mrf.mxu0  ;;  %v3218_v48 = vpop.f32.mrf.mxu1 }
 0x4e1   : > { %v3772_v52 = vsel %vm1918_vm12, %v3644_v23, 0.0  ;;  %v3774_v20 = vsel %vm1918_vm12, %v3646_v24, 0.0  ;;  %v3058_v27 = vadd.f32 %v3057_v2, %v6097_v22  ;;  %v3219_v11 = vadd.f32 %v3218_v48, %v6101_v17 }
 0x4e2   : > { %v3849_v14 = vmax.f32 %v3848_v58, %v3772_v52  ;;  %v3891_v1 = vmax.f32 %v3890_v3, %v3774_v20  ;;  %v3779_v62 = vsel %vm1919_vm13, %v3651_v5, 0.0  ;;  %v3781_v21 = vsel %vm1919_vm13, %v3653_v16, 0.0  ;;  %v3059_v46 = vpop.f32.mrf.mxu0  ;;  %v3220_v33 = vpop.f32.mrf.mxu1 }
 0x4e3   : > { %v3829_v57 = vmax.f32 %v3828_v47, %v3779_v62  ;;  %v3871_v55 = vmax.f32 %v3870_v10, %v3781_v21  ;;  %v3652_v54 = vmax.f32 %v3054_v28, 0.0  ;;  %v3654_v31 = vmax.f32 %v3215_v41, 0.0 }
 0x4e4   : > { %v3659_v42 = vmax.f32 %v3058_v27, 0.0  ;;  %v3661_v51 = vmax.f32 %v3219_v11, 0.0  ;;  %v3060_v0 = vadd.f32 %v3059_v46, %v6105_v40  ;;  %v3221_v26 = vadd.f32 %v3220_v33, %v6109_v44  ;;  %v3063_v56 = vpop.f32.mrf.mxu0  ;;  %v3224_v43 = vpop.f32.mrf.mxu1 }
 0x4e5   : > { %v3780_v4 = vsel %vm1919_vm13, %v3652_v54, 0.0  ;;  %v3782_v63 = vsel %vm1919_vm13, %v3654_v31, 0.0  ;;  %v3064_v50 = vadd.f32 %v3063_v56, %v6097_v22  ;;  %v3225_v58 = vadd.f32 %v3224_v43, %v6101_v17 }
 0x4e6   : > { %v3850_v3 = vmax.f32 %v3849_v14, %v3780_v4  ;;  %v3892_v25 = vmax.f32 %v3891_v1, %v3782_v63  ;;  %v3787_v59 = vsel %vm6601_vm14, %v3659_v42, 0.0  ;;  %v3789_v13 = vsel %vm6602_vm15, %v3661_v51, 0.0  ;;  %v3065_v7 = vpop.f32.mrf.mxu0  ;;  %v3226_v47 = vpop.f32.mrf.mxu1 }
 0x4e7   : > { %v3830_v10 = vmax.f32 %v3829_v57, %v3787_v59  ;;  %v3872_v23 = vmax.f32 %v3871_v55, %v3789_v13  ;;  %v3660_v24 = vmax.f32 %v3060_v0, 0.0  ;;  %v3662_v5 = vmax.f32 %v3221_v26, 0.0 }
 0x4e8   : > { %v3667_v16 = vmax.f32 %v3064_v50, 0.0  ;;  %v3669_v28 = vmax.f32 %v3225_v58, 0.0  ;;  %v3066_v41 = vadd.f32 %v3065_v7, %v6105_v40  ;;  %v3227_v2 = vadd.f32 %v3226_v47, %v6109_v44  ;;  %v3069_v48 = vpop.f32.mrf.mxu0  ;;  %v3230_v52 = vpop.f32.mrf.mxu1 }
 0x4e9   : > { %v3788_v20 = vsel %vm6603_vm1, %v3660_v24, 0.0  ;;  %v3790_v27 = vsel %vm6604_vm0, %v3662_v5, 0.0  ;;  %v3070_v11 = vadd.f32 %v3069_v48, %v6097_v22  ;;  %v3231_v14 = vadd.f32 %v3230_v52, %v6101_v17 }
 0x4ea   : > { %v3851_v1 = vmax.f32 %v3850_v3, %v3788_v20  ;;  %v3893_v62 = vmax.f32 %v3892_v25, %v3790_v27  ;;  %vm6605_vm14 = vcmp.lt.s32.totalorder %v5415_v30, 250  ;;  %v3071_v33 = vpop.f32.mrf.mxu0  ;;  %v3232_v57 = vpop.f32.mrf.mxu1  ;;  %v3668_v31 = vmax.f32 %v3066_v41, 0.0 }
 0x4eb   : > { %v3795_v21 = vsel %vm6605_vm14, %v3667_v16, 0.0  ;;  %vm6606_vm15 = vmmov %vm6605_vm14  ;;  %v3670_v42 = vmax.f32 %v3227_v2, 0.0  ;;  %v3675_v51 = vmax.f32 %v3070_v11, 0.0  ;;  %v3677_v0 = vmax.f32 %v3231_v14, 0.0 }
 0x4ec   : > { %v3797_v46 = vsel %vm6606_vm15, %v3669_v28, 0.0  ;;  %v3831_v55 = vmax.f32 %v3830_v10, %v3795_v21  ;;  %v3072_v26 = vadd.f32 %v3071_v33, %v6105_v40  ;;  %v3233_v56 = vadd.f32 %v3232_v57, %v6109_v44  ;;  %v3075_v43 = vpop.f32.mrf.mxu0  ;;  %v3236_v4 = vpop.f32.mrf.mxu1  ;;  %vm6607_vm1 = vmmov %vm6605_vm14 }
 0x4ed   : > { %v3873_v54 = vmax.f32 %v3872_v23, %v3797_v46  ;;  %v3796_v63 = vsel %vm6607_vm1, %v3668_v31, 0.0  ;;  %vm6608_vm0 = vmmov %vm6607_vm1  ;;  %v3076_v58 = vadd.f32 %v3075_v43, %v6097_v22  ;;  %v3237_v3 = vadd.f32 %v3236_v4, %v6101_v17 }
 0x4ee   : > { %v3798_v50 = vsel %vm6608_vm0, %v3670_v42, 0.0  ;;  %v3852_v25 = vmax.f32 %v3851_v1, %v3796_v63  ;;  %vm6609_vm14 = vcmp.lt.s32.totalorder %v5418_v32, 250  ;;  %v3077_v47 = vpop.f32.mrf.mxu0  ;;  %v3238_v10 = vpop.f32.mrf.mxu1  ;;  %v3676_v5 = vmax.f32 %v3072_v26, 0.0 }
 0x4ef   : > { %v3894_v59 = vmax.f32 %v3893_v62, %v3798_v50  ;;  %v3803_v13 = vsel %vm6609_vm14, %v3675_v51, 0.0  ;;  %vm6610_vm15 = vmmov %vm6609_vm14  ;;  %v3678_v16 = vmax.f32 %v3233_v56, 0.0  ;;  %v3683_v28 = vmax.f32 %v3076_v58, 0.0 }
 0x4f0   : > { %v3805_v7 = vsel %vm6610_vm15, %v3677_v0, 0.0  ;;  %v3832_v23 = vmax.f32 %v3831_v55, %v3803_v13  ;;  %v3685_v41 = vmax.f32 %v3237_v3, 0.0  ;;  %v3078_v22 = vadd.f32 %v3077_v47, %v6105_v40  ;;  %v3307_v2 = vpop.f32.mrf.mxu0  ;;  %v3468_v48 = vpop.f32.mrf.mxu1  ;;  %vm6611_vm1 = vmmov %vm6609_vm14 }
 0x4f1   : > { %v3874_v24 = vmax.f32 %v3873_v54, %v3805_v7  ;;  %v3239_v17 = vadd.f32 %v3238_v10, %v6109_v44  ;;  %v3804_v52 = vsel %vm6611_vm1, %v3676_v5, 0.0  ;;  %vm6612_vm0 = vmmov %vm6611_vm1  ;;  %v3308_v27 = vadd.f32 %v3307_v2, %v6121_v37 }
 0x4f2   : > { %v3806_v20 = vsel %vm6612_vm0, %v3678_v16, 0.0  ;;  %v3469_v11 = vadd.f32 %v3468_v48, %v6125_v15  ;;  %v3853_v14 = vmax.f32 %v3852_v25, %v3804_v52  ;;  %vm6613_vm14 = vcmp.lt.s32.totalorder %v5421_v35, 250  ;;  %v3309_v44 = vpop.f32.mrf.mxu0  ;;  %v3470_v21 = vpop.f32.mrf.mxu1 }
 0x4f3   : > { %v3895_v1 = vmax.f32 %v3894_v59, %v3806_v20  ;;  %v3811_v62 = vsel %vm6613_vm14, %v3683_v28, 0.0  ;;  %vm6614_vm15 = vmmov %vm6613_vm14  ;;  %v3684_v57 = vmax.f32 %v3078_v22, 0.0  ;;  %v3686_v55 = vmax.f32 %v3239_v17, 0.0 }
 0x4f4   : > { %v3813_v40 = vsel %vm6614_vm15, %v3685_v41, 0.0  ;;  %v3833_v46 = vmax.f32 %v3832_v23, %v3811_v62  ;;  %v3567_v54 = vmax.f32 %v3308_v27, 0.0  ;;  %v3569_v31 = vmax.f32 %v3469_v11, 0.0  ;;  %v3313_v0 = vpop.f32.mrf.mxu0  ;;  %v3474_v26 = vpop.f32.mrf.mxu1  ;;  %vm6615_vm1 = vmmov %vm6613_vm14 }
 0x4f5   : > { %v3875_v33 = vmax.f32 %v3874_v24, %v3813_v40  ;;  %v3310_v42 = vadd.f32 %v3309_v44, %v6155_v29  ;;  %v3471_v51 = vadd.f32 %v3470_v21, %v6159_v61  ;;  %v3812_v4 = vsel %vm6615_vm1, %v3684_v57, 0.0  ;;  %vm6616_vm0 = vmmov %vm6615_vm1 }
 0x4f6   : > { %v3834_v56 = vrot.slane %v3833_v46, 4  ;;  %v3814_v63 = vsel %vm6616_vm0, %v3686_v55, 0.0  ;;  %v3854_v50 = vmax.f32 %v3853_v14, %v3812_v4  ;;  %v3315_v3 = vpop.f32.mrf.mxu0  ;;  %v3476_v25 = vpop.f32.mrf.mxu1  ;;  %v3314_v24 = vadd.f32 %v3313_v0, %v6121_v37  ;;  %vm6629_vm14 = vmmov %vm6616_vm0 }
 0x4f7   : > { %v3876_v43 = vrot.slane %v3875_v33, 4  ;;  %v3896_v58 = vmax.f32 %v3895_v1, %v3814_v63  ;;  %v3568_v7 = vmax.f32 %v3310_v42, 0.0  ;;  %v3570_v47 = vmax.f32 %v3471_v51, 0.0  ;;  %vm6630_vm15 = vmmov %vm6616_vm0 }
 0x4f8   : > { %v3835_v59 = vmax.f32 %v3833_v46, %v3834_v56  ;;  %v3855_v10 = vrot.slane %v3854_v50, 4  ;;  %v3475_v5 = vadd.f32 %v3474_v26, %v6125_v15  ;;  %v3319_v16 = vpop.f32.mrf.mxu0  ;;  %v3480_v28 = vpop.f32.mrf.mxu1  ;;  %v6327_v17 = vsel %vm1908_vm2, %v3567_v54, 0.0  ;;  %vm6631_vm1 = vmmov %vm6616_vm0 }
 0x4f9   : > { %v3877_v13 = vmax.f32 %v3875_v33, %v3876_v43  ;;  %v3897_v23 = vrot.slane %v3896_v58, 4  ;;  %v6331_v2 = vsel %vm1908_vm2, %v3569_v31, 0.0  ;;  %v3575_v20 = vmax.f32 %v3314_v24, 0.0 }
 0x4fa   : > { %v3836_v41 = vrot.slane %v3835_v59, 2  ;;  %v3856_v48 = vmax.f32 %v3854_v50, %v3855_v10  ;;  %v3577_v27 = vmax.f32 %v3475_v5, 0.0  ;;  %v3321_v11 = vpop.f32.mrf.mxu0  ;;  %v3482_v14 = vpop.f32.mrf.mxu1  ;;  %v3316_v40 = vadd.f32 %v3315_v3, %v6155_v29 }
 0x4fb   : > { %v3878_v22 = vrot.slane %v3877_v13, 2  ;;  %v3898_v52 = vmax.f32 %v3896_v58, %v3897_v23  ;;  %v3477_v44 = vadd.f32 %v3476_v25, %v6159_v61  ;;  %v6337_v33 = vsel %vm1908_vm2, %v3568_v7, 0.0 }
 0x4fc   : > { %v3837_v1 = vmax.f32 %v3835_v59, %v3836_v41  ;;  %v3857_v21 = vrot.slane %v3856_v48, 2  ;;  %v6341_v57 = vsel %vm1908_vm2, %v3570_v47, 0.0  ;;  %v3325_v55 = vpop.f32.mrf.mxu0  ;;  %v3486_v54 = vpop.f32.mrf.mxu1  ;;  %v3703_v51 = vsel %vm1909_vm3, %v3575_v20, 0.0 }
 0x4fd   : > { %v3879_v62 = vmax.f32 %v3877_v13, %v3878_v22  ;;  %v3899_v46 = vrot.slane %v3898_v52, 2  ;;  %v3705_v0 = vsel %vm1909_vm3, %v3577_v27, 0.0  ;;  %v3576_v43 = vmax.f32 %v3316_v40, 0.0 }
 0x4fe   : > { %v3838_v31 = vrot.slane %v3837_v1, 1  ;;  %v3858_v26 = vmax.f32 %v3856_v48, %v3857_v21  ;;  %v3578_v4 = vmax.f32 %v3477_v44, 0.0  ;;  %v3327_v63 = vpop.f32.mrf.mxu0  ;;  %v3488_v50 = vpop.f32.mrf.mxu1  ;;  %v3320_v3 = vadd.f32 %v3319_v16, %v6121_v37 }
 0x4ff   : > { %v3880_v42 = vrot.slane %v3879_v62, 1  ;;  %v3900_v56 = vmax.f32 %v3898_v52, %v3899_v46  ;;  %v3481_v25 = vadd.f32 %v3480_v28, %v6125_v15  ;;  %v3903_v7 = vmax.f32 %v6327_v17, %v3703_v51 }
 0x500   : > { %v3839_v58 = vmax.f32 %v3837_v1, %v3838_v31  ;;  %v3859_v59 = vrot.slane %v3858_v26, 1  ;;  %v3945_v47 = vmax.f32 %v6331_v2, %v3705_v0  ;;  %v3331_v10 = vpop.f32.mrf.mxu0  ;;  %v3492_v23 = vpop.f32.mrf.mxu1  ;;  %v3704_v41 = vsel %vm1909_vm3, %v3576_v43, 0.0 }
 0x501   : > { %v3881_v18 = vmax.f32 %v3879_v62, %v3880_v42  ;;  %v3901_v13 = vrot.slane %v3900_v56, 1  ;;  %v3706_v22 = vsel %vm1909_vm3, %v3578_v4, 0.0  ;;  %v3583_v52 = vmax.f32 %v3320_v3, 0.0 }
 0x502   : > { %v3987_v24 = vmax.f32 %v3839_v58, 0.0  ;;  %v3860_v48 = vmax.f32 %v3858_v26, %v3859_v59  ;;  %v3585_v28 = vmax.f32 %v3481_v25, 0.0  ;;  %v3333_v20 = vpop.f32.mrf.mxu0  ;;  %v3494_v27 = vpop.f32.mrf.mxu1  ;;  %v3322_v17 = vadd.f32 %v3321_v11, %v6155_v29 }
 0x503   : > { %v3989_v5 = vmax.f32 %v3881_v18, 0.0  ;;  %v3902_v16 = vmax.f32 %v3900_v56, %v3901_v13  ;;  %v3483_v2 = vadd.f32 %v3482_v14, %v6159_v61  ;;  %v3326_v1 = vadd.f32 %v3325_v55, %v6121_v37 }
 0x504   : > { %v3487_v62 = vadd.f32 %v3486_v54, %v6125_v15  ;;  %v3988_v40 = vmax.f32 %v3860_v48, 0.0  ;;  %v3924_v21 = vmax.f32 %v6337_v33, %v3704_v41  ;;  %v3966_v19 = vmax.f32 %v6341_v57, %v3706_v22  ;;  %v3337_v46 = vpop.f32.mrf.mxu0  ;;  %v3498_v31 = vpop.f32.mrf.mxu1 }
 0x505   : > { %v3990_v44 = vmax.f32 %v3902_v16, 0.0  ;;  %v3711_v42 = vsel %vm1910_vm4, %v3583_v52, 0.0  ;;  %v3713_v11 = vsel %vm1910_vm4, %v3585_v28, 0.0  ;;  %v3584_v51 = vmax.f32 %v3322_v17, 0.0 }
 0x506   : > { %v3586_v14 = vmax.f32 %v3483_v2, 0.0  ;;  %v6365_v0 = vcombine.low %v3987_v24, %v3988_v40  ;;  %v3591_v54 = vmax.f32 %v3326_v1, 0.0  ;;  %v3593_v26 = vmax.f32 %v3487_v62, 0.0  ;;  %v3339_v56 = vpop.f32.mrf.mxu0  ;;  %v3500_v33 = vpop.f32.mrf.mxu1 }
 0x507   : > { %v6367_v55 = vcombine.low %v3989_v5, %v3990_v44  ;;  %v3712_v57 = vsel %vm1910_vm4, %v3584_v51, 0.0  ;;  %v3328_v4 = vadd.f32 %v3327_v63, %v6155_v29  ;;  %v3489_v58 = vadd.f32 %v3488_v50, %v6159_v61 }
 0x508   : > { %v3714_v43 = vsel %vm1910_vm4, %v3586_v14, 0.0  ;;  %v3904_v18 = vmax.f32 %v3903_v7, %v3711_v42  ;;  %v3946_v3 = vmax.f32 %v3945_v47, %v3713_v11  ;;  %v3719_v25 = vsel %vm1911_vm5, %v3591_v54, 0.0  ;;  %v3343_v13 = vpop.f32.mrf.mxu0  ;;  %v3504_v24 = vpop.f32.mrf.mxu1 }
 0x509   : > { %v3721_v59 = vsel %vm1911_vm5, %v3593_v26, 0.0  ;;  %v3925_v5 = vmax.f32 %v3924_v21, %v3712_v57  ;;  %v3967_v41 = vmax.f32 %v3966_v19, %v3714_v43  ;;  %v3592_v22 = vmax.f32 %v3328_v4, 0.0 }
 0x50a   : > { %v3594_v48 = vmax.f32 %v3489_v58, 0.0  ;;  %v3332_v34 = vadd.f32 %v3331_v10, %v6121_v37  ;;  %v3493_v63 = vadd.f32 %v3492_v23, %v6125_v15  ;;  %v3334_v50 = vadd.f32 %v3333_v20, %v6155_v29  ;;  %v3345_v47 = vpop.f32.mrf.mxu0  ;;  %v3506_v16 = vpop.f32.mrf.mxu1 }
 0x50b   : > { %v3495_v7 = vadd.f32 %v3494_v27, %v6159_v61  ;;  %v3905_v52 = vmax.f32 %v3904_v18, %v3719_v25  ;;  %v3947_v28 = vmax.f32 %v3946_v3, %v3721_v59  ;;  %v3338_v17 = vadd.f32 %v3337_v46, %v6121_v37 }
 0x50c   : > { %v3499_v2 = vadd.f32 %v3498_v31, %v6125_v15  ;;  %v3720_v1 = vsel %vm1911_vm5, %v3592_v22, 0.0  ;;  %v3722_v10 = vsel %vm1911_vm5, %v3594_v48, 0.0  ;;  %v3599_v62 = vmax.f32 %v3332_v34, 0.0  ;;  %v3349_v40 = vpop.f32.mrf.mxu0  ;;  %v3510_v20 = vpop.f32.mrf.mxu1 }
 0x50d   : > { %v3601_v23 = vmax.f32 %v3493_v63, 0.0  ;;  %v3600_v44 = vmax.f32 %v3334_v50, 0.0  ;;  %v3602_v27 = vmax.f32 %v3495_v7, 0.0  ;;  %v3607_v21 = vmax.f32 %v3338_v17, 0.0 }
 0x50e   : > { %v3609_v19 = vmax.f32 %v3499_v2, 0.0  ;;  %v3727_v42 = vsel %vm1912_vm6, %v3599_v62, 0.0  ;;  %v3340_v31 = vadd.f32 %v3339_v56, %v6155_v29  ;;  %v3501_v11 = vadd.f32 %v3500_v33, %v6159_v61  ;;  %v3351_v36 = vpop.f32.mrf.mxu0  ;;  %v3512_v51 = vpop.f32.mrf.mxu1 }
 0x50f   : > { %v3729_v46 = vsel %vm1912_vm6, %v3601_v23, 0.0  ;;  %v3926_v14 = vmax.f32 %v3925_v5, %v3720_v1  ;;  %v3968_v54 = vmax.f32 %v3967_v41, %v3722_v10  ;;  %v3728_v26 = vsel %vm1912_vm6, %v3600_v44, 0.0 }
 0x510   : > { %v3730_v57 = vsel %vm1912_vm6, %v3602_v27, 0.0  ;;  %v3906_v43 = vmax.f32 %v3905_v52, %v3727_v42  ;;  %v3948_v4 = vmax.f32 %v3947_v28, %v3729_v46  ;;  %v3735_v58 = vsel %vm1913_vm7, %v3607_v21, 0.0  ;;  %v3355_v18 = vpop.f32.mrf.mxu0  ;;  %v3516_v33 = vpop.f32.mrf.mxu1 }
 0x511   : > { %v3737_v56 = vsel %vm1913_vm7, %v3609_v19, 0.0  ;;  %v3927_v3 = vmax.f32 %v3926_v14, %v3728_v26  ;;  %v3969_v25 = vmax.f32 %v3968_v54, %v3730_v57  ;;  %v3608_v59 = vmax.f32 %v3340_v31, 0.0 }
 0x512   : > { %v3610_v5 = vmax.f32 %v3501_v11, 0.0  ;;  %v3344_v41 = vadd.f32 %v3343_v13, %v6121_v37  ;;  %v3505_v22 = vadd.f32 %v3504_v24, %v6125_v15  ;;  %v3346_v38 = vadd.f32 %v3345_v47, %v6155_v29  ;;  %v3357_v34 = vpop.f32.mrf.mxu0  ;;  %v3518_v63 = vpop.f32.mrf.mxu1 }
 0x513   : > { %v3507_v48 = vadd.f32 %v3506_v16, %v6159_v61  ;;  %v3907_v50 = vmax.f32 %v3906_v43, %v3735_v58  ;;  %v3949_v7 = vmax.f32 %v3948_v4, %v3737_v56  ;;  %v3350_v52 = vadd.f32 %v3349_v40, %v6121_v37 }
 0x514   : > { %v3511_v28 = vadd.f32 %v3510_v20, %v6125_v15  ;;  %v3736_v17 = vsel %vm1913_vm7, %v3608_v59, 0.0  ;;  %v3738_v13 = vsel %vm1913_vm7, %v3610_v5, 0.0  ;;  %v3615_v2 = vmax.f32 %v3344_v41, 0.0  ;;  %v3361_v1 = vpop.f32.mrf.mxu0  ;;  %v3522_v47 = vpop.f32.mrf.mxu1 }
 0x515   : > { %v3617_v24 = vmax.f32 %v3505_v22, 0.0  ;;  %v3616_v10 = vmax.f32 %v3346_v38, 0.0  ;;  %v3618_v16 = vmax.f32 %v3507_v48, 0.0  ;;  %v3623_v62 = vmax.f32 %v3350_v52, 0.0 }
 0x516   : > { %v3625_v23 = vmax.f32 %v3511_v28, 0.0  ;;  %v3743_v44 = vsel %vm1914_vm8, %v3615_v2, 0.0  ;;  %v3352_v20 = vadd.f32 %v3351_v36, %v6155_v29  ;;  %v3513_v27 = vadd.f32 %v3512_v51, %v6159_v61  ;;  %v3363_v39 = vpop.f32.mrf.mxu0  ;;  %v3524_v21 = vpop.f32.mrf.mxu1 }
 0x517   : > { %v3745_v40 = vsel %vm1914_vm8, %v3617_v24, 0.0  ;;  %v3928_v19 = vmax.f32 %v3927_v3, %v3736_v17  ;;  %v3970_v42 = vmax.f32 %v3969_v25, %v3738_v13  ;;  %v3744_v46 = vsel %vm1914_vm8, %v3616_v10, 0.0 }
 0x518   : > { %v3746_v31 = vsel %vm1914_vm8, %v3618_v16, 0.0  ;;  %v3908_v11 = vmax.f32 %v3907_v50, %v3743_v44  ;;  %v3950_v14 = vmax.f32 %v3949_v7, %v3745_v40  ;;  %v3751_v54 = vsel %vm1915_vm9, %v3623_v62, 0.0  ;;  %v3367_v26 = vpop.f32.mrf.mxu0  ;;  %v3528_v51 = vpop.f32.mrf.mxu1 }
 0x519   : > { %v3753_v36 = vsel %vm1915_vm9, %v3625_v23, 0.0  ;;  %v3929_v57 = vmax.f32 %v3928_v19, %v3744_v46  ;;  %v3971_v43 = vmax.f32 %v3970_v42, %v3746_v31  ;;  %v3624_v4 = vmax.f32 %v3352_v20, 0.0 }
 0x51a   : > { %v3626_v58 = vmax.f32 %v3513_v27, 0.0  ;;  %v3356_v56 = vadd.f32 %v3355_v18, %v6121_v37  ;;  %v3517_v3 = vadd.f32 %v3516_v33, %v6125_v15  ;;  %v3358_v45 = vadd.f32 %v3357_v34, %v6155_v29  ;;  %v3369_v59 = vpop.f32.mrf.mxu0  ;;  %v3530_v5 = vpop.f32.mrf.mxu1 }
 0x51b   : > { %v3519_v25 = vadd.f32 %v3518_v63, %v6159_v61  ;;  %v3909_v41 = vmax.f32 %v3908_v11, %v3751_v54  ;;  %v3951_v22 = vmax.f32 %v3950_v14, %v3753_v36  ;;  %v3362_v38 = vadd.f32 %v3361_v1, %v6121_v37 }
 0x51c   : > { %v3523_v48 = vadd.f32 %v3522_v47, %v6125_v15  ;;  %v3752_v50 = vsel %vm1915_vm9, %v3624_v4, 0.0  ;;  %v3754_v18 = vsel %vm1915_vm9, %v3626_v58, 0.0  ;;  %v3631_v7 = vmax.f32 %v3356_v56, 0.0  ;;  %v3373_v52 = vpop.f32.mrf.mxu0  ;;  %v3534_v34 = vpop.f32.mrf.mxu1 }
 0x51d   : > { %v3633_v33 = vmax.f32 %v3517_v3, 0.0  ;;  %v3632_v28 = vmax.f32 %v3358_v45, 0.0  ;;  %v3634_v63 = vmax.f32 %v3519_v25, 0.0  ;;  %v3639_v17 = vmax.f32 %v3362_v38, 0.0 }
 0x51e   : > { %v3641_v13 = vmax.f32 %v3523_v48, 0.0  ;;  %v3759_v2 = vsel %vm1916_vm10, %v3631_v7, 0.0  ;;  %v3364_v1 = vadd.f32 %v3363_v39, %v6155_v29  ;;  %v3525_v47 = vadd.f32 %v3524_v21, %v6159_v61  ;;  %v3375_v49 = vpop.f32.mrf.mxu0  ;;  %v3536_v10 = vpop.f32.mrf.mxu1 }
 0x51f   : > { %v3761_v24 = vsel %vm1916_vm10, %v3633_v33, 0.0  ;;  %v3930_v16 = vmax.f32 %v3929_v57, %v3752_v50  ;;  %v3972_v62 = vmax.f32 %v3971_v43, %v3754_v18  ;;  %v3760_v23 = vsel %vm1916_vm10, %v3632_v28, 0.0 }
 0x520   : > { %v3762_v44 = vsel %vm1916_vm10, %v3634_v63, 0.0  ;;  %v3910_v40 = vmax.f32 %v3909_v41, %v3759_v2  ;;  %v3952_v20 = vmax.f32 %v3951_v22, %v3761_v24  ;;  %v3767_v27 = vsel %vm1917_vm11, %v3639_v17, 0.0  ;;  %v3379_v19 = vpop.f32.mrf.mxu0  ;;  %v3540_v21 = vpop.f32.mrf.mxu1 }
 0x521   : > { %v3769_v39 = vsel %vm1917_vm11, %v3641_v13, 0.0  ;;  %v3931_v42 = vmax.f32 %v3930_v16, %v3760_v23  ;;  %v3973_v46 = vmax.f32 %v3972_v62, %v3762_v44  ;;  %v3640_v31 = vmax.f32 %v3364_v1, 0.0 }
 0x522   : > { %v3642_v11 = vmax.f32 %v3525_v47, 0.0  ;;  %v3368_v14 = vadd.f32 %v3367_v26, %v6121_v37  ;;  %v3529_v54 = vadd.f32 %v3528_v51, %v6125_v15  ;;  %v3370_v60 = vadd.f32 %v3369_v59, %v6155_v29  ;;  %v3381_v57 = vpop.f32.mrf.mxu0  ;;  %v3542_v43 = vpop.f32.mrf.mxu1 }
 0x523   : > { %v3531_v36 = vadd.f32 %v3530_v5, %v6159_v61  ;;  %v3911_v4 = vmax.f32 %v3910_v40, %v3767_v27  ;;  %v3953_v58 = vmax.f32 %v3952_v20, %v3769_v39  ;;  %v3374_v56 = vadd.f32 %v3373_v52, %v6121_v37 }
 0x524   : > { %v3535_v3 = vadd.f32 %v3534_v34, %v6125_v15  ;;  %v3768_v45 = vsel %vm1917_vm11, %v3640_v31, 0.0  ;;  %v3770_v26 = vsel %vm1917_vm11, %v3642_v11, 0.0  ;;  %v3647_v25 = vmax.f32 %v3368_v14, 0.0  ;;  %v3385_v41 = vpop.f32.mrf.mxu0  ;;  %v3546_v59 = vpop.f32.mrf.mxu1 }
 0x525   : > { %v3649_v51 = vmax.f32 %v3529_v54, 0.0  ;;  %v3648_v22 = vmax.f32 %v3370_v60, 0.0  ;;  %v3650_v5 = vmax.f32 %v3531_v36, 0.0  ;;  %v3655_v38 = vmax.f32 %v3374_v56, 0.0 }
 0x526   : > { %v3657_v48 = vmax.f32 %v3535_v3, 0.0  ;;  %v3775_v50 = vsel %vm1918_vm12, %v3647_v25, 0.0  ;;  %v3376_v7 = vadd.f32 %v3375_v49, %v6155_v29  ;;  %v3537_v33 = vadd.f32 %v3536_v10, %v6159_v61  ;;  %v3387_v6 = vpop.f32.mrf.mxu0  ;;  %v3548_v52 = vpop.f32.mrf.mxu1 }
 0x527   : > { %v3777_v18 = vsel %vm1918_vm12, %v3649_v51, 0.0  ;;  %v3932_v34 = vmax.f32 %v3931_v42, %v3768_v45  ;;  %v3974_v28 = vmax.f32 %v3973_v46, %v3770_v26  ;;  %v3776_v63 = vsel %vm1918_vm12, %v3648_v22, 0.0 }
 0x528   : > { %v3778_v17 = vsel %vm1918_vm12, %v3650_v5, 0.0  ;;  %v3912_v13 = vmax.f32 %v3911_v4, %v3775_v50  ;;  %v3954_v2 = vmax.f32 %v3953_v58, %v3777_v18  ;;  %v3783_v24 = vsel %vm1919_vm13, %v3655_v38, 0.0  ;;  %v3391_v47 = vpop.f32.mrf.mxu0  ;;  %v3552_v49 = vpop.f32.mrf.mxu1 }
 0x529   : > { %v3785_v1 = vsel %vm1919_vm13, %v3657_v48, 0.0  ;;  %v3933_v10 = vmax.f32 %v3932_v34, %v3776_v63  ;;  %v3975_v16 = vmax.f32 %v3974_v28, %v3778_v17  ;;  %v3656_v62 = vmax.f32 %v3376_v7, 0.0 }
 0x52a   : > { %v3658_v23 = vmax.f32 %v3537_v33, 0.0  ;;  %v3380_v44 = vadd.f32 %v3379_v19, %v6121_v37  ;;  %v3541_v40 = vadd.f32 %v3540_v21, %v6125_v15  ;;  %v3382_v53 = vadd.f32 %v3381_v57, %v6155_v29  ;;  %v3393_v31 = vpop.f32.mrf.mxu0  ;;  %v3554_v11 = vpop.f32.mrf.mxu1 }
 0x52b   : > { %v3543_v20 = vadd.f32 %v3542_v43, %v6159_v61  ;;  %v3913_v27 = vmax.f32 %v3912_v13, %v3783_v24  ;;  %v3955_v39 = vmax.f32 %v3954_v2, %v3785_v1  ;;  %v3386_v42 = vadd.f32 %v3385_v41, %v6121_v37 }
 0x52c   : > { %v3547_v46 = vadd.f32 %v3546_v59, %v6125_v15  ;;  %v3784_v14 = vsel %vm1919_vm13, %v3656_v62, 0.0  ;;  %v3786_v19 = vsel %vm1919_vm13, %v3658_v23, 0.0  ;;  %v3663_v54 = vmax.f32 %v3380_v44, 0.0  ;;  %v3397_v51 = vpop.f32.mrf.mxu0  ;;  %v3558_v41 = vpop.f32.mrf.mxu1 }
 0x52d   : > { %v3665_v21 = vmax.f32 %v3541_v40, 0.0  ;;  %v3664_v60 = vmax.f32 %v3382_v53, 0.0  ;;  %v3666_v36 = vmax.f32 %v3543_v20, 0.0  ;;  %v3671_v57 = vmax.f32 %v3386_v42, 0.0 }
 0x52e   : > { %v3673_v43 = vmax.f32 %v3547_v46, 0.0  ;;  %vm6617_vm2 = vcmp.lt.s32.totalorder %v5407_v9, 250  ;;  %v3388_v56 = vadd.f32 %v3387_v6, %v6155_v29  ;;  %v3549_v3 = vadd.f32 %v3548_v52, %v6159_v61  ;;  %v3399_v13 = vpop.f32.mrf.mxu0  ;;  %v3560_v2 = vpop.f32.mrf.mxu1 }
 0x52f   : > { %v3791_v4 = vsel %vm6617_vm2, %v3663_v54, 0.0  ;;  %vm6618_vm3 = vmmov %vm6617_vm2  ;;  %v3934_v45 = vmax.f32 %v3933_v10, %v3784_v14  ;;  %v3976_v26 = vmax.f32 %v3975_v16, %v3786_v19  ;;  %vm6621_vm6 = vcmp.lt.s32.totalorder %v5415_v30, 250 }
 0x530   : > { %v3793_v58 = vsel %vm6618_vm3, %v3665_v21, 0.0  ;;  %vm6619_vm4 = vmmov %vm6617_vm2  ;;  %v3914_v59 = vmax.f32 %v3913_v27, %v3791_v4  ;;  %v3799_v5 = vsel %vm6621_vm6, %v3671_v57, 0.0  ;;  %v3672_v18 = vmax.f32 %v3388_v56, 0.0 }
 0x531   : > { %v3792_v8 = vsel %vm6619_vm4, %v3664_v60, 0.0  ;;  %vm6620_vm5 = vmmov %vm6617_vm2  ;;  %v3956_v22 = vmax.f32 %v3955_v39, %v3793_v58  ;;  %v3674_v7 = vmax.f32 %v3549_v3, 0.0  ;;  %v3392_v33 = vadd.f32 %v3391_v47, %v6121_v37 }
 0x532   : > { %v3794_v25 = vsel %vm6620_vm5, %v3666_v36, 0.0  ;;  %vm6622_vm7 = vmmov %vm6621_vm6  ;;  %v3935_v48 = vmax.f32 %v3934_v45, %v3792_v8  ;;  %v3553_v6 = vadd.f32 %v3552_v49, %v6125_v15  ;;  %v3394_v9 = vadd.f32 %v3393_v31, %v6155_v29 }
 0x533   : > { %v3801_v38 = vsel %vm6622_vm7, %v3673_v43, 0.0  ;;  %v3977_v50 = vmax.f32 %v3976_v26, %v3794_v25  ;;  %v3555_v52 = vadd.f32 %v3554_v11, %v6159_v61  ;;  %v3915_v34 = vmax.f32 %v3914_v59, %v3799_v5  ;;  %vm6623_vm8 = vmmov %vm6621_vm6 }
 0x534   : > { %v3957_v28 = vmax.f32 %v3956_v22, %v3801_v38  ;;  %v3398_v63 = vadd.f32 %v3397_v51, %v6121_v37  ;;  %v3559_v17 = vadd.f32 %v3558_v41, %v6125_v15  ;;  %v3800_v24 = vsel %vm6623_vm8, %v3672_v18, 0.0  ;;  %vm6624_vm9 = vmmov %vm6621_vm6 }
 0x535   : > { %v3802_v1 = vsel %vm6624_vm9, %v3674_v7, 0.0  ;;  %v3679_v47 = vmax.f32 %v3392_v33, 0.0  ;;  %v3681_v49 = vmax.f32 %v3553_v6, 0.0  ;;  %v3680_v10 = vmax.f32 %v3394_v9, 0.0 }
 0x536   : > { %v3682_v16 = vmax.f32 %v3555_v52, 0.0  ;;  %v3687_v62 = vmax.f32 %v3398_v63, 0.0  ;;  %v3689_v23 = vmax.f32 %v3559_v17, 0.0  ;;  %vm6625_vm10 = vcmp.lt.s32.totalorder %v5418_v32, 250 }
 0x537   : > { %v3807_v44 = vsel %vm6625_vm10, %v3679_v47, 0.0  ;;  %vm6626_vm11 = vmmov %vm6625_vm10  ;;  %v3400_v15 = vadd.f32 %v3399_v13, %v6155_v29  ;;  %v3561_v40 = vadd.f32 %v3560_v2, %v6159_v61  ;;  %v3936_v39 = vmax.f32 %v3935_v48, %v3800_v24 }
 0x538   : > { %v3809_v37 = vsel %vm6626_vm11, %v3681_v49, 0.0  ;;  %v3916_v53 = vmax.f32 %v3915_v34, %v3807_v44  ;;  %vm6627_vm12 = vmmov %vm6625_vm10  ;;  %v3978_v42 = vmax.f32 %v3977_v50, %v3802_v1  ;;  %v3815_v46 = vsel %vm6629_vm14, %v3687_v62, 0.0 }
 0x539   : > { %v3958_v20 = vmax.f32 %v3957_v28, %v3809_v37  ;;  %v3808_v30 = vsel %vm6627_vm12, %v3680_v10, 0.0  ;;  %vm6628_vm13 = vmmov %vm6625_vm10  ;;  %v3817_v31 = vsel %vm6630_vm15, %v3689_v23, 0.0  ;;  %v3688_v14 = vmax.f32 %v3400_v15, 0.0 }
 0x53a   : > { %v3810_v27 = vsel %vm6628_vm13, %v3682_v16, 0.0  ;;  %v3917_v11 = vmax.f32 %v3916_v53, %v3815_v46  ;;  %v3690_v61 = vmax.f32 %v3561_v40, 0.0  ;;  %v3937_v19 = vmax.f32 %v3936_v39, %v3808_v30  ;;  %v3996_v16 = vld [vmem:[#allocation6 + $0x1] ss:$2 sm:$0xff] }
 0x53b   : > { %v3959_v29 = vmax.f32 %v3958_v20, %v3817_v31  ;;  %v3979_v54 = vmax.f32 %v3978_v42, %v3810_v27  ;;  %v4015_v21 = vrot.slane %v6365_v0, %v5662_v12  ;;  %v4022_v32 = vrot.slane %v6367_v55, %v5662_v12 }
 0x53c   : > { %v3918_v60 = vrot.slane %v3917_v11, 4  ;;  %v3816_v57 = vsel %vm6631_vm1, %v3688_v14, 0.0  ;;  %v3818_v43 = vsel %vm6616_vm0, %v3690_v61, 0.0 }
 0x53d   : > { %v3960_v36 = vrot.slane %v3959_v29, 4  ;;  %v3938_v4 = vmax.f32 %v3937_v19, %v3816_v57  ;;  %v3980_v58 = vmax.f32 %v3979_v54, %v3818_v43  ;;  %v4037_v56 = vcombine.low %v4015_v21, %v4022_v32 }
 0x53e   : > { %v3919_v3 = vmax.f32 %v3917_v11, %v3918_v60 }
 0x53f   : > { %v3961_v45 = vmax.f32 %v3959_v29, %v3960_v36  ;;  %v3939_v26 = vrot.slane %v3938_v4, 4  ;;  %v3981_v8 = vrot.slane %v3980_v58, 4  ;;  %v4045_v49 = vrot.slane %v4037_v56, %v5662_v12 }
 0x540   : > { %v3920_v25 = vrot.slane %v3919_v3, 2 }
 0x541   : > { %v3962_v0 = vrot.slane %v3961_v45, 2  ;;  %v3940_v51 = vmax.f32 %v3938_v4, %v3939_v26  ;;  %v3982_v41 = vmax.f32 %v3980_v58, %v3981_v8 }
 0x542   : > { %v3921_v55 = vmax.f32 %v3919_v3, %v3920_v25 }
 0x543   : > { %v3963_v59 = vmax.f32 %v3961_v45, %v3962_v0  ;;  %v3941_v22 = vrot.slane %v3940_v51, 2  ;;  %v3983_v5 = vrot.slane %v3982_v41, 2 }
 0x544   : > { %v3922_v38 = vrot.slane %v3921_v55, 1 }
 0x545   : > { %v3964_v48 = vrot.slane %v3963_v59, 1  ;;  %v3942_v50 = vmax.f32 %v3940_v51, %v3941_v22  ;;  %v3984_v35 = vmax.f32 %v3982_v41, %v3983_v5 }
 0x546   : > { %v3923_v18 = vmax.f32 %v3921_v55, %v3922_v38 }
 0x547   : > { %v3965_v7 = vmax.f32 %v3963_v59, %v3964_v48  ;;  %v3943_v33 = vrot.slane %v3942_v50, 1  ;;  %v3985_v6 = vrot.slane %v3984_v35, 1 }
 0x548   : > { %v3991_v34 = vmax.f32 %v3923_v18, 0.0 }
 0x549   : > { %v3944_v9 = vmax.f32 %v3942_v50, %v3943_v33  ;;  %v3986_v52 = vmax.f32 %v3984_v35, %v3985_v6  ;;  %v3993_v28 = vmax.f32 %v3965_v7, 0.0 }
 0x54b   : > { %v3992_v63 = vmax.f32 %v3944_v9, 0.0  ;;  %v3994_v17 = vmax.f32 %v3986_v52, 0.0 }
 0x54d   : > { %v4007_v13 = vcombine.low %v3991_v34, %v3992_v63  ;;  %v4008_v2 = vcombine.low %v3993_v28, %v3994_v17 }
 0x54f   : > { %v4029_v24 = vrot.slane %v4007_v13, %v5662_v12  ;;  %v4036_v1 = vrot.slane %v4008_v2, %v5662_v12 }
 0x551   : > { %v4038_v47 = vcombine.low %v4029_v24, %v4036_v1 }
 0x553   : > { %v4052_v10 = vrot.slane %v4038_v47, %v5662_v12 }
 0x555   : > { %v4053_v62 = vcombine.low %v4045_v49, %v4052_v10 }
 0x557   : > { %v4055_v23 = vmax.f32 %v3996_v16, %v4053_v62 }
 0x559   : > { %4056 = vst [vmem:[#allocation6 + $0x1] ss:$2 sm:$0xff] %v4055_v23 }
 0x55a   : > { %4594 = shalt.err (!%p4591_p0)
}
 0x55b   : > { %4497 = dma.vmem_to_hbm [thread:$0]  (%p6537_p7), %s4068_s21, 256, %s6574_s7, [#allocation5]  }
 0x55c   : > { %4630 = dma.done.wait (%p6537_p7), [#allocation5], 256  }
 0x55d   : > { %4632 = vsyncadd (%p6537_p7), [#allocation5], 4294967040 }
 0x55e PF: > { %s19_s28 = sadd.s32 1, %s4651_s28   ;;  %s6633_s24 = smov %s4639_s25 }
 0x55f   : > { %p16_p1 = scmp.ge.s32.totalorder %s19_s28, 4   ;;  %s6634_s25 = smov %s4752_s13 }
 0x560   : > { %s6635_s26 = smov %s4647_s27  ;;  %s6636_s27 = smov %s6638_s30 }
 0x561   :  { %18 = sbr.rel (!%p16_p1) target bundleno = 4 (0x4), region = 130 }
 0x566   :  { %4080 = vsyncpa [#allocation4], 1 }
 0x567   :  { %4082 = vsyncpa [#allocation4 + $0x1], 1 }
 0x568   :  { %4083 = vsyncpa [#allocation5], 1 }
 0x569   :  { %4085 = vsyncpa [#allocation5 + $0x1], 1 }

</bundles_post_ra>
